<compile_context>
chip_gen: v7x
topology: tpu7x:2x2x1
jax: 0.10.0
libtpu: 0.0.40
codegen_flags: <defaults>
</compile_context>

<pallas_src>
import functools

import jax
import jax.numpy as jnp
from jax.experimental import pallas as pl
from jax.experimental.pallas import tpu as pltpu


def _zero_map2(i):
    return (0, 0)


def _lstm_kernel(x2d_ref,                 # (T*Bp, I)   time-major flattened input (f32)
                 w_ih0_ref,               # (I, 4*Hp)   gate blocks lane-aligned
                 w_hh0_ref,               # (Hp, 4*Hp)
                 b0_ref,                  # (1, 4*Hp)   f32
                 w_ih1_hbm,               # (Hp, 4*Hp)  pl.ANY (manual DMA)
                 w_hh1_hbm,               # (Hp, 4*Hp)  pl.ANY (manual DMA)
                 b1_ref,                  # (1, 4*Hp)   f32
                 gamma_ref, beta_ref,     # (1, Hp)     f32
                 fc_w_hbm,                # (Hp, Cp)    pl.ANY (manual DMA)
                 fc_b_ref,                # (1, Cp)     f32
                 out_ref,                 # (Bp, Cp)    f32
                 z0_ref,                  # VMEM (T*Bp, 4*Hp) f32 scratch
                 w_ih1_ref,               # VMEM (Hp, 4*Hp)   scratch
                 w_hh1_ref,               # VMEM (Hp, 4*Hp)   scratch
                 fc_w_ref,                # VMEM (Hp, Cp)     scratch
                 dma_sem,                 # DMA semaphores (3,)
                 *, hidden):
    f32 = jnp.float32
    Bp = out_ref.shape[0]                 # padded batch (8 sublanes)
    T = x2d_ref.shape[0] // Bp
    Hp = w_hh0_ref.shape[0]               # padded hidden (multiple of 128)
    G = 4 * Hp
    wdt = w_hh0_ref.dtype                 # MXU operand dtype (bf16 or f32)

    # ---- kick off manual weight DMAs so they overlap the prologue / step 0 ----
    cp_ih1 = pltpu.make_async_copy(w_ih1_hbm, w_ih1_ref, dma_sem.at[0])
    cp_hh1 = pltpu.make_async_copy(w_hh1_hbm, w_hh1_ref, dma_sem.at[1])
    cp_fc = pltpu.make_async_copy(fc_w_hbm, fc_w_ref, dma_sem.at[2])
    cp_ih1.start()
    cp_hh1.start()
    cp_fc.start()

    # ---- prologue: layer-0 input projection for ALL timesteps (bias folded) ----
    z0_ref[...] = jnp.dot(x2d_ref[...].astype(wdt), w_ih0_ref[...],
                          preferred_element_type=f32) + b0_ref[...]

    def gate_slices(g):
        # Lane-aligned whole-vreg slices: each gate is its own 128-wide block.
        return (g[:, 0 * Hp:1 * Hp], g[:, 1 * Hp:2 * Hp],
                g[:, 2 * Hp:3 * Hp], g[:, 3 * Hp:4 * Hp])

    # Hoisted bias broadcast (JAX does not CSE broadcast_in_dim inside loops).
    b1_b = jnp.broadcast_to(b1_ref[...], (Bp, G)).astype(f32)

    # ---- recurrence: fully unrolled (T=8); h/c carried as values (vregs) ----
    h0 = jnp.zeros((Bp, Hp), f32)
    c0 = jnp.zeros((Bp, Hp), f32)
    h1 = jnp.zeros((Bp, Hp), f32)
    c1 = jnp.zeros((Bp, Hp), f32)
    # Off-chain layer-1 partial: h1_prev @ W_hh1 + b1.  h1_prev = 0 at t = 0.
    hh1_acc = b1_b
    # TODO(synk): if T ever grows beyond ~16, switch this Python unroll to
    # lax.fori_loop(..., unroll=2..4) with pl.ds(pl.multiple_of(t*Bp, Bp), Bp).

    for t in range(T):
        # Layer 0: input projection precomputed; only h0 @ W_hh0 on the chain.
        gates0 = z0_ref[t * Bp:(t + 1) * Bp, :] + jnp.dot(
            h0.astype(wdt), w_hh0_ref[...], preferred_element_type=f32)
        i0, f0, g0, o0 = gate_slices(gates0)
        c0 = jax.nn.sigmoid(f0) * c0 + jax.nn.sigmoid(i0) * jnp.tanh(g0)
        h0 = jax.nn.sigmoid(o0) * jnp.tanh(c0)

        # Layer 1: only h0_new @ W_ih1 (single K=128 MXU pass) on the chain;
        # the h1_prev @ W_hh1 (+ b1) half was issued at the end of step t-1.
        if t == 0:
            cp_ih1.wait()
            cp_hh1.wait()
        gates1 = hh1_acc + jnp.dot(h0.astype(wdt), w_ih1_ref[...],
                                   preferred_element_type=f32)
        i1, f1, g1, o1 = gate_slices(gates1)
        c1 = jax.nn.sigmoid(f1) * c1 + jax.nn.sigmoid(i1) * jnp.tanh(g1)
        h1 = jax.nn.sigmoid(o1) * jnp.tanh(c1)

        # Off-chain: precompute next step's h1 @ W_hh1 (+ b1) right away; it
        # only depends on this step's h1 so it overlaps the next layer-0 matmul.
        if t + 1 < T:
            hh1_acc = jnp.dot(h1.astype(wdt), w_hh1_ref[...],
                              preferred_element_type=f32) + b1_b

    # ---- epilogue: LayerNorm over the real `hidden` lanes + ReLU + Linear ----
    # Padded lanes of h1 are exactly 0 by construction (zero-padded gate
    # columns and f32 biases); mask anyway as cheap insurance.
    lane = jax.lax.broadcasted_iota(jnp.int32, (1, Hp), 1)
    mask = lane < hidden
    h1m = jnp.where(mask, h1, 0.0)
    mean = jnp.sum(h1m, axis=-1, keepdims=True) / hidden
    centered = jnp.where(mask, h1m - mean, 0.0)
    var = jnp.sum(centered * centered, axis=-1, keepdims=True) / hidden
    y = centered * jax.lax.rsqrt(var + 1e-5) * gamma_ref[...] + beta_ref[...]
    y = jnp.maximum(y, 0.0)                                           # ReLU

    cp_fc.wait()
    out = jnp.dot(y.astype(wdt), fc_w_ref[...],
                  preferred_element_type=f32) + fc_b_ref[...]
    out_ref[...] = out.astype(out_ref.dtype)                          # (8,128) lane-dense


def eye_state_double_lstm_182(x, packed, *, hidden, num_classes):
    """x: (B, T, I) float32. Returns (B, num_classes) float32."""
    B, T, I = x.shape
    Bp = 8                                                  # sublane-aligned batch
    Hp = packed["w_hh0"].shape[0]
    Cp = packed["fc_w"].shape[1]
    wdt = packed["w_hh0"].dtype

    # Layout plumbing only: zero-pad batch to 8 rows and flatten time-major so
    # every per-step slab is a whole-vreg sublane block inside the kernel.
    xp = jnp.zeros((Bp, T, I), jnp.float32).at[:B].set(x)
    x_flat = jnp.transpose(xp, (1, 0, 2)).reshape(T * Bp, I)

    args = [x_flat, packed["w_ih0"], packed["w_hh0"], packed["b0"],
            packed["w_ih1"], packed["w_hh1"], packed["b1"],
            packed["gamma"], packed["beta"], packed["fc_w"], packed["fc_b"]]

    manual_dma = {4, 5, 9}   # w_ih1, w_hh1, fc_w: hand-copied inside the kernel
    in_specs = []
    for idx, a in enumerate(args):
        if idx in manual_dma:
            in_specs.append(pl.BlockSpec(memory_space=pl.ANY))
        else:
            in_specs.append(pl.BlockSpec(a.shape, _zero_map2))

    grid_spec = pltpu.PrefetchScalarGridSpec(
        num_scalar_prefetch=0,
        grid=(1,),                          # single invocation; loop is in-kernel
        in_specs=in_specs,
        out_specs=pl.BlockSpec((Bp, Cp), _zero_map2),
        scratch_shapes=[
            pltpu.VMEM((T * Bp, 4 * Hp), jnp.float32),      # z0 (time-parallel proj)
            pltpu.VMEM((Hp, 4 * Hp), wdt),                  # w_ih1 landing buffer
            pltpu.VMEM((Hp, 4 * Hp), wdt),                  # w_hh1 landing buffer
            pltpu.VMEM((Hp, Cp), wdt),                      # fc_w  landing buffer
            pltpu.SemaphoreType.DMA((3,)),
        ],
    )

    out = pl.pallas_call(
        functools.partial(_lstm_kernel, hidden=hidden),
        out_shape=jax.ShapeDtypeStruct((Bp, Cp), jnp.float32),
        grid_spec=grid_spec,
        compiler_params=pltpu.CompilerParams(
            dimension_semantics=("arbitrary",)),
    )(*args)
    return out[:B, :num_classes]


# --------------------------------------------------------------------------
# Parameter construction (PyTorch-layout raw params) and kernel-layout packing
# --------------------------------------------------------------------------
def init_raw_params(key, input_size, hidden, num_classes):
    """Deterministic synthetic parameters in PyTorch nn.LSTM/Linear layout."""
    H, I, C = hidden, input_size, num_classes
    k = 1.0 / (float(H) ** 0.5)
    keys = jax.random.split(key, 16)
    ki = iter(keys)
    u = lambda shape: jax.random.uniform(next(ki), shape, jnp.float32, -k, k)

    raw = {}
    in_sizes = [I, H]
    for layer in range(2):
        raw[f"w_ih_l{layer}"] = u((4 * H, in_sizes[layer]))
        raw[f"w_hh_l{layer}"] = u((4 * H, H))
        raw[f"b_ih_l{layer}"] = u((4 * H,))
        raw[f"b_hh_l{layer}"] = u((4 * H,))
    # nn.LayerNorm default is weight=1, bias=0; perturb slightly so the packing
    # of gamma/beta is actually exercised by the check.
    raw["ln_w"] = 1.0 + 0.1 * jax.random.normal(next(ki), (H,), jnp.float32)
    raw["ln_b"] = 0.1 * jax.random.normal(next(ki), (H,), jnp.float32)
    raw["fc_w"] = u((C, H))
    raw["fc_b"] = u((C,))
    return raw


def pack_params(raw, *, hidden, num_classes, param_dtype=jnp.bfloat16):
    """PyTorch-layout params -> padded, lane-aligned kernel layout.

    Hidden is padded to a multiple of 128 (Hp); each gate occupies its own
    128-wide column block [g*Hp : g*Hp+hidden] (zeros elsewhere).  num_classes
    is padded to 128 lanes for a lane-dense epilogue store.  LSTM / FC weights
    are stored in `param_dtype` (bf16 for MXU-friendly operands); biases and
    LayerNorm params stay f32 so padded lanes remain exactly zero.
    """
    H, C = hidden, num_classes
    Hp = ((H + 127) // 128) * 128
    Cp = ((C + 127) // 128) * 128
    G = 4 * Hp

    def pack_w(w, in_rows):
        # w: (4H, in_dim) PyTorch layout -> (in_rows, 4*Hp), transposed.
        in_dim = w.shape[1]
        out = jnp.zeros((in_rows, G), jnp.float32)
        for g in range(4):
            out = out.at[:in_dim, g * Hp:g * Hp + H].set(
                w[g * H:(g + 1) * H, :].T)
        return out.astype(param_dtype)

    def pack_b(b_ih, b_hh):
        b = (b_ih + b_hh).astype(jnp.float32)
        out = jnp.zeros((1, G), jnp.float32)
        for g in range(4):
            out = out.at[0, g * Hp:g * Hp + H].set(b[g * H:(g + 1) * H])
        return out

    I = raw["w_ih_l0"].shape[1]
    return {
        "w_ih0": pack_w(raw["w_ih_l0"], I),                        # (I, G)
        "w_hh0": pack_w(raw["w_hh_l0"], Hp),                       # (Hp, G)
        "b0": pack_b(raw["b_ih_l0"], raw["b_hh_l0"]),              # (1, G)
        "w_ih1": pack_w(raw["w_ih_l1"], Hp),                       # (Hp, G)
        "w_hh1": pack_w(raw["w_hh_l1"], Hp),                       # (Hp, G)
        "b1": pack_b(raw["b_ih_l1"], raw["b_hh_l1"]),              # (1, G)
        "gamma": jnp.zeros((1, Hp), jnp.float32).at[0, :H].set(raw["ln_w"]),
        "beta": jnp.zeros((1, Hp), jnp.float32).at[0, :H].set(raw["ln_b"]),
        "fc_w": jnp.zeros((Hp, Cp), jnp.float32)
                   .at[:H, :C].set(raw["fc_w"].T).astype(param_dtype),
        "fc_b": jnp.zeros((1, Cp), jnp.float32).at[0, :C].set(raw["fc_b"]),
    }


# --------------------------------------------------------------------------
# Pure-JAX reference (mirrors the PyTorch forward) for validation
# --------------------------------------------------------------------------
def reference_forward(x, raw, *, hidden, num_classes):
    H = hidden
    B, T, I = x.shape

    def run_layer(seq, layer):
        w_ih = raw[f"w_ih_l{layer}"]
        w_hh = raw[f"w_hh_l{layer}"]
        b = raw[f"b_ih_l{layer}"] + raw[f"b_hh_l{layer}"]

        def step(carry, x_t):
            h, c = carry
            gates = x_t @ w_ih.T + h @ w_hh.T + b
            i_g = jax.nn.sigmoid(gates[:, 0 * H:1 * H])
            f_g = jax.nn.sigmoid(gates[:, 1 * H:2 * H])
            g_g = jnp.tanh(gates[:, 2 * H:3 * H])
            o_g = jax.nn.sigmoid(gates[:, 3 * H:4 * H])
            c_new = f_g * c + i_g * g_g
            h_new = o_g * jnp.tanh(c_new)
            return (h_new, c_new), h_new

        init = (jnp.zeros((B, H), jnp.float32), jnp.zeros((B, H), jnp.float32))
        _, hs = jax.lax.scan(step, init, jnp.swapaxes(seq, 0, 1))
        return jnp.swapaxes(hs, 0, 1)

    out = x
    for layer in range(2):
        out = run_layer(out, layer)
    mean = jnp.mean(out, axis=-1, keepdims=True)
    var = jnp.mean((out - mean) ** 2, axis=-1, keepdims=True)
    out = (out - mean) * jax.lax.rsqrt(var + 1e-5)
    out = out * raw["ln_w"] + raw["ln_b"]
    out = jnp.maximum(out[:, -1, :], 0.0)
    return out @ raw["fc_w"].T + raw["fc_b"]


if __name__ == "__main__":
    # Small shapes consistent with the module: input_size=4, hidden_size=32
    # -> LSTM hidden = 32 + 64 = 96 (padded to 128), num_classes=2, B=2, T=8.
    input_size, hidden_size, num_classes = 4, 32, 2
    hidden = hidden_size + 64
    B, T = 2, 8

    key = jax.random.PRNGKey(0)
    kx, kp = jax.random.split(key)
    x = jax.random.normal(kx, (B, T, input_size), jnp.float32)
    raw = init_raw_params(kp, input_size, hidden, num_classes)
    ref = reference_forward(x, raw, hidden=hidden, num_classes=num_classes)

    # 1) f32 weights: tight numerical check of the kernel math itself.
    packed_f32 = pack_params(raw, hidden=hidden, num_classes=num_classes,
                             param_dtype=jnp.float32)
    out_f32 = jax.block_until_ready(
        eye_state_double_lstm_182(x, packed_f32, hidden=hidden,
                                  num_classes=num_classes))
    assert out_f32.shape == (B, num_classes)
    assert jnp.allclose(out_f32, ref, rtol=1e-3, atol=1e-3), (out_f32, ref)

    # 2) bf16 weights (shipped perf config: bf16 MXU operands, f32 accumulate).
    #    Looser tolerance vs the f32 reference — the delta is quantization of
    #    the bf16 operands, not a kernel bug (the f32 path above pins that).
    packed_bf16 = pack_params(raw, hidden=hidden, num_classes=num_classes,
                              param_dtype=jnp.bfloat16)
    out_bf16 = jax.block_until_ready(
        eye_state_double_lstm_182(x, packed_bf16, hidden=hidden,
                                  num_classes=num_classes))
    assert out_bf16.shape == (B, num_classes)
    assert jnp.allclose(out_bf16, ref, rtol=3e-2, atol=3e-2), (out_bf16, ref)

    print("KERNEL_OK")
</pallas_src>

<mosaic_0001>
module attributes {stable_mosaic.version = 11 : i64} {
  func.func @_lstm_kernel(%arg0: i32, %arg1: memref<64x4xf32, #tpu.memory_space<vmem>>, %arg2: memref<4x512xf32, #tpu.memory_space<vmem>>, %arg3: memref<128x512xf32, #tpu.memory_space<vmem>>, %arg4: memref<1x512xf32, #tpu.memory_space<vmem>>, %arg5: memref<128x512xf32, #tpu.memory_space<any>>, %arg6: memref<128x512xf32, #tpu.memory_space<any>>, %arg7: memref<1x512xf32, #tpu.memory_space<vmem>>, %arg8: memref<1x128xf32, #tpu.memory_space<vmem>>, %arg9: memref<1x128xf32, #tpu.memory_space<vmem>>, %arg10: memref<128x128xf32, #tpu.memory_space<any>>, %arg11: memref<1x128xf32, #tpu.memory_space<vmem>>, %arg12: memref<8x128xf32, #tpu.memory_space<vmem>>, %arg13: memref<64x512xf32, #tpu.memory_space<vmem>>, %arg14: memref<128x512xf32, #tpu.memory_space<vmem>>, %arg15: memref<128x512xf32, #tpu.memory_space<vmem>>, %arg16: memref<128x128xf32, #tpu.memory_space<vmem>>, %arg17: memref<3x!tpu.dma_semaphore, #tpu.memory_space<semaphore_mem>>) attributes {dimension_semantics = [#tpu.dimension_semantics<arbitrary>], iteration_bounds = array<i64: 1>, scalar_prefetch = 0 : i64, scratch_operands = 5 : i64, tpu.core_type = #tpu.core_type<tc>, window_params = [{pipeline_mode = #tpu.pipeline_mode<synchronous>, transform_indices = @transform_0, window_bounds = array<i64: 64, 4>}, {pipeline_mode = #tpu.pipeline_mode<synchronous>, transform_indices = @transform_1, window_bounds = array<i64: 4, 512>}, {pipeline_mode = #tpu.pipeline_mode<synchronous>, transform_indices = @transform_2, window_bounds = array<i64: 128, 512>}, {pipeline_mode = #tpu.pipeline_mode<synchronous>, transform_indices = @transform_3, window_bounds = array<i64: 1, 512>}, {}, {}, {pipeline_mode = #tpu.pipeline_mode<synchronous>, transform_indices = @transform_6, window_bounds = array<i64: 1, 512>}, {pipeline_mode = #tpu.pipeline_mode<synchronous>, transform_indices = @transform_7, window_bounds = array<i64: 1, 128>}, {pipeline_mode = #tpu.pipeline_mode<synchronous>, transform_indices = @transform_8, window_bounds = array<i64: 1, 128>}, {}, {pipeline_mode = #tpu.pipeline_mode<synchronous>, transform_indices = @transform_10, window_bounds = array<i64: 1, 128>}, {pipeline_mode = #tpu.pipeline_mode<synchronous>, transform_indices = @transform_11, window_bounds = array<i64: 8, 128>}]} {
    %c0_i32 = arith.constant 0 : i32
    %0 = tpu.memref_slice %arg17[%c0_i32] : memref<3x!tpu.dma_semaphore, #tpu.memory_space<semaphore_mem>> -> memref<1x!tpu.dma_semaphore, #tpu.memory_space<semaphore_mem>>
    %1 = tpu.memref_squeeze %0 : memref<1x!tpu.dma_semaphore, #tpu.memory_space<semaphore_mem>> -> memref<!tpu.dma_semaphore, #tpu.memory_space<semaphore_mem>>
    tpu.enqueue_dma source(%arg5 : memref<128x512xf32, #tpu.memory_space<any>>) target(%arg14 : memref<128x512xf32, #tpu.memory_space<vmem>>) target_semaphore(%1 : memref<!tpu.dma_semaphore, #tpu.memory_space<semaphore_mem>>)
    %c1_i32 = arith.constant 1 : i32
    %2 = tpu.memref_slice %arg17[%c1_i32] : memref<3x!tpu.dma_semaphore, #tpu.memory_space<semaphore_mem>> -> memref<1x!tpu.dma_semaphore, #tpu.memory_space<semaphore_mem>>
    %3 = tpu.memref_squeeze %2 : memref<1x!tpu.dma_semaphore, #tpu.memory_space<semaphore_mem>> -> memref<!tpu.dma_semaphore, #tpu.memory_space<semaphore_mem>>
    tpu.enqueue_dma source(%arg6 : memref<128x512xf32, #tpu.memory_space<any>>) target(%arg15 : memref<128x512xf32, #tpu.memory_space<vmem>>) target_semaphore(%3 : memref<!tpu.dma_semaphore, #tpu.memory_space<semaphore_mem>>)
    %c2_i32 = arith.constant 2 : i32
    %4 = tpu.memref_slice %arg17[%c2_i32] : memref<3x!tpu.dma_semaphore, #tpu.memory_space<semaphore_mem>> -> memref<1x!tpu.dma_semaphore, #tpu.memory_space<semaphore_mem>>
    %5 = tpu.memref_squeeze %4 : memref<1x!tpu.dma_semaphore, #tpu.memory_space<semaphore_mem>> -> memref<!tpu.dma_semaphore, #tpu.memory_space<semaphore_mem>>
    tpu.enqueue_dma source(%arg10 : memref<128x128xf32, #tpu.memory_space<any>>) target(%arg16 : memref<128x128xf32, #tpu.memory_space<vmem>>) target_semaphore(%5 : memref<!tpu.dma_semaphore, #tpu.memory_space<semaphore_mem>>)
    %c0 = arith.constant 0 : index
    %c0_0 = arith.constant 0 : index
    %6 = vector.load %arg1[%c0, %c0_0] : memref<64x4xf32, #tpu.memory_space<vmem>>, vector<64x4xf32>
    %c0_1 = arith.constant 0 : index
    %c0_2 = arith.constant 0 : index
    %7 = vector.load %arg2[%c0_1, %c0_2] : memref<4x512xf32, #tpu.memory_space<vmem>>, vector<4x512xf32>
    %cst = arith.constant dense<0.000000e+00> : vector<64x512xf32>
    %8 = tpu.matmul %6, %7, %cst {dimension_numbers = #tpu.dot_dimension_numbers<[1], [0], [0], [1], [0, 0, 1, 1], [], []>} : vector<64x4xf32>, vector<4x512xf32>, vector<64x512xf32> -> vector<64x512xf32>
    %c0_3 = arith.constant 0 : index
    %c0_4 = arith.constant 0 : index
    %9 = vector.load %arg4[%c0_3, %c0_4] : memref<1x512xf32, #tpu.memory_space<vmem>>, vector<1x512xf32>
    %10 = vector.broadcast %9 : vector<1x512xf32> to vector<64x512xf32>
    %11 = arith.addf %8, %10 : vector<64x512xf32>
    %c0_5 = arith.constant 0 : index
    %c0_6 = arith.constant 0 : index
    %12 = vector.load %arg13[%c0_5, %c0_6] : memref<64x512xf32, #tpu.memory_space<vmem>>, vector<64x512xf32>
    tpu.vector_store %arg13[%c0_5, %c0_6], %11 {strides = array<i32>} : memref<64x512xf32, #tpu.memory_space<vmem>>, vector<64x512xf32>,
    %c0_7 = arith.constant 0 : index
    %c0_8 = arith.constant 0 : index
    %13 = vector.load %arg7[%c0_7, %c0_8] : memref<1x512xf32, #tpu.memory_space<vmem>>, vector<1x512xf32>
    %14 = vector.shape_cast %13 : vector<1x512xf32> to vector<1x512xf32>
    %15 = vector.broadcast %14 : vector<1x512xf32> to vector<8x512xf32>
    %cst_9 = arith.constant 0.000000e+00 : f32
    %16 = vector.broadcast %cst_9 : f32 to vector<8x128xf32>
    %cst_10 = arith.constant 0.000000e+00 : f32
    %17 = vector.broadcast %cst_10 : f32 to vector<8x128xf32>
    %cst_11 = arith.constant 0.000000e+00 : f32
    %18 = vector.broadcast %cst_11 : f32 to vector<8x128xf32>
    %c0_12 = arith.constant 0 : index
    %c0_13 = arith.constant 0 : index
    %19 = vector.load %arg13[%c0_12, %c0_13] : memref<64x512xf32, #tpu.memory_space<vmem>>, vector<8x512xf32>
    %c0_14 = arith.constant 0 : index
    %c0_15 = arith.constant 0 : index
    %20 = vector.load %arg3[%c0_14, %c0_15] : memref<128x512xf32, #tpu.memory_space<vmem>>, vector<128x512xf32>
    %cst_16 = arith.constant dense<0.000000e+00> : vector<8x512xf32>
    %21 = tpu.matmul %16, %20, %cst_16 {dimension_numbers = #tpu.dot_dimension_numbers<[1], [0], [0], [1], [0, 0, 1, 1], [], []>} : vector<8x128xf32>, vector<128x512xf32>, vector<8x512xf32> -> vector<8x512xf32>
    %22 = arith.addf %19, %21 : vector<8x512xf32>
    %23 = vector.extract_strided_slice %22 {offsets = [0, 0], sizes = [8, 128], strides = [1, 1]} : vector<8x512xf32> to vector<8x128xf32>
    %24 = vector.extract_strided_slice %22 {offsets = [0, 128], sizes = [8, 128], strides = [1, 1]} : vector<8x512xf32> to vector<8x128xf32>
    %25 = vector.extract_strided_slice %22 {offsets = [0, 256], sizes = [8, 128], strides = [1, 1]} : vector<8x512xf32> to vector<8x128xf32>
    %26 = vector.extract_strided_slice %22 {offsets = [0, 384], sizes = [8, 128], strides = [1, 1]} : vector<8x512xf32> to vector<8x128xf32>
    %27 = arith.negf %24 : vector<8x128xf32>
    %28 = math.exp %27 : vector<8x128xf32>
    %cst_17 = arith.constant 1.000000e+00 : f32
    %29 = vector.broadcast %cst_17 : f32 to vector<8x128xf32>
    %30 = arith.addf %29, %28 : vector<8x128xf32>
    %31 = arith.divf %29, %30 : vector<8x128xf32>
    %32 = arith.mulf %31, %17 : vector<8x128xf32>
    %33 = arith.negf %23 : vector<8x128xf32>
    %34 = math.exp %33 : vector<8x128xf32>
    %cst_18 = arith.constant 1.000000e+00 : f32
    %35 = vector.broadcast %cst_18 : f32 to vector<8x128xf32>
    %36 = arith.addf %35, %34 : vector<8x128xf32>
    %37 = arith.divf %35, %36 : vector<8x128xf32>
    %38 = math.tanh %25 : vector<8x128xf32>
    %39 = arith.mulf %37, %38 : vector<8x128xf32>
    %40 = arith.addf %32, %39 : vector<8x128xf32>
    %41 = arith.negf %26 : vector<8x128xf32>
    %42 = math.exp %41 : vector<8x128xf32>
    %cst_19 = arith.constant 1.000000e+00 : f32
    %43 = vector.broadcast %cst_19 : f32 to vector<8x128xf32>
    %44 = arith.addf %43, %42 : vector<8x128xf32>
    %45 = arith.divf %43, %44 : vector<8x128xf32>
    %46 = math.tanh %40 : vector<8x128xf32>
    %47 = arith.mulf %45, %46 : vector<8x128xf32>
    %c0_i32_20 = arith.constant 0 : i32
    %48 = tpu.memref_slice %arg17[%c0_i32_20] : memref<3x!tpu.dma_semaphore, #tpu.memory_space<semaphore_mem>> -> memref<1x!tpu.dma_semaphore, #tpu.memory_space<semaphore_mem>>
    %49 = tpu.memref_squeeze %48 : memref<1x!tpu.dma_semaphore, #tpu.memory_space<semaphore_mem>> -> memref<!tpu.dma_semaphore, #tpu.memory_space<semaphore_mem>>
    tpu.wait_dma2 semaphore(%49 : memref<!tpu.dma_semaphore, #tpu.memory_space<semaphore_mem>>) src(%arg5 : memref<128x512xf32, #tpu.memory_space<any>>) dst(%arg14 : memref<128x512xf32, #tpu.memory_space<vmem>>)
    %c1_i32_21 = arith.constant 1 : i32
    %50 = tpu.memref_slice %arg17[%c1_i32_21] : memref<3x!tpu.dma_semaphore, #tpu.memory_space<semaphore_mem>> -> memref<1x!tpu.dma_semaphore, #tpu.memory_space<semaphore_mem>>
    %51 = tpu.memref_squeeze %50 : memref<1x!tpu.dma_semaphore, #tpu.memory_space<semaphore_mem>> -> memref<!tpu.dma_semaphore, #tpu.memory_space<semaphore_mem>>
    tpu.wait_dma2 semaphore(%51 : memref<!tpu.dma_semaphore, #tpu.memory_space<semaphore_mem>>) src(%arg6 : memref<128x512xf32, #tpu.memory_space<any>>) dst(%arg15 : memref<128x512xf32, #tpu.memory_space<vmem>>)
    %c0_22 = arith.constant 0 : index
    %c0_23 = arith.constant 0 : index
    %52 = vector.load %arg14[%c0_22, %c0_23] : memref<128x512xf32, #tpu.memory_space<vmem>>, vector<128x512xf32>
    %cst_24 = arith.constant dense<0.000000e+00> : vector<8x512xf32>
    %53 = tpu.matmul %47, %52, %cst_24 {dimension_numbers = #tpu.dot_dimension_numbers<[1], [0], [0], [1], [0, 0, 1, 1], [], []>} : vector<8x128xf32>, vector<128x512xf32>, vector<8x512xf32> -> vector<8x512xf32>
    %54 = arith.addf %15, %53 : vector<8x512xf32>
    %55 = vector.extract_strided_slice %54 {offsets = [0, 0], sizes = [8, 128], strides = [1, 1]} : vector<8x512xf32> to vector<8x128xf32>
    %56 = vector.extract_strided_slice %54 {offsets = [0, 128], sizes = [8, 128], strides = [1, 1]} : vector<8x512xf32> to vector<8x128xf32>
    %57 = vector.extract_strided_slice %54 {offsets = [0, 256], sizes = [8, 128], strides = [1, 1]} : vector<8x512xf32> to vector<8x128xf32>
    %58 = vector.extract_strided_slice %54 {offsets = [0, 384], sizes = [8, 128], strides = [1, 1]} : vector<8x512xf32> to vector<8x128xf32>
    %59 = arith.negf %56 : vector<8x128xf32>
    %60 = math.exp %59 : vector<8x128xf32>
    %cst_25 = arith.constant 1.000000e+00 : f32
    %61 = vector.broadcast %cst_25 : f32 to vector<8x128xf32>
    %62 = arith.addf %61, %60 : vector<8x128xf32>
    %63 = arith.divf %61, %62 : vector<8x128xf32>
    %64 = arith.mulf %63, %18 : vector<8x128xf32>
    %65 = arith.negf %55 : vector<8x128xf32>
    %66 = math.exp %65 : vector<8x128xf32>
    %cst_26 = arith.constant 1.000000e+00 : f32
    %67 = vector.broadcast %cst_26 : f32 to vector<8x128xf32>
    %68 = arith.addf %67, %66 : vector<8x128xf32>
    %69 = arith.divf %67, %68 : vector<8x128xf32>
    %70 = math.tanh %57 : vector<8x128xf32>
    %71 = arith.mulf %69, %70 : vector<8x128xf32>
    %72 = arith.addf %64, %71 : vector<8x128xf32>
    %73 = arith.negf %58 : vector<8x128xf32>
    %74 = math.exp %73 : vector<8x128xf32>
    %cst_27 = arith.constant 1.000000e+00 : f32
    %75 = vector.broadcast %cst_27 : f32 to vector<8x128xf32>
    %76 = arith.addf %75, %74 : vector<8x128xf32>
    %77 = arith.divf %75, %76 : vector<8x128xf32>
    %78 = math.tanh %72 : vector<8x128xf32>
    %79 = arith.mulf %77, %78 : vector<8x128xf32>
    %c0_28 = arith.constant 0 : index
    %c0_29 = arith.constant 0 : index
    %80 = vector.load %arg15[%c0_28, %c0_29] : memref<128x512xf32, #tpu.memory_space<vmem>>, vector<128x512xf32>
    %cst_30 = arith.constant dense<0.000000e+00> : vector<8x512xf32>
    %81 = tpu.matmul %79, %80, %cst_30 {dimension_numbers = #tpu.dot_dimension_numbers<[1], [0], [0], [1], [0, 0, 1, 1], [], []>} : vector<8x128xf32>, vector<128x512xf32>, vector<8x512xf32> -> vector<8x512xf32>
    %82 = arith.addf %81, %15 : vector<8x512xf32>
    %c8 = arith.constant 8 : index
    %c0_31 = arith.constant 0 : index
    %83 = vector.load %arg13[%c8, %c0_31] : memref<64x512xf32, #tpu.memory_space<vmem>>, vector<8x512xf32>
    %c0_32 = arith.constant 0 : index
    %c0_33 = arith.constant 0 : index
    %84 = vector.load %arg3[%c0_32, %c0_33] : memref<128x512xf32, #tpu.memory_space<vmem>>, vector<128x512xf32>
    %cst_34 = arith.constant dense<0.000000e+00> : vector<8x512xf32>
    %85 = tpu.matmul %47, %84, %cst_34 {dimension_numbers = #tpu.dot_dimension_numbers<[1], [0], [0], [1], [0, 0, 1, 1], [], []>} : vector<8x128xf32>, vector<128x512xf32>, vector<8x512xf32> -> vector<8x512xf32>
    %86 = arith.addf %83, %85 : vector<8x512xf32>
    %87 = vector.extract_strided_slice %86 {offsets = [0, 0], sizes = [8, 128], strides = [1, 1]} : vector<8x512xf32> to vector<8x128xf32>
    %88 = vector.extract_strided_slice %86 {offsets = [0, 128], sizes = [8, 128], strides = [1, 1]} : vector<8x512xf32> to vector<8x128xf32>
    %89 = vector.extract_strided_slice %86 {offsets = [0, 256], sizes = [8, 128], strides = [1, 1]} : vector<8x512xf32> to vector<8x128xf32>
    %90 = vector.extract_strided_slice %86 {offsets = [0, 384], sizes = [8, 128], strides = [1, 1]} : vector<8x512xf32> to vector<8x128xf32>
    %91 = arith.negf %88 : vector<8x128xf32>
    %92 = math.exp %91 : vector<8x128xf32>
    %cst_35 = arith.constant 1.000000e+00 : f32
    %93 = vector.broadcast %cst_35 : f32 to vector<8x128xf32>
    %94 = arith.addf %93, %92 : vector<8x128xf32>
    %95 = arith.divf %93, %94 : vector<8x128xf32>
    %96 = arith.mulf %95, %40 : vector<8x128xf32>
    %97 = arith.negf %87 : vector<8x128xf32>
    %98 = math.exp %97 : vector<8x128xf32>
    %cst_36 = arith.constant 1.000000e+00 : f32
    %99 = vector.broadcast %cst_36 : f32 to vector<8x128xf32>
    %100 = arith.addf %99, %98 : vector<8x128xf32>
    %101 = arith.divf %99, %100 : vector<8x128xf32>
    %102 = math.tanh %89 : vector<8x128xf32>
    %103 = arith.mulf %101, %102 : vector<8x128xf32>
    %104 = arith.addf %96, %103 : vector<8x128xf32>
    %105 = arith.negf %90 : vector<8x128xf32>
    %106 = math.exp %105 : vector<8x128xf32>
    %cst_37 = arith.constant 1.000000e+00 : f32
    %107 = vector.broadcast %cst_37 : f32 to vector<8x128xf32>
    %108 = arith.addf %107, %106 : vector<8x128xf32>
    %109 = arith.divf %107, %108 : vector<8x128xf32>
    %110 = math.tanh %104 : vector<8x128xf32>
    %111 = arith.mulf %109, %110 : vector<8x128xf32>
    %c0_38 = arith.constant 0 : index
    %c0_39 = arith.constant 0 : index
    %112 = vector.load %arg14[%c0_38, %c0_39] : memref<128x512xf32, #tpu.memory_space<vmem>>, vector<128x512xf32>
    %cst_40 = arith.constant dense<0.000000e+00> : vector<8x512xf32>
    %113 = tpu.matmul %111, %112, %cst_40 {dimension_numbers = #tpu.dot_dimension_numbers<[1], [0], [0], [1], [0, 0, 1, 1], [], []>} : vector<8x128xf32>, vector<128x512xf32>, vector<8x512xf32> -> vector<8x512xf32>
    %114 = arith.addf %82, %113 : vector<8x512xf32>
    %115 = vector.extract_strided_slice %114 {offsets = [0, 0], sizes = [8, 128], strides = [1, 1]} : vector<8x512xf32> to vector<8x128xf32>
    %116 = vector.extract_strided_slice %114 {offsets = [0, 128], sizes = [8, 128], strides = [1, 1]} : vector<8x512xf32> to vector<8x128xf32>
    %117 = vector.extract_strided_slice %114 {offsets = [0, 256], sizes = [8, 128], strides = [1, 1]} : vector<8x512xf32> to vector<8x128xf32>
    %118 = vector.extract_strided_slice %114 {offsets = [0, 384], sizes = [8, 128], strides = [1, 1]} : vector<8x512xf32> to vector<8x128xf32>
    %119 = arith.negf %116 : vector<8x128xf32>
    %120 = math.exp %119 : vector<8x128xf32>
    %cst_41 = arith.constant 1.000000e+00 : f32
    %121 = vector.broadcast %cst_41 : f32 to vector<8x128xf32>
    %122 = arith.addf %121, %120 : vector<8x128xf32>
    %123 = arith.divf %121, %122 : vector<8x128xf32>
    %124 = arith.mulf %123, %72 : vector<8x128xf32>
    %125 = arith.negf %115 : vector<8x128xf32>
    %126 = math.exp %125 : vector<8x128xf32>
    %cst_42 = arith.constant 1.000000e+00 : f32
    %127 = vector.broadcast %cst_42 : f32 to vector<8x128xf32>
    %128 = arith.addf %127, %126 : vector<8x128xf32>
    %129 = arith.divf %127, %128 : vector<8x128xf32>
    %130 = math.tanh %117 : vector<8x128xf32>
    %131 = arith.mulf %129, %130 : vector<8x128xf32>
    %132 = arith.addf %124, %131 : vector<8x128xf32>
    %133 = arith.negf %118 : vector<8x128xf32>
    %134 = math.exp %133 : vector<8x128xf32>
    %cst_43 = arith.constant 1.000000e+00 : f32
    %135 = vector.broadcast %cst_43 : f32 to vector<8x128xf32>
    %136 = arith.addf %135, %134 : vector<8x128xf32>
    %137 = arith.divf %135, %136 : vector<8x128xf32>
    %138 = math.tanh %132 : vector<8x128xf32>
    %139 = arith.mulf %137, %138 : vector<8x128xf32>
    %c0_44 = arith.constant 0 : index
    %c0_45 = arith.constant 0 : index
    %140 = vector.load %arg15[%c0_44, %c0_45] : memref<128x512xf32, #tpu.memory_space<vmem>>, vector<128x512xf32>
    %cst_46 = arith.constant dense<0.000000e+00> : vector<8x512xf32>
    %141 = tpu.matmul %139, %140, %cst_46 {dimension_numbers = #tpu.dot_dimension_numbers<[1], [0], [0], [1], [0, 0, 1, 1], [], []>} : vector<8x128xf32>, vector<128x512xf32>, vector<8x512xf32> -> vector<8x512xf32>
    %142 = arith.addf %141, %15 : vector<8x512xf32>
    %c16 = arith.constant 16 : index
    %c0_47 = arith.constant 0 : index
    %143 = vector.load %arg13[%c16, %c0_47] : memref<64x512xf32, #tpu.memory_space<vmem>>, vector<8x512xf32>
    %c0_48 = arith.constant 0 : index
    %c0_49 = arith.constant 0 : index
    %144 = vector.load %arg3[%c0_48, %c0_49] : memref<128x512xf32, #tpu.memory_space<vmem>>, vector<128x512xf32>
    %cst_50 = arith.constant dense<0.000000e+00> : vector<8x512xf32>
    %145 = tpu.matmul %111, %144, %cst_50 {dimension_numbers = #tpu.dot_dimension_numbers<[1], [0], [0], [1], [0, 0, 1, 1], [], []>} : vector<8x128xf32>, vector<128x512xf32>, vector<8x512xf32> -> vector<8x512xf32>
    %146 = arith.addf %143, %145 : vector<8x512xf32>
    %147 = vector.extract_strided_slice %146 {offsets = [0, 0], sizes = [8, 128], strides = [1, 1]} : vector<8x512xf32> to vector<8x128xf32>
    %148 = vector.extract_strided_slice %146 {offsets = [0, 128], sizes = [8, 128], strides = [1, 1]} : vector<8x512xf32> to vector<8x128xf32>
    %149 = vector.extract_strided_slice %146 {offsets = [0, 256], sizes = [8, 128], strides = [1, 1]} : vector<8x512xf32> to vector<8x128xf32>
    %150 = vector.extract_strided_slice %146 {offsets = [0, 384], sizes = [8, 128], strides = [1, 1]} : vector<8x512xf32> to vector<8x128xf32>
    %151 = arith.negf %148 : vector<8x128xf32>
    %152 = math.exp %151 : vector<8x128xf32>
    %cst_51 = arith.constant 1.000000e+00 : f32
    %153 = vector.broadcast %cst_51 : f32 to vector<8x128xf32>
    %154 = arith.addf %153, %152 : vector<8x128xf32>
    %155 = arith.divf %153, %154 : vector<8x128xf32>
    %156 = arith.mulf %155, %104 : vector<8x128xf32>
    %157 = arith.negf %147 : vector<8x128xf32>
    %158 = math.exp %157 : vector<8x128xf32>
    %cst_52 = arith.constant 1.000000e+00 : f32
    %159 = vector.broadcast %cst_52 : f32 to vector<8x128xf32>
    %160 = arith.addf %159, %158 : vector<8x128xf32>
    %161 = arith.divf %159, %160 : vector<8x128xf32>
    %162 = math.tanh %149 : vector<8x128xf32>
    %163 = arith.mulf %161, %162 : vector<8x128xf32>
    %164 = arith.addf %156, %163 : vector<8x128xf32>
    %165 = arith.negf %150 : vector<8x128xf32>
    %166 = math.exp %165 : vector<8x128xf32>
    %cst_53 = arith.constant 1.000000e+00 : f32
    %167 = vector.broadcast %cst_53 : f32 to vector<8x128xf32>
    %168 = arith.addf %167, %166 : vector<8x128xf32>
    %169 = arith.divf %167, %168 : vector<8x128xf32>
    %170 = math.tanh %164 : vector<8x128xf32>
    %171 = arith.mulf %169, %170 : vector<8x128xf32>
    %c0_54 = arith.constant 0 : index
    %c0_55 = arith.constant 0 : index
    %172 = vector.load %arg14[%c0_54, %c0_55] : memref<128x512xf32, #tpu.memory_space<vmem>>, vector<128x512xf32>
    %cst_56 = arith.constant dense<0.000000e+00> : vector<8x512xf32>
    %173 = tpu.matmul %171, %172, %cst_56 {dimension_numbers = #tpu.dot_dimension_numbers<[1], [0], [0], [1], [0, 0, 1, 1], [], []>} : vector<8x128xf32>, vector<128x512xf32>, vector<8x512xf32> -> vector<8x512xf32>
    %174 = arith.addf %142, %173 : vector<8x512xf32>
    %175 = vector.extract_strided_slice %174 {offsets = [0, 0], sizes = [8, 128], strides = [1, 1]} : vector<8x512xf32> to vector<8x128xf32>
    %176 = vector.extract_strided_slice %174 {offsets = [0, 128], sizes = [8, 128], strides = [1, 1]} : vector<8x512xf32> to vector<8x128xf32>
    %177 = vector.extract_strided_slice %174 {offsets = [0, 256], sizes = [8, 128], strides = [1, 1]} : vector<8x512xf32> to vector<8x128xf32>
    %178 = vector.extract_strided_slice %174 {offsets = [0, 384], sizes = [8, 128], strides = [1, 1]} : vector<8x512xf32> to vector<8x128xf32>
    %179 = arith.negf %176 : vector<8x128xf32>
    %180 = math.exp %179 : vector<8x128xf32>
    %cst_57 = arith.constant 1.000000e+00 : f32
    %181 = vector.broadcast %cst_57 : f32 to vector<8x128xf32>
    %182 = arith.addf %181, %180 : vector<8x128xf32>
    %183 = arith.divf %181, %182 : vector<8x128xf32>
    %184 = arith.mulf %183, %132 : vector<8x128xf32>
    %185 = arith.negf %175 : vector<8x128xf32>
    %186 = math.exp %185 : vector<8x128xf32>
    %cst_58 = arith.constant 1.000000e+00 : f32
    %187 = vector.broadcast %cst_58 : f32 to vector<8x128xf32>
    %188 = arith.addf %187, %186 : vector<8x128xf32>
    %189 = arith.divf %187, %188 : vector<8x128xf32>
    %190 = math.tanh %177 : vector<8x128xf32>
    %191 = arith.mulf %189, %190 : vector<8x128xf32>
    %192 = arith.addf %184, %191 : vector<8x128xf32>
    %193 = arith.negf %178 : vector<8x128xf32>
    %194 = math.exp %193 : vector<8x128xf32>
    %cst_59 = arith.constant 1.000000e+00 : f32
    %195 = vector.broadcast %cst_59 : f32 to vector<8x128xf32>
    %196 = arith.addf %195, %194 : vector<8x128xf32>
    %197 = arith.divf %195, %196 : vector<8x128xf32>
    %198 = math.tanh %192 : vector<8x128xf32>
    %199 = arith.mulf %197, %198 : vector<8x128xf32>
    %c0_60 = arith.constant 0 : index
    %c0_61 = arith.constant 0 : index
    %200 = vector.load %arg15[%c0_60, %c0_61] : memref<128x512xf32, #tpu.memory_space<vmem>>, vector<128x512xf32>
    %cst_62 = arith.constant dense<0.000000e+00> : vector<8x512xf32>
    %201 = tpu.matmul %199, %200, %cst_62 {dimension_numbers = #tpu.dot_dimension_numbers<[1], [0], [0], [1], [0, 0, 1, 1], [], []>} : vector<8x128xf32>, vector<128x512xf32>, vector<8x512xf32> -> vector<8x512xf32>
    %202 = arith.addf %201, %15 : vector<8x512xf32>
    %c24 = arith.constant 24 : index
    %c0_63 = arith.constant 0 : index
    %203 = vector.load %arg13[%c24, %c0_63] : memref<64x512xf32, #tpu.memory_space<vmem>>, vector<8x512xf32>
    %c0_64 = arith.constant 0 : index
    %c0_65 = arith.constant 0 : index
    %204 = vector.load %arg3[%c0_64, %c0_65] : memref<128x512xf32, #tpu.memory_space<vmem>>, vector<128x512xf32>
    %cst_66 = arith.constant dense<0.000000e+00> : vector<8x512xf32>
    %205 = tpu.matmul %171, %204, %cst_66 {dimension_numbers = #tpu.dot_dimension_numbers<[1], [0], [0], [1], [0, 0, 1, 1], [], []>} : vector<8x128xf32>, vector<128x512xf32>, vector<8x512xf32> -> vector<8x512xf32>
    %206 = arith.addf %203, %205 : vector<8x512xf32>
    %207 = vector.extract_strided_slice %206 {offsets = [0, 0], sizes = [8, 128], strides = [1, 1]} : vector<8x512xf32> to vector<8x128xf32>
    %208 = vector.extract_strided_slice %206 {offsets = [0, 128], sizes = [8, 128], strides = [1, 1]} : vector<8x512xf32> to vector<8x128xf32>
    %209 = vector.extract_strided_slice %206 {offsets = [0, 256], sizes = [8, 128], strides = [1, 1]} : vector<8x512xf32> to vector<8x128xf32>
    %210 = vector.extract_strided_slice %206 {offsets = [0, 384], sizes = [8, 128], strides = [1, 1]} : vector<8x512xf32> to vector<8x128xf32>
    %211 = arith.negf %208 : vector<8x128xf32>
    %212 = math.exp %211 : vector<8x128xf32>
    %cst_67 = arith.constant 1.000000e+00 : f32
    %213 = vector.broadcast %cst_67 : f32 to vector<8x128xf32>
    %214 = arith.addf %213, %212 : vector<8x128xf32>
    %215 = arith.divf %213, %214 : vector<8x128xf32>
    %216 = arith.mulf %215, %164 : vector<8x128xf32>
    %217 = arith.negf %207 : vector<8x128xf32>
    %218 = math.exp %217 : vector<8x128xf32>
    %cst_68 = arith.constant 1.000000e+00 : f32
    %219 = vector.broadcast %cst_68 : f32 to vector<8x128xf32>
    %220 = arith.addf %219, %218 : vector<8x128xf32>
    %221 = arith.divf %219, %220 : vector<8x128xf32>
    %222 = math.tanh %209 : vector<8x128xf32>
    %223 = arith.mulf %221, %222 : vector<8x128xf32>
    %224 = arith.addf %216, %223 : vector<8x128xf32>
    %225 = arith.negf %210 : vector<8x128xf32>
    %226 = math.exp %225 : vector<8x128xf32>
    %cst_69 = arith.constant 1.000000e+00 : f32
    %227 = vector.broadcast %cst_69 : f32 to vector<8x128xf32>
    %228 = arith.addf %227, %226 : vector<8x128xf32>
    %229 = arith.divf %227, %228 : vector<8x128xf32>
    %230 = math.tanh %224 : vector<8x128xf32>
    %231 = arith.mulf %229, %230 : vector<8x128xf32>
    %c0_70 = arith.constant 0 : index
    %c0_71 = arith.constant 0 : index
    %232 = vector.load %arg14[%c0_70, %c0_71] : memref<128x512xf32, #tpu.memory_space<vmem>>, vector<128x512xf32>
    %cst_72 = arith.constant dense<0.000000e+00> : vector<8x512xf32>
    %233 = tpu.matmul %231, %232, %cst_72 {dimension_numbers = #tpu.dot_dimension_numbers<[1], [0], [0], [1], [0, 0, 1, 1], [], []>} : vector<8x128xf32>, vector<128x512xf32>, vector<8x512xf32> -> vector<8x512xf32>
    %234 = arith.addf %202, %233 : vector<8x512xf32>
    %235 = vector.extract_strided_slice %234 {offsets = [0, 0], sizes = [8, 128], strides = [1, 1]} : vector<8x512xf32> to vector<8x128xf32>
    %236 = vector.extract_strided_slice %234 {offsets = [0, 128], sizes = [8, 128], strides = [1, 1]} : vector<8x512xf32> to vector<8x128xf32>
    %237 = vector.extract_strided_slice %234 {offsets = [0, 256], sizes = [8, 128], strides = [1, 1]} : vector<8x512xf32> to vector<8x128xf32>
    %238 = vector.extract_strided_slice %234 {offsets = [0, 384], sizes = [8, 128], strides = [1, 1]} : vector<8x512xf32> to vector<8x128xf32>
    %239 = arith.negf %236 : vector<8x128xf32>
    %240 = math.exp %239 : vector<8x128xf32>
    %cst_73 = arith.constant 1.000000e+00 : f32
    %241 = vector.broadcast %cst_73 : f32 to vector<8x128xf32>
    %242 = arith.addf %241, %240 : vector<8x128xf32>
    %243 = arith.divf %241, %242 : vector<8x128xf32>
    %244 = arith.mulf %243, %192 : vector<8x128xf32>
    %245 = arith.negf %235 : vector<8x128xf32>
    %246 = math.exp %245 : vector<8x128xf32>
    %cst_74 = arith.constant 1.000000e+00 : f32
    %247 = vector.broadcast %cst_74 : f32 to vector<8x128xf32>
    %248 = arith.addf %247, %246 : vector<8x128xf32>
    %249 = arith.divf %247, %248 : vector<8x128xf32>
    %250 = math.tanh %237 : vector<8x128xf32>
    %251 = arith.mulf %249, %250 : vector<8x128xf32>
    %252 = arith.addf %244, %251 : vector<8x128xf32>
    %253 = arith.negf %238 : vector<8x128xf32>
    %254 = math.exp %253 : vector<8x128xf32>
    %cst_75 = arith.constant 1.000000e+00 : f32
    %255 = vector.broadcast %cst_75 : f32 to vector<8x128xf32>
    %256 = arith.addf %255, %254 : vector<8x128xf32>
    %257 = arith.divf %255, %256 : vector<8x128xf32>
    %258 = math.tanh %252 : vector<8x128xf32>
    %259 = arith.mulf %257, %258 : vector<8x128xf32>
    %c0_76 = arith.constant 0 : index
    %c0_77 = arith.constant 0 : index
    %260 = vector.load %arg15[%c0_76, %c0_77] : memref<128x512xf32, #tpu.memory_space<vmem>>, vector<128x512xf32>
    %cst_78 = arith.constant dense<0.000000e+00> : vector<8x512xf32>
    %261 = tpu.matmul %259, %260, %cst_78 {dimension_numbers = #tpu.dot_dimension_numbers<[1], [0], [0], [1], [0, 0, 1, 1], [], []>} : vector<8x128xf32>, vector<128x512xf32>, vector<8x512xf32> -> vector<8x512xf32>
    %262 = arith.addf %261, %15 : vector<8x512xf32>
    %c32 = arith.constant 32 : index
    %c0_79 = arith.constant 0 : index
    %263 = vector.load %arg13[%c32, %c0_79] : memref<64x512xf32, #tpu.memory_space<vmem>>, vector<8x512xf32>
    %c0_80 = arith.constant 0 : index
    %c0_81 = arith.constant 0 : index
    %264 = vector.load %arg3[%c0_80, %c0_81] : memref<128x512xf32, #tpu.memory_space<vmem>>, vector<128x512xf32>
    %cst_82 = arith.constant dense<0.000000e+00> : vector<8x512xf32>
    %265 = tpu.matmul %231, %264, %cst_82 {dimension_numbers = #tpu.dot_dimension_numbers<[1], [0], [0], [1], [0, 0, 1, 1], [], []>} : vector<8x128xf32>, vector<128x512xf32>, vector<8x512xf32> -> vector<8x512xf32>
    %266 = arith.addf %263, %265 : vector<8x512xf32>
    %267 = vector.extract_strided_slice %266 {offsets = [0, 0], sizes = [8, 128], strides = [1, 1]} : vector<8x512xf32> to vector<8x128xf32>
    %268 = vector.extract_strided_slice %266 {offsets = [0, 128], sizes = [8, 128], strides = [1, 1]} : vector<8x512xf32> to vector<8x128xf32>
    %269 = vector.extract_strided_slice %266 {offsets = [0, 256], sizes = [8, 128], strides = [1, 1]} : vector<8x512xf32> to vector<8x128xf32>
    %270 = vector.extract_strided_slice %266 {offsets = [0, 384], sizes = [8, 128], strides = [1, 1]} : vector<8x512xf32> to vector<8x128xf32>
    %271 = arith.negf %268 : vector<8x128xf32>
    %272 = math.exp %271 : vector<8x128xf32>
    %cst_83 = arith.constant 1.000000e+00 : f32
    %273 = vector.broadcast %cst_83 : f32 to vector<8x128xf32>
    %274 = arith.addf %273, %272 : vector<8x128xf32>
    %275 = arith.divf %273, %274 : vector<8x128xf32>
    %276 = arith.mulf %275, %224 : vector<8x128xf32>
    %277 = arith.negf %267 : vector<8x128xf32>
    %278 = math.exp %277 : vector<8x128xf32>
    %cst_84 = arith.constant 1.000000e+00 : f32
    %279 = vector.broadcast %cst_84 : f32 to vector<8x128xf32>
    %280 = arith.addf %279, %278 : vector<8x128xf32>
    %281 = arith.divf %279, %280 : vector<8x128xf32>
    %282 = math.tanh %269 : vector<8x128xf32>
    %283 = arith.mulf %281, %282 : vector<8x128xf32>
    %284 = arith.addf %276, %283 : vector<8x128xf32>
    %285 = arith.negf %270 : vector<8x128xf32>
    %286 = math.exp %285 : vector<8x128xf32>
    %cst_85 = arith.constant 1.000000e+00 : f32
    %287 = vector.broadcast %cst_85 : f32 to vector<8x128xf32>
    %288 = arith.addf %287, %286 : vector<8x128xf32>
    %289 = arith.divf %287, %288 : vector<8x128xf32>
    %290 = math.tanh %284 : vector<8x128xf32>
    %291 = arith.mulf %289, %290 : vector<8x128xf32>
    %c0_86 = arith.constant 0 : index
    %c0_87 = arith.constant 0 : index
    %292 = vector.load %arg14[%c0_86, %c0_87] : memref<128x512xf32, #tpu.memory_space<vmem>>, vector<128x512xf32>
    %cst_88 = arith.constant dense<0.000000e+00> : vector<8x512xf32>
    %293 = tpu.matmul %291, %292, %cst_88 {dimension_numbers = #tpu.dot_dimension_numbers<[1], [0], [0], [1], [0, 0, 1, 1], [], []>} : vector<8x128xf32>, vector<128x512xf32>, vector<8x512xf32> -> vector<8x512xf32>
    %294 = arith.addf %262, %293 : vector<8x512xf32>
    %295 = vector.extract_strided_slice %294 {offsets = [0, 0], sizes = [8, 128], strides = [1, 1]} : vector<8x512xf32> to vector<8x128xf32>
    %296 = vector.extract_strided_slice %294 {offsets = [0, 128], sizes = [8, 128], strides = [1, 1]} : vector<8x512xf32> to vector<8x128xf32>
    %297 = vector.extract_strided_slice %294 {offsets = [0, 256], sizes = [8, 128], strides = [1, 1]} : vector<8x512xf32> to vector<8x128xf32>
    %298 = vector.extract_strided_slice %294 {offsets = [0, 384], sizes = [8, 128], strides = [1, 1]} : vector<8x512xf32> to vector<8x128xf32>
    %299 = arith.negf %296 : vector<8x128xf32>
    %300 = math.exp %299 : vector<8x128xf32>
    %cst_89 = arith.constant 1.000000e+00 : f32
    %301 = vector.broadcast %cst_89 : f32 to vector<8x128xf32>
    %302 = arith.addf %301, %300 : vector<8x128xf32>
    %303 = arith.divf %301, %302 : vector<8x128xf32>
    %304 = arith.mulf %303, %252 : vector<8x128xf32>
    %305 = arith.negf %295 : vector<8x128xf32>
    %306 = math.exp %305 : vector<8x128xf32>
    %cst_90 = arith.constant 1.000000e+00 : f32
    %307 = vector.broadcast %cst_90 : f32 to vector<8x128xf32>
    %308 = arith.addf %307, %306 : vector<8x128xf32>
    %309 = arith.divf %307, %308 : vector<8x128xf32>
    %310 = math.tanh %297 : vector<8x128xf32>
    %311 = arith.mulf %309, %310 : vector<8x128xf32>
    %312 = arith.addf %304, %311 : vector<8x128xf32>
    %313 = arith.negf %298 : vector<8x128xf32>
    %314 = math.exp %313 : vector<8x128xf32>
    %cst_91 = arith.constant 1.000000e+00 : f32
    %315 = vector.broadcast %cst_91 : f32 to vector<8x128xf32>
    %316 = arith.addf %315, %314 : vector<8x128xf32>
    %317 = arith.divf %315, %316 : vector<8x128xf32>
    %318 = math.tanh %312 : vector<8x128xf32>
    %319 = arith.mulf %317, %318 : vector<8x128xf32>
    %c0_92 = arith.constant 0 : index
    %c0_93 = arith.constant 0 : index
    %320 = vector.load %arg15[%c0_92, %c0_93] : memref<128x512xf32, #tpu.memory_space<vmem>>, vector<128x512xf32>
    %cst_94 = arith.constant dense<0.000000e+00> : vector<8x512xf32>
    %321 = tpu.matmul %319, %320, %cst_94 {dimension_numbers = #tpu.dot_dimension_numbers<[1], [0], [0], [1], [0, 0, 1, 1], [], []>} : vector<8x128xf32>, vector<128x512xf32>, vector<8x512xf32> -> vector<8x512xf32>
    %322 = arith.addf %321, %15 : vector<8x512xf32>
    %c40 = arith.constant 40 : index
    %c0_95 = arith.constant 0 : index
    %323 = vector.load %arg13[%c40, %c0_95] : memref<64x512xf32, #tpu.memory_space<vmem>>, vector<8x512xf32>
    %c0_96 = arith.constant 0 : index
    %c0_97 = arith.constant 0 : index
    %324 = vector.load %arg3[%c0_96, %c0_97] : memref<128x512xf32, #tpu.memory_space<vmem>>, vector<128x512xf32>
    %cst_98 = arith.constant dense<0.000000e+00> : vector<8x512xf32>
    %325 = tpu.matmul %291, %324, %cst_98 {dimension_numbers = #tpu.dot_dimension_numbers<[1], [0], [0], [1], [0, 0, 1, 1], [], []>} : vector<8x128xf32>, vector<128x512xf32>, vector<8x512xf32> -> vector<8x512xf32>
    %326 = arith.addf %323, %325 : vector<8x512xf32>
    %327 = vector.extract_strided_slice %326 {offsets = [0, 0], sizes = [8, 128], strides = [1, 1]} : vector<8x512xf32> to vector<8x128xf32>
    %328 = vector.extract_strided_slice %326 {offsets = [0, 128], sizes = [8, 128], strides = [1, 1]} : vector<8x512xf32> to vector<8x128xf32>
    %329 = vector.extract_strided_slice %326 {offsets = [0, 256], sizes = [8, 128], strides = [1, 1]} : vector<8x512xf32> to vector<8x128xf32>
    %330 = vector.extract_strided_slice %326 {offsets = [0, 384], sizes = [8, 128], strides = [1, 1]} : vector<8x512xf32> to vector<8x128xf32>
    %331 = arith.negf %328 : vector<8x128xf32>
    %332 = math.exp %331 : vector<8x128xf32>
    %cst_99 = arith.constant 1.000000e+00 : f32
    %333 = vector.broadcast %cst_99 : f32 to vector<8x128xf32>
    %334 = arith.addf %333, %332 : vector<8x128xf32>
    %335 = arith.divf %333, %334 : vector<8x128xf32>
    %336 = arith.mulf %335, %284 : vector<8x128xf32>
    %337 = arith.negf %327 : vector<8x128xf32>
    %338 = math.exp %337 : vector<8x128xf32>
    %cst_100 = arith.constant 1.000000e+00 : f32
    %339 = vector.broadcast %cst_100 : f32 to vector<8x128xf32>
    %340 = arith.addf %339, %338 : vector<8x128xf32>
    %341 = arith.divf %339, %340 : vector<8x128xf32>
    %342 = math.tanh %329 : vector<8x128xf32>
    %343 = arith.mulf %341, %342 : vector<8x128xf32>
    %344 = arith.addf %336, %343 : vector<8x128xf32>
    %345 = arith.negf %330 : vector<8x128xf32>
    %346 = math.exp %345 : vector<8x128xf32>
    %cst_101 = arith.constant 1.000000e+00 : f32
    %347 = vector.broadcast %cst_101 : f32 to vector<8x128xf32>
    %348 = arith.addf %347, %346 : vector<8x128xf32>
    %349 = arith.divf %347, %348 : vector<8x128xf32>
    %350 = math.tanh %344 : vector<8x128xf32>
    %351 = arith.mulf %349, %350 : vector<8x128xf32>
    %c0_102 = arith.constant 0 : index
    %c0_103 = arith.constant 0 : index
    %352 = vector.load %arg14[%c0_102, %c0_103] : memref<128x512xf32, #tpu.memory_space<vmem>>, vector<128x512xf32>
    %cst_104 = arith.constant dense<0.000000e+00> : vector<8x512xf32>
    %353 = tpu.matmul %351, %352, %cst_104 {dimension_numbers = #tpu.dot_dimension_numbers<[1], [0], [0], [1], [0, 0, 1, 1], [], []>} : vector<8x128xf32>, vector<128x512xf32>, vector<8x512xf32> -> vector<8x512xf32>
    %354 = arith.addf %322, %353 : vector<8x512xf32>
    %355 = vector.extract_strided_slice %354 {offsets = [0, 0], sizes = [8, 128], strides = [1, 1]} : vector<8x512xf32> to vector<8x128xf32>
    %356 = vector.extract_strided_slice %354 {offsets = [0, 128], sizes = [8, 128], strides = [1, 1]} : vector<8x512xf32> to vector<8x128xf32>
    %357 = vector.extract_strided_slice %354 {offsets = [0, 256], sizes = [8, 128], strides = [1, 1]} : vector<8x512xf32> to vector<8x128xf32>
    %358 = vector.extract_strided_slice %354 {offsets = [0, 384], sizes = [8, 128], strides = [1, 1]} : vector<8x512xf32> to vector<8x128xf32>
    %359 = arith.negf %356 : vector<8x128xf32>
    %360 = math.exp %359 : vector<8x128xf32>
    %cst_105 = arith.constant 1.000000e+00 : f32
    %361 = vector.broadcast %cst_105 : f32 to vector<8x128xf32>
    %362 = arith.addf %361, %360 : vector<8x128xf32>
    %363 = arith.divf %361, %362 : vector<8x128xf32>
    %364 = arith.mulf %363, %312 : vector<8x128xf32>
    %365 = arith.negf %355 : vector<8x128xf32>
    %366 = math.exp %365 : vector<8x128xf32>
    %cst_106 = arith.constant 1.000000e+00 : f32
    %367 = vector.broadcast %cst_106 : f32 to vector<8x128xf32>
    %368 = arith.addf %367, %366 : vector<8x128xf32>
    %369 = arith.divf %367, %368 : vector<8x128xf32>
    %370 = math.tanh %357 : vector<8x128xf32>
    %371 = arith.mulf %369, %370 : vector<8x128xf32>
    %372 = arith.addf %364, %371 : vector<8x128xf32>
    %373 = arith.negf %358 : vector<8x128xf32>
    %374 = math.exp %373 : vector<8x128xf32>
    %cst_107 = arith.constant 1.000000e+00 : f32
    %375 = vector.broadcast %cst_107 : f32 to vector<8x128xf32>
    %376 = arith.addf %375, %374 : vector<8x128xf32>
    %377 = arith.divf %375, %376 : vector<8x128xf32>
    %378 = math.tanh %372 : vector<8x128xf32>
    %379 = arith.mulf %377, %378 : vector<8x128xf32>
    %c0_108 = arith.constant 0 : index
    %c0_109 = arith.constant 0 : index
    %380 = vector.load %arg15[%c0_108, %c0_109] : memref<128x512xf32, #tpu.memory_space<vmem>>, vector<128x512xf32>
    %cst_110 = arith.constant dense<0.000000e+00> : vector<8x512xf32>
    %381 = tpu.matmul %379, %380, %cst_110 {dimension_numbers = #tpu.dot_dimension_numbers<[1], [0], [0], [1], [0, 0, 1, 1], [], []>} : vector<8x128xf32>, vector<128x512xf32>, vector<8x512xf32> -> vector<8x512xf32>
    %382 = arith.addf %381, %15 : vector<8x512xf32>
    %c48 = arith.constant 48 : index
    %c0_111 = arith.constant 0 : index
    %383 = vector.load %arg13[%c48, %c0_111] : memref<64x512xf32, #tpu.memory_space<vmem>>, vector<8x512xf32>
    %c0_112 = arith.constant 0 : index
    %c0_113 = arith.constant 0 : index
    %384 = vector.load %arg3[%c0_112, %c0_113] : memref<128x512xf32, #tpu.memory_space<vmem>>, vector<128x512xf32>
    %cst_114 = arith.constant dense<0.000000e+00> : vector<8x512xf32>
    %385 = tpu.matmul %351, %384, %cst_114 {dimension_numbers = #tpu.dot_dimension_numbers<[1], [0], [0], [1], [0, 0, 1, 1], [], []>} : vector<8x128xf32>, vector<128x512xf32>, vector<8x512xf32> -> vector<8x512xf32>
    %386 = arith.addf %383, %385 : vector<8x512xf32>
    %387 = vector.extract_strided_slice %386 {offsets = [0, 0], sizes = [8, 128], strides = [1, 1]} : vector<8x512xf32> to vector<8x128xf32>
    %388 = vector.extract_strided_slice %386 {offsets = [0, 128], sizes = [8, 128], strides = [1, 1]} : vector<8x512xf32> to vector<8x128xf32>
    %389 = vector.extract_strided_slice %386 {offsets = [0, 256], sizes = [8, 128], strides = [1, 1]} : vector<8x512xf32> to vector<8x128xf32>
    %390 = vector.extract_strided_slice %386 {offsets = [0, 384], sizes = [8, 128], strides = [1, 1]} : vector<8x512xf32> to vector<8x128xf32>
    %391 = arith.negf %388 : vector<8x128xf32>
    %392 = math.exp %391 : vector<8x128xf32>
    %cst_115 = arith.constant 1.000000e+00 : f32
    %393 = vector.broadcast %cst_115 : f32 to vector<8x128xf32>
    %394 = arith.addf %393, %392 : vector<8x128xf32>
    %395 = arith.divf %393, %394 : vector<8x128xf32>
    %396 = arith.mulf %395, %344 : vector<8x128xf32>
    %397 = arith.negf %387 : vector<8x128xf32>
    %398 = math.exp %397 : vector<8x128xf32>
    %cst_116 = arith.constant 1.000000e+00 : f32
    %399 = vector.broadcast %cst_116 : f32 to vector<8x128xf32>
    %400 = arith.addf %399, %398 : vector<8x128xf32>
    %401 = arith.divf %399, %400 : vector<8x128xf32>
    %402 = math.tanh %389 : vector<8x128xf32>
    %403 = arith.mulf %401, %402 : vector<8x128xf32>
    %404 = arith.addf %396, %403 : vector<8x128xf32>
    %405 = arith.negf %390 : vector<8x128xf32>
    %406 = math.exp %405 : vector<8x128xf32>
    %cst_117 = arith.constant 1.000000e+00 : f32
    %407 = vector.broadcast %cst_117 : f32 to vector<8x128xf32>
    %408 = arith.addf %407, %406 : vector<8x128xf32>
    %409 = arith.divf %407, %408 : vector<8x128xf32>
    %410 = math.tanh %404 : vector<8x128xf32>
    %411 = arith.mulf %409, %410 : vector<8x128xf32>
    %c0_118 = arith.constant 0 : index
    %c0_119 = arith.constant 0 : index
    %412 = vector.load %arg14[%c0_118, %c0_119] : memref<128x512xf32, #tpu.memory_space<vmem>>, vector<128x512xf32>
    %cst_120 = arith.constant dense<0.000000e+00> : vector<8x512xf32>
    %413 = tpu.matmul %411, %412, %cst_120 {dimension_numbers = #tpu.dot_dimension_numbers<[1], [0], [0], [1], [0, 0, 1, 1], [], []>} : vector<8x128xf32>, vector<128x512xf32>, vector<8x512xf32> -> vector<8x512xf32>
    %414 = arith.addf %382, %413 : vector<8x512xf32>
    %415 = vector.extract_strided_slice %414 {offsets = [0, 0], sizes = [8, 128], strides = [1, 1]} : vector<8x512xf32> to vector<8x128xf32>
    %416 = vector.extract_strided_slice %414 {offsets = [0, 128], sizes = [8, 128], strides = [1, 1]} : vector<8x512xf32> to vector<8x128xf32>
    %417 = vector.extract_strided_slice %414 {offsets = [0, 256], sizes = [8, 128], strides = [1, 1]} : vector<8x512xf32> to vector<8x128xf32>
    %418 = vector.extract_strided_slice %414 {offsets = [0, 384], sizes = [8, 128], strides = [1, 1]} : vector<8x512xf32> to vector<8x128xf32>
    %419 = arith.negf %416 : vector<8x128xf32>
    %420 = math.exp %419 : vector<8x128xf32>
    %cst_121 = arith.constant 1.000000e+00 : f32
    %421 = vector.broadcast %cst_121 : f32 to vector<8x128xf32>
    %422 = arith.addf %421, %420 : vector<8x128xf32>
    %423 = arith.divf %421, %422 : vector<8x128xf32>
    %424 = arith.mulf %423, %372 : vector<8x128xf32>
    %425 = arith.negf %415 : vector<8x128xf32>
    %426 = math.exp %425 : vector<8x128xf32>
    %cst_122 = arith.constant 1.000000e+00 : f32
    %427 = vector.broadcast %cst_122 : f32 to vector<8x128xf32>
    %428 = arith.addf %427, %426 : vector<8x128xf32>
    %429 = arith.divf %427, %428 : vector<8x128xf32>
    %430 = math.tanh %417 : vector<8x128xf32>
    %431 = arith.mulf %429, %430 : vector<8x128xf32>
    %432 = arith.addf %424, %431 : vector<8x128xf32>
    %433 = arith.negf %418 : vector<8x128xf32>
    %434 = math.exp %433 : vector<8x128xf32>
    %cst_123 = arith.constant 1.000000e+00 : f32
    %435 = vector.broadcast %cst_123 : f32 to vector<8x128xf32>
    %436 = arith.addf %435, %434 : vector<8x128xf32>
    %437 = arith.divf %435, %436 : vector<8x128xf32>
    %438 = math.tanh %432 : vector<8x128xf32>
    %439 = arith.mulf %437, %438 : vector<8x128xf32>
    %c0_124 = arith.constant 0 : index
    %c0_125 = arith.constant 0 : index
    %440 = vector.load %arg15[%c0_124, %c0_125] : memref<128x512xf32, #tpu.memory_space<vmem>>, vector<128x512xf32>
    %cst_126 = arith.constant dense<0.000000e+00> : vector<8x512xf32>
    %441 = tpu.matmul %439, %440, %cst_126 {dimension_numbers = #tpu.dot_dimension_numbers<[1], [0], [0], [1], [0, 0, 1, 1], [], []>} : vector<8x128xf32>, vector<128x512xf32>, vector<8x512xf32> -> vector<8x512xf32>
    %442 = arith.addf %441, %15 : vector<8x512xf32>
    %c56 = arith.constant 56 : index
    %c0_127 = arith.constant 0 : index
    %443 = vector.load %arg13[%c56, %c0_127] : memref<64x512xf32, #tpu.memory_space<vmem>>, vector<8x512xf32>
    %c0_128 = arith.constant 0 : index
    %c0_129 = arith.constant 0 : index
    %444 = vector.load %arg3[%c0_128, %c0_129] : memref<128x512xf32, #tpu.memory_space<vmem>>, vector<128x512xf32>
    %cst_130 = arith.constant dense<0.000000e+00> : vector<8x512xf32>
    %445 = tpu.matmul %411, %444, %cst_130 {dimension_numbers = #tpu.dot_dimension_numbers<[1], [0], [0], [1], [0, 0, 1, 1], [], []>} : vector<8x128xf32>, vector<128x512xf32>, vector<8x512xf32> -> vector<8x512xf32>
    %446 = arith.addf %443, %445 : vector<8x512xf32>
    %447 = vector.extract_strided_slice %446 {offsets = [0, 0], sizes = [8, 128], strides = [1, 1]} : vector<8x512xf32> to vector<8x128xf32>
    %448 = vector.extract_strided_slice %446 {offsets = [0, 128], sizes = [8, 128], strides = [1, 1]} : vector<8x512xf32> to vector<8x128xf32>
    %449 = vector.extract_strided_slice %446 {offsets = [0, 256], sizes = [8, 128], strides = [1, 1]} : vector<8x512xf32> to vector<8x128xf32>
    %450 = vector.extract_strided_slice %446 {offsets = [0, 384], sizes = [8, 128], strides = [1, 1]} : vector<8x512xf32> to vector<8x128xf32>
    %451 = arith.negf %448 : vector<8x128xf32>
    %452 = math.exp %451 : vector<8x128xf32>
    %cst_131 = arith.constant 1.000000e+00 : f32
    %453 = vector.broadcast %cst_131 : f32 to vector<8x128xf32>
    %454 = arith.addf %453, %452 : vector<8x128xf32>
    %455 = arith.divf %453, %454 : vector<8x128xf32>
    %456 = arith.mulf %455, %404 : vector<8x128xf32>
    %457 = arith.negf %447 : vector<8x128xf32>
    %458 = math.exp %457 : vector<8x128xf32>
    %cst_132 = arith.constant 1.000000e+00 : f32
    %459 = vector.broadcast %cst_132 : f32 to vector<8x128xf32>
    %460 = arith.addf %459, %458 : vector<8x128xf32>
    %461 = arith.divf %459, %460 : vector<8x128xf32>
    %462 = math.tanh %449 : vector<8x128xf32>
    %463 = arith.mulf %461, %462 : vector<8x128xf32>
    %464 = arith.addf %456, %463 : vector<8x128xf32>
    %465 = arith.negf %450 : vector<8x128xf32>
    %466 = math.exp %465 : vector<8x128xf32>
    %cst_133 = arith.constant 1.000000e+00 : f32
    %467 = vector.broadcast %cst_133 : f32 to vector<8x128xf32>
    %468 = arith.addf %467, %466 : vector<8x128xf32>
    %469 = arith.divf %467, %468 : vector<8x128xf32>
    %470 = math.tanh %464 : vector<8x128xf32>
    %471 = arith.mulf %469, %470 : vector<8x128xf32>
    %c0_134 = arith.constant 0 : index
    %c0_135 = arith.constant 0 : index
    %472 = vector.load %arg14[%c0_134, %c0_135] : memref<128x512xf32, #tpu.memory_space<vmem>>, vector<128x512xf32>
    %cst_136 = arith.constant dense<0.000000e+00> : vector<8x512xf32>
    %473 = tpu.matmul %471, %472, %cst_136 {dimension_numbers = #tpu.dot_dimension_numbers<[1], [0], [0], [1], [0, 0, 1, 1], [], []>} : vector<8x128xf32>, vector<128x512xf32>, vector<8x512xf32> -> vector<8x512xf32>
    %474 = arith.addf %442, %473 : vector<8x512xf32>
    %475 = vector.extract_strided_slice %474 {offsets = [0, 0], sizes = [8, 128], strides = [1, 1]} : vector<8x512xf32> to vector<8x128xf32>
    %476 = vector.extract_strided_slice %474 {offsets = [0, 128], sizes = [8, 128], strides = [1, 1]} : vector<8x512xf32> to vector<8x128xf32>
    %477 = vector.extract_strided_slice %474 {offsets = [0, 256], sizes = [8, 128], strides = [1, 1]} : vector<8x512xf32> to vector<8x128xf32>
    %478 = vector.extract_strided_slice %474 {offsets = [0, 384], sizes = [8, 128], strides = [1, 1]} : vector<8x512xf32> to vector<8x128xf32>
    %479 = arith.negf %476 : vector<8x128xf32>
    %480 = math.exp %479 : vector<8x128xf32>
    %cst_137 = arith.constant 1.000000e+00 : f32
    %481 = vector.broadcast %cst_137 : f32 to vector<8x128xf32>
    %482 = arith.addf %481, %480 : vector<8x128xf32>
    %483 = arith.divf %481, %482 : vector<8x128xf32>
    %484 = arith.mulf %483, %432 : vector<8x128xf32>
    %485 = arith.negf %475 : vector<8x128xf32>
    %486 = math.exp %485 : vector<8x128xf32>
    %cst_138 = arith.constant 1.000000e+00 : f32
    %487 = vector.broadcast %cst_138 : f32 to vector<8x128xf32>
    %488 = arith.addf %487, %486 : vector<8x128xf32>
    %489 = arith.divf %487, %488 : vector<8x128xf32>
    %490 = math.tanh %477 : vector<8x128xf32>
    %491 = arith.mulf %489, %490 : vector<8x128xf32>
    %492 = arith.addf %484, %491 : vector<8x128xf32>
    %493 = arith.negf %478 : vector<8x128xf32>
    %494 = math.exp %493 : vector<8x128xf32>
    %cst_139 = arith.constant 1.000000e+00 : f32
    %495 = vector.broadcast %cst_139 : f32 to vector<8x128xf32>
    %496 = arith.addf %495, %494 : vector<8x128xf32>
    %497 = arith.divf %495, %496 : vector<8x128xf32>
    %498 = math.tanh %492 : vector<8x128xf32>
    %499 = arith.mulf %497, %498 : vector<8x128xf32>
    %500 = tpu.iota {dimensions = array<i32: 1>} : vector<1x128xi32>
    %c96_i32 = arith.constant 96 : i32
    %501 = vector.broadcast %c96_i32 : i32 to vector<1x128xi32>
    %502 = arith.cmpi slt, %500, %501 : vector<1x128xi32>
    %cst_140 = arith.constant 0.000000e+00 : f32
    %503 = vector.shape_cast %502 : vector<1x128xi1> to vector<1x128xi1>
    %504 = vector.broadcast %503 : vector<1x128xi1> to vector<8x128xi1>
    %505 = vector.broadcast %cst_140 : f32 to vector<8x128xf32>
    %506 = arith.select %504, %499, %505 : vector<8x128xi1>, vector<8x128xf32>
    %cst_141 = arith.constant dense<0.000000e+00> : vector<8xf32>
    %507 = vector.multi_reduction <add>, %506, %cst_141 [1] : vector<8x128xf32> to vector<8xf32>
    %508 = vector.shape_cast %507 : vector<8xf32> to vector<8x1xf32>
    %cst_142 = arith.constant 9.600000e+01 : f32
    %509 = vector.broadcast %cst_142 : f32 to vector<8x1xf32>
    %510 = arith.divf %508, %509 : vector<8x1xf32>
    %511 = vector.broadcast %510 : vector<8x1xf32> to vector<8x128xf32>
    %512 = arith.subf %506, %511 : vector<8x128xf32>
    %cst_143 = arith.constant 0.000000e+00 : f32
    %513 = vector.shape_cast %502 : vector<1x128xi1> to vector<1x128xi1>
    %514 = vector.broadcast %513 : vector<1x128xi1> to vector<8x128xi1>
    %515 = vector.broadcast %cst_143 : f32 to vector<8x128xf32>
    %516 = arith.select %514, %512, %515 : vector<8x128xi1>, vector<8x128xf32>
    %517 = arith.mulf %516, %516 : vector<8x128xf32>
    %cst_144 = arith.constant dense<0.000000e+00> : vector<8xf32>
    %518 = vector.multi_reduction <add>, %517, %cst_144 [1] : vector<8x128xf32> to vector<8xf32>
    %519 = vector.shape_cast %518 : vector<8xf32> to vector<8x1xf32>
    %cst_145 = arith.constant 9.600000e+01 : f32
    %520 = vector.broadcast %cst_145 : f32 to vector<8x1xf32>
    %521 = arith.divf %519, %520 : vector<8x1xf32>
    %cst_146 = arith.constant 9.99999974E-6 : f32
    %522 = vector.broadcast %cst_146 : f32 to vector<8x1xf32>
    %523 = arith.addf %521, %522 : vector<8x1xf32>
    %524 = math.rsqrt %523 : vector<8x1xf32>
    %525 = vector.broadcast %524 : vector<8x1xf32> to vector<8x128xf32>
    %526 = arith.mulf %516, %525 : vector<8x128xf32>
    %c0_147 = arith.constant 0 : index
    %c0_148 = arith.constant 0 : index
    %527 = vector.load %arg8[%c0_147, %c0_148] : memref<1x128xf32, #tpu.memory_space<vmem>>, vector<1x128xf32>
    %528 = vector.broadcast %527 : vector<1x128xf32> to vector<8x128xf32>
    %529 = arith.mulf %526, %528 : vector<8x128xf32>
    %c0_149 = arith.constant 0 : index
    %c0_150 = arith.constant 0 : index
    %530 = vector.load %arg9[%c0_149, %c0_150] : memref<1x128xf32, #tpu.memory_space<vmem>>, vector<1x128xf32>
    %531 = vector.broadcast %530 : vector<1x128xf32> to vector<8x128xf32>
    %532 = arith.addf %529, %531 : vector<8x128xf32>
    %cst_151 = arith.constant 0.000000e+00 : f32
    %533 = vector.broadcast %cst_151 : f32 to vector<8x128xf32>
    %534 = arith.maximumf %532, %533 : vector<8x128xf32>
    %c2_i32_152 = arith.constant 2 : i32
    %535 = tpu.memref_slice %arg17[%c2_i32_152] : memref<3x!tpu.dma_semaphore, #tpu.memory_space<semaphore_mem>> -> memref<1x!tpu.dma_semaphore, #tpu.memory_space<semaphore_mem>>
    %536 = tpu.memref_squeeze %535 : memref<1x!tpu.dma_semaphore, #tpu.memory_space<semaphore_mem>> -> memref<!tpu.dma_semaphore, #tpu.memory_space<semaphore_mem>>
    tpu.wait_dma2 semaphore(%536 : memref<!tpu.dma_semaphore, #tpu.memory_space<semaphore_mem>>) src(%arg10 : memref<128x128xf32, #tpu.memory_space<any>>) dst(%arg16 : memref<128x128xf32, #tpu.memory_space<vmem>>)
    %c0_153 = arith.constant 0 : index
    %c0_154 = arith.constant 0 : index
    %537 = vector.load %arg16[%c0_153, %c0_154] : memref<128x128xf32, #tpu.memory_space<vmem>>, vector<128x128xf32>
    %cst_155 = arith.constant dense<0.000000e+00> : vector<8x128xf32>
    %538 = tpu.matmul %534, %537, %cst_155 {dimension_numbers = #tpu.dot_dimension_numbers<[1], [0], [0], [1], [0, 0, 1, 1], [], []>} : vector<8x128xf32>, vector<128x128xf32>, vector<8x128xf32> -> vector<8x128xf32>
    %c0_156 = arith.constant 0 : index
    %c0_157 = arith.constant 0 : index
    %539 = vector.load %arg11[%c0_156, %c0_157] : memref<1x128xf32, #tpu.memory_space<vmem>>, vector<1x128xf32>
    %540 = vector.broadcast %539 : vector<1x128xf32> to vector<8x128xf32>
    %541 = arith.addf %538, %540 : vector<8x128xf32>
    %c0_158 = arith.constant 0 : index
    %c0_159 = arith.constant 0 : index
    %542 = vector.load %arg12[%c0_158, %c0_159] : memref<8x128xf32, #tpu.memory_space<vmem>>, vector<8x128xf32>
    tpu.vector_store %arg12[%c0_158, %c0_159], %541 {strides = array<i32>} : memref<8x128xf32, #tpu.memory_space<vmem>>, vector<8x128xf32>,
    return
  }
  func.func @transform_0(%arg0: i32) -> (i32, i32) {
    %c0_i32 = arith.constant 0 : i32
    %c0_i32_0 = arith.constant 0 : i32
    %c0_i32_1 = arith.constant 0 : i32
    return %c0_i32, %c0_i32_0 : i32, i32
  }
  func.func @transform_1(%arg0: i32) -> (i32, i32) {
    %c0_i32 = arith.constant 0 : i32
    %c0_i32_0 = arith.constant 0 : i32
    %c0_i32_1 = arith.constant 0 : i32
    return %c0_i32, %c0_i32_0 : i32, i32
  }
  func.func @transform_2(%arg0: i32) -> (i32, i32) {
    %c0_i32 = arith.constant 0 : i32
    %c0_i32_0 = arith.constant 0 : i32
    %c0_i32_1 = arith.constant 0 : i32
    return %c0_i32, %c0_i32_0 : i32, i32
  }
  func.func @transform_3(%arg0: i32) -> (i32, i32) {
    %c0_i32 = arith.constant 0 : i32
    %c0_i32_0 = arith.constant 0 : i32
    %c0_i32_1 = arith.constant 0 : i32
    return %c0_i32, %c0_i32_0 : i32, i32
  }
  func.func @transform_6(%arg0: i32) -> (i32, i32) {
    %c0_i32 = arith.constant 0 : i32
    %c0_i32_0 = arith.constant 0 : i32
    %c0_i32_1 = arith.constant 0 : i32
    return %c0_i32, %c0_i32_0 : i32, i32
  }
  func.func @transform_7(%arg0: i32) -> (i32, i32) {
    %c0_i32 = arith.constant 0 : i32
    %c0_i32_0 = arith.constant 0 : i32
    %c0_i32_1 = arith.constant 0 : i32
    return %c0_i32, %c0_i32_0 : i32, i32
  }
  func.func @transform_8(%arg0: i32) -> (i32, i32) {
    %c0_i32 = arith.constant 0 : i32
    %c0_i32_0 = arith.constant 0 : i32
    %c0_i32_1 = arith.constant 0 : i32
    return %c0_i32, %c0_i32_0 : i32, i32
  }
  func.func @transform_10(%arg0: i32) -> (i32, i32) {
    %c0_i32 = arith.constant 0 : i32
    %c0_i32_0 = arith.constant 0 : i32
    %c0_i32_1 = arith.constant 0 : i32
    return %c0_i32, %c0_i32_0 : i32, i32
  }
  func.func @transform_11(%arg0: i32) -> (i32, i32) {
    %c0_i32 = arith.constant 0 : i32
    %c0_i32_0 = arith.constant 0 : i32
    %c0_i32_1 = arith.constant 0 : i32
    return %c0_i32, %c0_i32_0 : i32, i32
  }
}

</mosaic_0001>

<bundles_post_ra>
// kernel: tpu_custom_call.1
= control target key start
LH: loop header
LB: loop body
LE: loop exit
PB: predicated region body
PF: predicated region fallthrough
CT: control target
= control target key end

     0   :  { %16 = vsyncpa [#allocation8], 0  ;;  %s8090_s0 = inlined_call_operand.vmem [shape: f32[64,4], index: 0, kind: input, shape index: {}]   ;;  %s8091_s1 = inlined_call_operand.vmem [shape: f32[4,512], index: 1, kind: input, shape index: {}]   ;;  %s8092_s2 = inlined_call_operand.hbm [shape: f32[128,512], index: 2, kind: input, shape index: {}]   ;;  %s8093_s3 = inlined_call_operand.vmem [shape: f32[1,512], index: 3, kind: input, shape index: {}]   ;;  %s8094_s4 = inlined_call_operand.hbm [shape: f32[128,512], index: 4, kind: input, shape index: {}]   ;;  %s8095_s5 = inlined_call_operand.hbm [shape: f32[128,512], index: 5, kind: input, shape index: {}]   ;;  %s8096_s6 = inlined_call_operand.vmem [shape: f32[1,512], index: 6, kind: input, shape index: {}]   ;;  %s8097_s7 = inlined_call_operand.vmem [shape: f32[1,128], index: 7, kind: input, shape index: {}]   ;;  %s8098_s8 = inlined_call_operand.vmem [shape: f32[1,128], index: 8, kind: input, shape index: {}]   ;;  %s8099_s9 = inlined_call_operand.hbm [shape: f32[128,128], index: 9, kind: input, shape index: {}]   ;;  %s8100_s10 = inlined_call_operand.vmem [shape: f32[1,128], index: 10, kind: input, shape index: {}]   ;;  %s8101_s11 = inlined_call_operand.hbm [shape: f32[8,128], index: 11, kind: output, shape index: {}]  }
   0x1   :  { %17 = vsyncpa [#allocation9], 0  ;;  %s6740_s17 = smov [#allocation7]   ;;  %s6620_s21 = scalar_lea.hbm %s8092_s2, 8192 }
   0x2   :  { %s27_s18 = sshll.u32 %s6740_s17, 4  ;;  %p6621_p0 = scmp.ne.s32.totalorder %s8092_s2, %s6620_s21  ;;  %s28_s18 = int_to_ptr.vmem [resolvable:$true] %s27_s18 }
   0x3   :  { %p6624_p1 = scmp.lt.u32.totalorder %s6620_s21, %s8092_s2 }
   0x5   :  { %p6626_p2 = pnand %p6624_p1, %p6621_p0 }
   0x7   :  { %6629 = shalt.err (!%p6626_p2)
}
   0x8   :  { %s6630_s26 = scalar_lea.vmem %s28_s18, 8192  ;;  %p6635_p4 = scmp.lt.s32.totalorder %s28_s18, %s28_s18 }
   0x9   :  { %p6631_p3 = scmp.ne.s32.totalorder %s28_s18, %s6630_s26  ;;  %p6636_p5 = scmp.lt.s32.totalorder %s6630_s26, %s6630_s26 }
   0xb   :  { %p6637_p6 = por %p6636_p5, %p6635_p4 }
   0xd   :  { %p6638_p7 = pnand %p6637_p6, %p6631_p3 }
   0xf   :  { %6641 = shalt.err (!%p6638_p7)
}
  0x10   :  { %s6741_s27 = smov 512   ;;  %s6742_s28 = smov 32  }
  0x11   :  { %33 = dma.hbm_to_vmem [thread:$0]  %s8092_s2, 8192, %s28_s18, [#allocation8], %s6741_s27, %s6741_s27, %s6742_s28  }
  0x12   :  { %6730 = dma.done.wait [#allocation8], 8192  }
  0x13   :  { %6731 = vsyncadd [#allocation8], 4294959104  ;;  %v8103_v0 = vmov 0.0   ;;  %v90_v1 = vld [vmem:[%s8091_s1] sm:$0xff]  ;;  %vm143_vm0 = vcmask 1043456   ;;  %v91_v2 = vld [vmem:[%s8091_s1 + $0x8] sm:$0xff] }
  0x14   :  { %216 = vmatprep.mubr.f32.mxu0 %v8103_v0  ;;  %329 = vmatprep.mubr.f32.mxu1 %v8103_v0  ;;  %v82_v3 = vld [vmem:[%s8090_s0] sm:$0xff]  ;;  %v116_v4 = vcombine.high %v90_v1, %v90_v1  ;;  %v117_v5 = vcombine.high %v91_v2, %v91_v2  ;;  %v437_v6 = vld [vmem:[#allocation7 + $0x8] sm:$0xff]  ;;  %v439_v8 = vld [vmem:[#allocation7 + $0x18] sm:$0xff]  ;;  %vm118_vm1 = vcmask 31744   ;;  %s6745_s13 = smov [#allocation4]   ;;  %s6642_s17 = scalar_lea.hbm %s8094_s4, 8192 }
  0x15   :  { %v441_v7 = vld [vmem:[#allocation7 + $0x28] sm:$0xff]  ;;  %v443_v10 = vld [vmem:[#allocation7 + $0x38] sm:$0xff]  ;;  %v436_v11 = vld [vmem:[#allocation7] sm:$0xff]  ;;  %s66_s14 = sshll.u32 %s6745_s13, 4  ;;  %p6643_p8 = scmp.ne.s32.totalorder %s8094_s4, %s6642_s17  ;;  %s67_s14 = int_to_ptr.vmem [resolvable:$true] %s66_s14 }
  0x16   :  { %v4734_v9 = vpack.c.bf16 %v441_v7, %v437_v6  ;;  %v440_v12 = vld [vmem:[#allocation7 + $0x20] sm:$0xff]  ;;  %4608 = vmatprep.subr.msk.mxu0 %vm143_vm0, %v116_v4  ;;  %4618 = vmatprep.subr.msk.mxu1 %vm143_vm0, %v117_v5  ;;  %v4766_v13 = vpack.c.bf16 %v443_v10, %v439_v8  ;;  %v438_v15 = vld [vmem:[#allocation7 + $0x10] sm:$0xff]  ;;  %v445_v18 = vld [vmem:[#allocation7 + $0x48] sm:$0xff]  ;;  %p6646_p9 = scmp.lt.u32.totalorder %s6642_s17, %s8094_s4 }
  0x17   :  { %v4736_v14 = vpack.c.bf16 %v440_v12, %v436_v11  ;;  %v442_v16 = vld [vmem:[#allocation7 + $0x30] sm:$0xff]  ;;  %4609 = vmatpush1.msk.msra.mxu0 %vm143_vm0, %v90_v1  ;;  %4619 = vmatpush1.msk.msra.mxu1 %vm143_vm0, %v91_v2  ;;  %v449_v19 = vld [vmem:[#allocation7 + $0x68] sm:$0xff]  ;;  %v447_v20 = vld [vmem:[#allocation7 + $0x58] sm:$0xff]  ;;  %v8102_v2 = vlaneseq }
  0x18   :  { %v4768_v17 = vpack.c.bf16 %v442_v16, %v438_v15  ;;  %4610 = vmatmul.mubr.msk.f32.vlgmr.msra.gmra.mrb[0].mxu0 %vm118_vm1, %v82_v3  ;;  %4620 = vmatmul.mubr.msk.f32.vlgmr.msra.gmra.mrb[0].mxu1 %vm118_vm1, %v82_v3  ;;  %v451_v21 = vld [vmem:[#allocation7 + $0x78] sm:$0xff]  ;;  %v444_v22 = vld [vmem:[#allocation7 + $0x40] sm:$0xff]  ;;  %v83_v24 = vld [vmem:[%s8090_s0 + $0x8] sm:$0xff]  ;;  %v4738_v25 = vpack.c.bf16 %v449_v19, %v445_v18  ;;  %p6648_p10 = pnand %p6646_p9, %p6643_p8 }
  0x19   :  { %v448_v23 = vld [vmem:[#allocation7 + $0x60] sm:$0xff]  ;;  %4735 = vmatprep.subr.bf16.mxu0 %v4734_v9  ;;  %4767 = vmatprep.subr.bf16.mxu1 %v4766_v13  ;;  %v4770_v26 = vpack.c.bf16 %v451_v21, %v447_v20  ;;  %v446_v27 = vld [vmem:[#allocation7 + $0x50] sm:$0xff]  ;;  %v453_v31 = vld [vmem:[#allocation7 + $0x88] sm:$0xff]  ;;  %v6866_v16 = vshrl.u32 %v8102_v2, 7 }
  0x1a   :  { %v450_v28 = vld [vmem:[#allocation7 + $0x70] sm:$0xff]  ;;  %4737 = vmatpush1.bf16.msra.mxu0 %v4736_v14  ;;  %4769 = vmatpush1.bf16.msra.mxu1 %v4768_v17  ;;  %v4740_v29 = vpack.c.bf16 %v448_v23, %v444_v22  ;;  %v457_v32 = vld [vmem:[#allocation7 + $0xa8] sm:$0xff]  ;;  %v455_v33 = vld [vmem:[#allocation7 + $0x98] sm:$0xff] }
  0x1b   :  { %v4772_v30 = vpack.c.bf16 %v450_v28, %v446_v27  ;;  %222 = vmatprep.mubr.f32.mxu0 %v8103_v0  ;;  %335 = vmatprep.mubr.f32.mxu1 %v8103_v0  ;;  %v459_v34 = vld [vmem:[#allocation7 + $0xb8] sm:$0xff]  ;;  %v452_v35 = vld [vmem:[#allocation7 + $0x80] sm:$0xff]  ;;  %v454_v37 = vld [vmem:[#allocation7 + $0x90] sm:$0xff]  ;;  %v4742_v40 = vpack.c.bf16 %v457_v32, %v453_v31 }
  0x1c   :  { %v456_v36 = vld [vmem:[#allocation7 + $0xa0] sm:$0xff]  ;;  %4611 = vmatmul.mubr.msk.f32.gmra.mrb[2].mxu0 %vm118_vm1, %v83_v24  ;;  %4621 = vmatmul.mubr.msk.f32.gmra.mrb[2].mxu1 %vm118_vm1, %v83_v24  ;;  %v458_v38 = vld [vmem:[#allocation7 + $0xb0] sm:$0xff]  ;;  %v4774_v41 = vpack.c.bf16 %v459_v34, %v455_v33  ;;  %v461_v42 = vld [vmem:[#allocation7 + $0xc8] sm:$0xff] }
  0x1d   :  { %4739 = vmatprep.subr.bf16.mxu0 %v4738_v25  ;;  %4771 = vmatprep.subr.bf16.mxu1 %v4770_v26  ;;  %v84_v39 = vld [vmem:[%s8090_s0 + $0x10] sm:$0xff]  ;;  %v465_v43 = vld [vmem:[#allocation7 + $0xe8] sm:$0xff]  ;;  %v4744_v44 = vpack.c.bf16 %v456_v36, %v452_v35  ;;  %v4776_v45 = vpack.c.bf16 %v458_v38, %v454_v37  ;;  %v463_v46 = vld [vmem:[#allocation7 + $0xd8] sm:$0xff] }
  0x1e   :  { %4741 = vmatpush1.bf16.msra.mxu0 %v4740_v29  ;;  %4773 = vmatpush1.bf16.msra.mxu1 %v4772_v30  ;;  %v467_v47 = vld [vmem:[#allocation7 + $0xf8] sm:$0xff]  ;;  %v460_v48 = vld [vmem:[#allocation7 + $0xc0] sm:$0xff]  ;;  %v462_v50 = vld [vmem:[#allocation7 + $0xd0] sm:$0xff]  ;;  %v4746_v53 = vpack.c.bf16 %v465_v43, %v461_v42  ;;  %v96_v30 = vsub.s32 0, %v6866_v16 }
  0x1f   :  { %228 = vmatprep.mubr.f32.mxu0 %v8103_v0  ;;  %341 = vmatprep.mubr.f32.mxu1 %v8103_v0  ;;  %v464_v49 = vld [vmem:[#allocation7 + $0xe0] sm:$0xff]  ;;  %v466_v51 = vld [vmem:[#allocation7 + $0xf0] sm:$0xff]  ;;  %v85_v52 = vld [vmem:[%s8090_s0 + $0x18] sm:$0xff]  ;;  %v4778_v54 = vpack.c.bf16 %v467_v47, %v463_v46 }
  0x20   :  { %4612 = vmatmul.mubr.msk.f32.gmra.mrb[4].mxu0 %vm118_vm1, %v84_v39  ;;  %4622 = vmatmul.mubr.msk.f32.gmra.mrb[4].mxu1 %vm118_vm1, %v84_v39  ;;  %v469_v55 = vld [vmem:[#allocation7 + $0x108] sm:$0xff]  ;;  %v4748_v57 = vpack.c.bf16 %v464_v49, %v460_v48  ;;  %v4780_v58 = vpack.c.bf16 %v466_v51, %v462_v50  ;;  %v471_v59 = vld [vmem:[#allocation7 + $0x118] sm:$0xff]  ;;  %v468_v61 = vld [vmem:[#allocation7 + $0x100] sm:$0xff]  ;;  %v104_v51 = vsub.s32 2, %v6866_v16 }
  0x21   :  { %4743 = vmatprep.subr.bf16.mxu0 %v4742_v40  ;;  %4775 = vmatprep.subr.bf16.mxu1 %v4774_v41  ;;  %v473_v56 = vld [vmem:[#allocation7 + $0x128] sm:$0xff]  ;;  %v475_v60 = vld [vmem:[#allocation7 + $0x138] sm:$0xff]  ;;  %v472_v62 = vld [vmem:[#allocation7 + $0x120] sm:$0xff] }
  0x22   :  { %4745 = vmatpush1.bf16.msra.mxu0 %v4744_v44  ;;  %4777 = vmatpush1.bf16.msra.mxu1 %v4776_v45  ;;  %v470_v63 = vld [vmem:[#allocation7 + $0x110] sm:$0xff]  ;;  %v86_v3 = vld [vmem:[%s8090_s0 + $0x20] sm:$0xff]  ;;  %v4750_v4 = vpack.c.bf16 %v473_v56, %v469_v55  ;;  %v4782_v5 = vpack.c.bf16 %v475_v60, %v471_v59  ;;  %v477_v6 = vld [vmem:[#allocation7 + $0x148] sm:$0xff]  ;;  %v4752_v8 = vpack.c.bf16 %v472_v62, %v468_v61  ;;  %v108_v55 = vsub.s32 3, %v6866_v16 }
  0x23   :  { %234 = vmatprep.mubr.f32.mxu0 %v8103_v0  ;;  %347 = vmatprep.mubr.f32.mxu1 %v8103_v0  ;;  %v474_v1 = vld [vmem:[#allocation7 + $0x130] sm:$0xff]  ;;  %v481_v7 = vld [vmem:[#allocation7 + $0x168] sm:$0xff]  ;;  %v479_v10 = vld [vmem:[#allocation7 + $0x158] sm:$0xff] }
  0x24   :  { %4613 = vmatmul.mubr.msk.f32.gmra.mrb[6].mxu0 %vm118_vm1, %v85_v52  ;;  %4623 = vmatmul.mubr.msk.f32.gmra.mrb[6].mxu1 %vm118_vm1, %v85_v52  ;;  %v4784_v9 = vpack.c.bf16 %v474_v1, %v470_v63  ;;  %v483_v11 = vld [vmem:[#allocation7 + $0x178] sm:$0xff]  ;;  %v476_v12 = vld [vmem:[#allocation7 + $0x140] sm:$0xff]  ;;  %v478_v14 = vld [vmem:[#allocation7 + $0x150] sm:$0xff]  ;;  %v4754_v18 = vpack.c.bf16 %v481_v7, %v477_v6  ;;  %v100_v52 = vsub.s32 1, %v6866_v16 }
  0x25   :  { %4747 = vmatprep.subr.bf16.mxu0 %v4746_v53  ;;  %4779 = vmatprep.subr.bf16.mxu1 %v4778_v54  ;;  %v480_v13 = vld [vmem:[#allocation7 + $0x160] sm:$0xff]  ;;  %v482_v15 = vld [vmem:[#allocation7 + $0x170] sm:$0xff]  ;;  %v87_v17 = vld [vmem:[%s8090_s0 + $0x28] sm:$0xff]  ;;  %v4786_v19 = vpack.c.bf16 %v483_v11, %v479_v10 }
  0x26   :  { %4749 = vmatpush1.bf16.msra.mxu0 %v4748_v57  ;;  %4781 = vmatpush1.bf16.msra.mxu1 %v4780_v58  ;;  %v485_v20 = vld [vmem:[#allocation7 + $0x188] sm:$0xff]  ;;  %v4756_v22 = vpack.c.bf16 %v480_v13, %v476_v12  ;;  %v4788_v23 = vpack.c.bf16 %v482_v15, %v478_v14  ;;  %v487_v24 = vld [vmem:[#allocation7 + $0x198] sm:$0xff]  ;;  %v484_v26 = vld [vmem:[#allocation7 + $0x180] sm:$0xff] }
  0x27   :  { %240 = vmatprep.mubr.f32.mxu0 %v8103_v0  ;;  %353 = vmatprep.mubr.f32.mxu1 %v8103_v0  ;;  %v489_v21 = vld [vmem:[#allocation7 + $0x1a8] sm:$0xff]  ;;  %v491_v25 = vld [vmem:[#allocation7 + $0x1b8] sm:$0xff]  ;;  %v488_v27 = vld [vmem:[#allocation7 + $0x1a0] sm:$0xff] }
  0x28   :  { %4614 = vmatmul.mubr.msk.f32.gmra.mrb[8].mxu0 %vm118_vm1, %v86_v3  ;;  %4624 = vmatmul.mubr.msk.f32.gmra.mrb[8].mxu1 %vm118_vm1, %v86_v3  ;;  %v486_v28 = vld [vmem:[#allocation7 + $0x190] sm:$0xff]  ;;  %v410_v31 = vld [vmem:[%s8096_s6] sm:$0xf]  ;;  %v4758_v33 = vpack.c.bf16 %v489_v21, %v485_v20  ;;  %v4790_v34 = vpack.c.bf16 %v491_v25, %v487_v24  ;;  %v493_v35 = vld [vmem:[#allocation7 + $0x1c8] sm:$0xff]  ;;  %v4760_v38 = vpack.c.bf16 %v488_v27, %v484_v26 }
  0x29   :  { %4751 = vmatprep.subr.bf16.mxu0 %v4750_v4  ;;  %4783 = vmatprep.subr.bf16.mxu1 %v4782_v5  ;;  %v490_v29 = vld [vmem:[#allocation7 + $0x1b0] sm:$0xff]  ;;  %v497_v36 = vld [vmem:[#allocation7 + $0x1e8] sm:$0xff]  ;;  %v6886_v37 = vrot.slane %v410_v31, %v96_v30  ;;  %v495_v40 = vld [vmem:[#allocation7 + $0x1d8] sm:$0xff]  ;;  %v6907_v53 = vrot.slane %v410_v31, %v104_v51  ;;  %v6909_v54 = vrot.slane %v410_v31, %v100_v52 }
  0x2a   :  { %4753 = vmatpush1.bf16.msra.mxu0 %v4752_v8  ;;  %4785 = vmatpush1.bf16.msra.mxu1 %v4784_v9  ;;  %v88_v32 = vld [vmem:[%s8090_s0 + $0x30] sm:$0xff]  ;;  %v4792_v39 = vpack.c.bf16 %v490_v29, %v486_v28  ;;  %v499_v41 = vld [vmem:[#allocation7 + $0x1f8] sm:$0xff]  ;;  %v492_v42 = vld [vmem:[#allocation7 + $0x1c0] sm:$0xff]  ;;  %v4762_v47 = vpack.c.bf16 %v497_v36, %v493_v35  ;;  %v6912_v56 = vrot.slane %v410_v31, %v108_v55 }
  0x2b   :  { %246 = vmatprep.mubr.f32.mxu0 %v8103_v0  ;;  %359 = vmatprep.mubr.f32.mxu1 %v8103_v0  ;;  %8276 = vst [vmem:[#allocation24_spill] sm:$0xff] %v6886_v37  ;;  %v496_v43 = vld [vmem:[#allocation7 + $0x1e0] sm:$0xff]  ;;  %v494_v44 = vld [vmem:[#allocation7 + $0x1d0] sm:$0xff]  ;;  %v89_v46 = vld [vmem:[%s8090_s0 + $0x38] sm:$0xff]  ;;  %v4794_v48 = vpack.c.bf16 %v499_v41, %v495_v40  ;;  %s6744_s0 = smov [#allocation3]  }
  0x2c   :  { %4615 = vmatmul.mubr.msk.f32.gmra.mrb[10].mxu0 %vm118_vm1, %v87_v17  ;;  %4625 = vmatmul.mubr.msk.f32.gmra.mrb[10].mxu1 %vm118_vm1, %v87_v17  ;;  %v498_v45 = vld [vmem:[#allocation7 + $0x1f0] sm:$0xff]  ;;  %v4764_v49 = vpack.c.bf16 %v496_v43, %v492_v42  ;;  %8277 = vst [vmem:[#allocation25_spill] sm:$0xff] %v6907_v53  ;;  %8278 = vst [vmem:[#allocation26_spill] sm:$0xff] %v6909_v54  ;;  %s54_s12 = sshll.u32 %s6744_s0, 4  ;;  %s55_s12 = int_to_ptr.vmem [resolvable:$true] %s54_s12 }
  0x2d   :  { %4755 = vmatprep.subr.bf16.mxu0 %v4754_v18  ;;  %4787 = vmatprep.subr.bf16.mxu1 %v4786_v19  ;;  %v4796_v50 = vpack.c.bf16 %v498_v45, %v494_v44  ;;  %8279 = vst [vmem:[#allocation27_spill] sm:$0xff] %v6912_v56 }
  0x2e   :  { %4757 = vmatpush1.bf16.msra.mxu0 %v4756_v22  ;;  %4789 = vmatpush1.bf16.msra.mxu1 %v4788_v23 }
  0x2f   :  { %252 = vmatprep.mubr.f32.mxu0 %v8103_v0  ;;  %365 = vmatprep.mubr.f32.mxu1 %v8103_v0 }
  0x30   :  { %4616 = vmatmul.mubr.msk.f32.gmra.mrb[12].mxu0 %vm118_vm1, %v88_v32  ;;  %4626 = vmatmul.mubr.msk.f32.gmra.mrb[12].mxu1 %vm118_vm1, %v88_v32 }
  0x31   :  { %4759 = vmatprep.subr.bf16.mxu0 %v4758_v33  ;;  %4791 = vmatprep.subr.bf16.mxu1 %v4790_v34 }
  0x32   :  { %4761 = vmatpush1.bf16.msra.mxu0 %v4760_v38  ;;  %4793 = vmatpush1.bf16.msra.mxu1 %v4792_v39 }
  0x33   :  { %258 = vmatprep.mubr.f32.mxu0 %v8103_v0  ;;  %371 = vmatprep.mubr.f32.mxu1 %v8103_v0 }
  0x34   :  { %4617 = vmatmul.mubr.msk.f32.gmra.mrb[14].mxu0 %vm118_vm1, %v89_v46  ;;  %4627 = vmatmul.mubr.msk.f32.gmra.mrb[14].mxu1 %vm118_vm1, %v89_v46 }
  0x35   :  { %4763 = vmatprep.subr.bf16.mxu0 %v4762_v47  ;;  %4795 = vmatprep.subr.bf16.mxu1 %v4794_v48 }
  0x36   :  { %4765 = vmatpush1.bf16.msra.mxu0 %v4764_v49  ;;  %4797 = vmatpush1.bf16.msra.mxu1 %v4796_v50 }
  0x37   :  { %564 = vmatprep.mubr.f32.mxu0 %v8103_v0  ;;  %635 = vmatprep.mubr.f32.mxu1 %v8103_v0 }
  0x39   :  { %565 = vmatmul.mubr.f32.vlgmr.msra.gmra.mrb[0].mxu0 %v8103_v0  ;;  %636 = vmatmul.mubr.f32.vlgmr.msra.gmra.mrb[0].mxu1 %v8103_v0 }
  0x3a   :  { %6651 = shalt.err (!%p6648_p10)  }
  0x3b   :  { %s6652_s20 = scalar_lea.vmem %s55_s12, 8192  ;;  %p6657_p12 = scmp.lt.s32.totalorder %s55_s12, %s55_s12 }
  0x3c   :  { %p6653_p11 = scmp.ne.s32.totalorder %s55_s12, %s6652_s20  ;;  %p6658_p13 = scmp.lt.s32.totalorder %s6652_s20, %s6652_s20 }
  0x3e   :  { %p6659_p0 = por %p6658_p13, %p6657_p12 }
  0x40   :  { %p6660_p1 = pnand %p6659_p0, %p6653_p11 }
  0x42   :  { %6663 = shalt.err (!%p6660_p1)  }
  0x43   :  { %57 = dma.hbm_to_vmem [thread:$0]  %s8094_s4, 8192, %s55_s12, [#allocation6] }
  0x44   :  { %s6664_s25 = scalar_lea.hbm %s8095_s5, 8192 }
  0x45   :  { %p6665_p2 = scmp.ne.s32.totalorder %s8095_s5, %s6664_s25  ;;  %p6668_p3 = scmp.lt.u32.totalorder %s6664_s25, %s8095_s5 }
  0x47   :  { %p6670_p4 = pnand %p6668_p3, %p6665_p2 }
  0x49   :  { %6673 = shalt.err (!%p6670_p4)  }
  0x4a   :  { %s6674_s6 = scalar_lea.vmem %s67_s14, 8192  ;;  %p6679_p6 = scmp.lt.s32.totalorder %s67_s14, %s67_s14 }
  0x4b   :  { %p6675_p5 = scmp.ne.s32.totalorder %s67_s14, %s6674_s6  ;;  %p6680_p7 = scmp.lt.s32.totalorder %s6674_s6, %s6674_s6 }
  0x4d   :  { %p6681_p8 = por %p6680_p7, %p6679_p6 }
  0x4f   :  { %p6682_p9 = pnand %p6681_p8, %p6675_p5 }
  0x51   :  { %6685 = shalt.err (!%p6682_p9)  }
  0x52   :  { %69 = dma.hbm_to_vmem [thread:$0]  %s8095_s5, 8192, %s67_s14, [#allocation6 + $0x1] }
  0x53   :  { %s6746_s0 = smov [#allocation5]   ;;  %s6686_s16 = scalar_lea.hbm %s8099_s9, 2048 }
  0x54   :  { %s78_s12 = sshll.u32 %s6746_s0, 4  ;;  %p6687_p10 = scmp.ne.s32.totalorder %s8099_s9, %s6686_s16  ;;  %s79_s12 = int_to_ptr.vmem [resolvable:$true] %s78_s12 }
  0x55   :  { %p6690_p11 = scmp.lt.u32.totalorder %s6686_s16, %s8099_s9 }
  0x57   :  { %p6692_p12 = pnand %p6690_p11, %p6687_p10 }
  0x59   :  { %6695 = shalt.err (!%p6692_p12)  }
  0x5a   :  { %s6696_s19 = scalar_lea.vmem %s79_s12, 2048  ;;  %p6701_p0 = scmp.lt.s32.totalorder %s79_s12, %s79_s12 }
  0x5b   :  { %p6697_p13 = scmp.ne.s32.totalorder %s79_s12, %s6696_s19  ;;  %p6702_p1 = scmp.lt.s32.totalorder %s6696_s19, %s6696_s19 }
  0x5d   :  { %p6703_p2 = por %p6702_p1, %p6701_p0 }
  0x5f   :  { %p6704_p3 = pnand %p6703_p2, %p6697_p13 }
  0x61   :  { %6707 = shalt.err (!%p6704_p3)  }
  0x62   :  { %81 = dma.hbm_to_vmem [thread:$0]  %s8099_s9, 2048, %s79_s12, [#allocation6 + $0x2]  ;;  %v92_v57 = vld [vmem:[%s8093_s3] sm:$0xf] }
  0x63   :  { %v6955_v58 = vrot.slane %v92_v57, %v96_v30  ;;  %v6957_v59 = vrot.slane %v92_v57, %v100_v52  ;;  %v6961_v6 = vrot.slane %v92_v57, %v108_v55  ;;  %v6966_v8 = vrot.slane %v92_v57, %v104_v51 }
  0x65   :  { %8280 = vst [vmem:[#allocation28_spill] sm:$0xff] %v6955_v58  ;;  %8281 = vst [vmem:[#allocation29_spill] sm:$0xff] %v6957_v59 }
  0x66   :  { %8282 = vst [vmem:[#allocation30_spill] sm:$0xff] %v6961_v6  ;;  %8283 = vst [vmem:[#allocation31_spill] sm:$0xff] %v6966_v8 }
 0x10c   :  { %v566_v60 = vpop.f32.mrb[0].mxu0  ;;  %v637_v61 = vpop.f32.mrb[0].mxu1 }
 0x10d   :  { %v6230_v62 = vadd.f32 %v566_v60, %v6955_v58  ;;  %v568_v63 = vpop.f32.mrb[1].mxu0  ;;  %v639_v1 = vpop.f32.mrb[1].mxu1  ;;  %v6246_v10 = vadd.f32 %v637_v61, %v6966_v8 }
 0x10e   :  { %v6231_v3 = vadd.f32 %v568_v63, %v6957_v59  ;;  %v6247_v7 = vadd.f32 %v639_v1, %v6961_v6 }
 0x10f   :  { %v4629_v4 = vmul.f32 -1.442695, %v6230_v62 }
 0x110   :  { %v4628_v5 = vmul.f32 -1.442695, %v6231_v3  ;;  %v4630_v9 = vmul.f32 -1.442695, %v6247_v7 }
 0x111   :  { %6362 = vpow2.f32 %v4629_v4 }
 0x112   :  { %6364 = vpow2.f32 %v4628_v5 }
 0x113   :  { %6366 = vpow2.f32 %v4630_v9 }
 0x114   :  { %6368 = vtanh.f32 %v6246_v10 }
 0x11b   :  { %v6363_v11 = vpop.eup %6362 }
 0x11c   :  { %v6365_v12 = vpop.eup %6364  ;;  %v656_v13 = vadd.f32 1.0, %v6363_v11 }
 0x11d   :  { %v649_v14 = vadd.f32 1.0, %v6365_v12  ;;  %v6367_v15 = vpop.eup %6366 }
 0x11e   :  { %6370 = vrcp.f32 %v656_v13  ;;  %v6369_v17 = vpop.eup %6368  ;;  %v665_v21 = vadd.f32 1.0, %v6367_v15 }
 0x11f   :  { %6372 = vrcp.f32 %v649_v14 }
 0x120   :  { %6374 = vrcp.f32 %v665_v21 }
 0x128   :  { %v6371_v18 = vpop.eup %6370 }
 0x129   :  { %v6373_v19 = vpop.eup %6372  ;;  %v660_v20 = vmul.f32 %v6371_v18, %v6369_v17 }
 0x12a   :  { %v652_v16 = vmul.f32 0.0, %v6373_v19  ;;  %v6375_v23 = vpop.eup %6374 }
 0x12c   :  { %v6969_v22 = vadd.f32 %v660_v20, %v652_v16 }
 0x12e   :  { %6376 = vtanh.f32 %v6969_v22 }
 0x138   :  { %v6377_v24 = vpop.eup %6376 }
 0x139   :  { %v6972_v25 = vmul.f32 %v6377_v24, %v6375_v23 }
 0x13a   :  { %6732 = dma.done.wait [#allocation6], 8192 }
 0x13b   :  { %6733 = vsyncadd [#allocation6], 4294959104 }
 0x13c   :  { %6734 = dma.done.wait [#allocation6 + $0x1], 8192 }
 0x13d   :  { %6735 = vsyncadd [#allocation6 + $0x1], 4294959104  ;;  %804 = vmatprep.mubr.f32.mxu0 %v8103_v0  ;;  %875 = vmatprep.mubr.f32.mxu1 %v8103_v0  ;;  %v677_v26 = vld [vmem:[#allocation3 + $0x8] sm:$0xff]  ;;  %v676_v28 = vld [vmem:[#allocation3] sm:$0xff] }
 0x13e   :  { %v681_v27 = vld [vmem:[#allocation3 + $0x28] sm:$0xff]  ;;  %v680_v30 = vld [vmem:[#allocation3 + $0x20] sm:$0xff]  ;;  %v679_v45 = vld [vmem:[#allocation3 + $0x18] sm:$0xff] }
 0x13f   :  { %v6976_v29 = vpack.c.bf16 %v681_v27, %v677_v26  ;;  %v685_v31 = vld [vmem:[#allocation3 + $0x48] sm:$0xff]  ;;  %v6978_v33 = vpack.c.bf16 %v680_v30, %v676_v28  ;;  %v684_v35 = vld [vmem:[#allocation3 + $0x40] sm:$0xff]  ;;  %v683_v46 = vld [vmem:[#allocation3 + $0x38] sm:$0xff] }
 0x140   :  { %v689_v32 = vld [vmem:[#allocation3 + $0x68] sm:$0xff]  ;;  %v688_v36 = vld [vmem:[#allocation3 + $0x60] sm:$0xff]  ;;  %v6989_v48 = vpack.c.bf16 %v683_v46, %v679_v45  ;;  %v678_v49 = vld [vmem:[#allocation3 + $0x10] sm:$0xff] }
 0x141   :  { %v6980_v34 = vpack.c.bf16 %v689_v32, %v685_v31  ;;  %v693_v38 = vld [vmem:[#allocation3 + $0x88] sm:$0xff]  ;;  %4799 = vmatprep.subr.bf16.mxu0 %v6976_v29  ;;  %v6984_v40 = vpack.c.bf16 %v688_v36, %v684_v35  ;;  %v692_v41 = vld [vmem:[#allocation3 + $0x80] sm:$0xff]  ;;  %v682_v50 = vld [vmem:[#allocation3 + $0x30] sm:$0xff] }
 0x142   :  { %v697_v39 = vld [vmem:[#allocation3 + $0xa8] sm:$0xff]  ;;  %4801 = vmatpush1.bf16.msra.mxu0 %v6978_v33  ;;  %v696_v42 = vld [vmem:[#allocation3 + $0xa0] sm:$0xff]  ;;  %v6991_v51 = vpack.c.bf16 %v682_v50, %v678_v49  ;;  %4831 = vmatprep.subr.bf16.mxu1 %v6989_v48  ;;  %v687_v55 = vld [vmem:[#allocation3 + $0x58] sm:$0xff] }
 0x143   :  { %4803 = vmatprep.subr.bf16.mxu0 %v6980_v34  ;;  %v6987_v43 = vpack.c.bf16 %v697_v39, %v693_v38  ;;  %v701_v44 = vld [vmem:[#allocation3 + $0xc8] sm:$0xff]  ;;  %v6994_v52 = vpack.c.bf16 %v696_v42, %v692_v41  ;;  %v691_v57 = vld [vmem:[#allocation3 + $0x78] sm:$0xff]  ;;  %v686_v60 = vld [vmem:[#allocation3 + $0x50] sm:$0xff] }
 0x144   :  { %v705_v47 = vld [vmem:[#allocation3 + $0xe8] sm:$0xff]  ;;  %v700_v62 = vld [vmem:[#allocation3 + $0xc0] sm:$0xff]  ;;  %4833 = vmatpush1.bf16.msra.mxu1 %v6991_v51  ;;  %v7001_v1 = vpack.c.bf16 %v691_v57, %v687_v55  ;;  %v690_v3 = vld [vmem:[#allocation3 + $0x70] sm:$0xff] }
 0x145   :  { %8284 = vst [vmem:[#allocation32_spill] sm:$0xff] %v6994_v52  ;;  %v6998_v61 = vpack.c.bf16 %v705_v47, %v701_v44  ;;  %v704_v63 = vld [vmem:[#allocation3 + $0xe0] sm:$0xff]  ;;  %v709_v4 = vld [vmem:[#allocation3 + $0x108] sm:$0xff]  ;;  %v7003_v7 = vpack.c.bf16 %v690_v3, %v686_v60  ;;  %v695_v9 = vld [vmem:[#allocation3 + $0x98] sm:$0xff] }
 0x146   :  { %4805 = vmatpush1.bf16.msra.mxu0 %v6984_v40  ;;  %v713_v5 = vld [vmem:[#allocation3 + $0x128] sm:$0xff]  ;;  %4835 = vmatprep.subr.bf16.mxu1 %v7001_v1  ;;  %v699_v10 = vld [vmem:[#allocation3 + $0xb8] sm:$0xff]  ;;  %v694_v11 = vld [vmem:[#allocation3 + $0x90] sm:$0xff]  ;;  %v7007_v13 = vpack.c.bf16 %v704_v63, %v700_v62 }
 0x147   :  { %4807 = vmatprep.subr.bf16.mxu0 %v6987_v43  ;;  %8285 = vst [vmem:[#allocation33_spill] sm:$0xff] %v6998_v61  ;;  %v698_v12 = vld [vmem:[#allocation3 + $0xb0] sm:$0xff]  ;;  %v708_v14 = vld [vmem:[#allocation3 + $0x100] sm:$0xff]  ;;  %v7009_v17 = vpack.c.bf16 %v699_v10, %v695_v9  ;;  %v7012_v18 = vpack.c.bf16 %v713_v5, %v709_v4  ;;  %v717_v19 = vld [vmem:[#allocation3 + $0x148] sm:$0xff] }
 0x148   :  { %8286 = vst [vmem:[#allocation34_spill] sm:$0xff] %v7007_v13  ;;  %v712_v15 = vld [vmem:[#allocation3 + $0x120] sm:$0xff]  ;;  %4837 = vmatpush1.bf16.msra.mxu1 %v7003_v7  ;;  %v7015_v20 = vpack.c.bf16 %v698_v12, %v694_v11  ;;  %v703_v21 = vld [vmem:[#allocation3 + $0xd8] sm:$0xff]  ;;  %v721_v23 = vld [vmem:[#allocation3 + $0x168] sm:$0xff] }
 0x149   :  { %8287 = vst [vmem:[#allocation35_spill] sm:$0xff] %v7012_v18  ;;  %v707_v16 = vld [vmem:[#allocation3 + $0xf8] sm:$0xff]  ;;  %4839 = vmatprep.subr.bf16.mxu1 %v7009_v17  ;;  %v702_v26 = vld [vmem:[#allocation3 + $0xd0] sm:$0xff]  ;;  %v7021_v28 = vpack.c.bf16 %v712_v15, %v708_v14  ;;  %v7024_v32 = vpack.c.bf16 %v721_v23, %v717_v19  ;;  %v716_v35 = vld [vmem:[#allocation3 + $0x140] sm:$0xff] }
 0x14a   :  { %4809 = vmatpush1.bf16.msra.mxu0 %v6994_v52  ;;  %8288 = vst [vmem:[#allocation36_spill] sm:$0xff] %v7015_v20  ;;  %v7018_v24 = vpack.c.bf16 %v707_v16, %v703_v21  ;;  %v706_v27 = vld [vmem:[#allocation3 + $0xf0] sm:$0xff]  ;;  %v711_v30 = vld [vmem:[#allocation3 + $0x118] sm:$0xff]  ;;  %v720_v36 = vld [vmem:[#allocation3 + $0x160] sm:$0xff] }
 0x14b   :  { %4811 = vmatprep.subr.bf16.mxu0 %v6998_v61  ;;  %8290 = vst [vmem:[#allocation38_spill] sm:$0xff] %v7021_v28  ;;  %v715_v31 = vld [vmem:[#allocation3 + $0x138] sm:$0xff]  ;;  %8291 = vst [vmem:[#allocation39_spill] sm:$0xff] %v7024_v32  ;;  %v725_v38 = vld [vmem:[#allocation3 + $0x188] sm:$0xff]  ;;  %v7027_v39 = vpack.c.bf16 %v706_v27, %v702_v26  ;;  %v7033_v49 = vpack.c.bf16 %v720_v36, %v716_v35 }
 0x14c   :  { %8289 = vst [vmem:[#allocation37_spill] sm:$0xff] %v7018_v24  ;;  %4841 = vmatpush1.bf16.msra.mxu1 %v7015_v20  ;;  %v729_v41 = vld [vmem:[#allocation3 + $0x1a8] sm:$0xff]  ;;  %v7030_v42 = vpack.c.bf16 %v715_v31, %v711_v30  ;;  %v710_v44 = vld [vmem:[#allocation3 + $0x110] sm:$0xff]  ;;  %v719_v46 = vld [vmem:[#allocation3 + $0x158] sm:$0xff] }
 0x14d   :  { %8292 = vst [vmem:[#allocation40_spill] sm:$0xff] %v7027_v39  ;;  %4843 = vmatprep.subr.bf16.mxu1 %v7018_v24  ;;  %v714_v45 = vld [vmem:[#allocation3 + $0x130] sm:$0xff]  ;;  %v723_v47 = vld [vmem:[#allocation3 + $0x178] sm:$0xff]  ;;  %8294 = vst [vmem:[#allocation42_spill] sm:$0xff] %v7033_v49  ;;  %v7036_v50 = vpack.c.bf16 %v729_v41, %v725_v38 }
 0x14e   :  { %4813 = vmatpush1.bf16.msra.mxu0 %v7007_v13  ;;  %8293 = vst [vmem:[#allocation41_spill] sm:$0xff] %v7030_v42  ;;  %v724_v55 = vld [vmem:[#allocation3 + $0x180] sm:$0xff]  ;;  %v733_v60 = vld [vmem:[#allocation3 + $0x1c8] sm:$0xff]  ;;  %v7039_v62 = vpack.c.bf16 %v714_v45, %v710_v44  ;;  %v7042_v3 = vpack.c.bf16 %v723_v47, %v719_v46  ;;  %v718_v4 = vld [vmem:[#allocation3 + $0x150] sm:$0xff] }
 0x14f   :  { %4815 = vmatprep.subr.bf16.mxu0 %v7012_v18  ;;  %8295 = vst [vmem:[#allocation43_spill] sm:$0xff] %v7036_v50  ;;  %v728_v57 = vld [vmem:[#allocation3 + $0x1a0] sm:$0xff]  ;;  %v737_v63 = vld [vmem:[#allocation3 + $0x1e8] sm:$0xff]  ;;  %v722_v5 = vld [vmem:[#allocation3 + $0x170] sm:$0xff] }
 0x150   :  { %4845 = vmatpush1.bf16.msra.mxu1 %v7027_v39  ;;  %8296 = vst [vmem:[#allocation44_spill] sm:$0xff] %v7039_v62  ;;  %8297 = vst [vmem:[#allocation45_spill] sm:$0xff] %v7042_v3  ;;  %v727_v9 = vld [vmem:[#allocation3 + $0x198] sm:$0xff]  ;;  %v7045_v11 = vpack.c.bf16 %v728_v57, %v724_v55  ;;  %v7048_v12 = vpack.c.bf16 %v737_v63, %v733_v60  ;;  %v732_v14 = vld [vmem:[#allocation3 + $0x1c0] sm:$0xff]  ;;  %v7051_v19 = vpack.c.bf16 %v722_v5, %v718_v4 }
 0x151   :  { %4847 = vmatprep.subr.bf16.mxu1 %v7030_v42  ;;  %v731_v10 = vld [vmem:[#allocation3 + $0x1b8] sm:$0xff]  ;;  %v736_v15 = vld [vmem:[#allocation3 + $0x1e0] sm:$0xff]  ;;  %v726_v16 = vld [vmem:[#allocation3 + $0x190] sm:$0xff] }
 0x152   :  { %4817 = vmatpush1.bf16.msra.mxu0 %v7021_v28  ;;  %8298 = vst [vmem:[#allocation46_spill] sm:$0xff] %v7045_v11  ;;  %8299 = vst [vmem:[#allocation47_spill] sm:$0xff] %v7048_v12  ;;  %v7054_v21 = vpack.c.bf16 %v731_v10, %v727_v9  ;;  %v730_v23 = vld [vmem:[#allocation3 + $0x1b0] sm:$0xff]  ;;  %v735_v26 = vld [vmem:[#allocation3 + $0x1d8] sm:$0xff]  ;;  %v7057_v30 = vpack.c.bf16 %v736_v15, %v732_v14 }
 0x153   :  { %4819 = vmatprep.subr.bf16.mxu0 %v7024_v32  ;;  %8300 = vst [vmem:[#allocation48_spill] sm:$0xff] %v7051_v19  ;;  %v739_v27 = vld [vmem:[#allocation3 + $0x1f8] sm:$0xff]  ;;  %v7061_v31 = vpack.c.bf16 %v730_v23, %v726_v16  ;;  %v734_v36 = vld [vmem:[#allocation3 + $0x1d0] sm:$0xff]  ;;  %v911_v44 = vld [vmem:[#allocation4 + $0x8] sm:$0xff] }
 0x154   :  { %4849 = vmatpush1.bf16.msra.mxu1 %v7039_v62  ;;  %8301 = vst [vmem:[#allocation49_spill] sm:$0xff] %v7054_v21  ;;  %8302 = vst [vmem:[#allocation50_spill] sm:$0xff] %v7057_v30  ;;  %v7064_v35 = vpack.c.bf16 %v739_v27, %v735_v26  ;;  %v738_v38 = vld [vmem:[#allocation3 + $0x1f0] sm:$0xff]  ;;  %v915_v45 = vld [vmem:[#allocation4 + $0x28] sm:$0xff] }
 0x155   :  { %4851 = vmatprep.subr.bf16.mxu1 %v7042_v3  ;;  %8303 = vst [vmem:[#allocation51_spill] sm:$0xff] %v7061_v31  ;;  %v7068_v41 = vpack.c.bf16 %v738_v38, %v734_v36  ;;  %v7076_v46 = vpack.c.bf16 %v915_v45, %v911_v44  ;;  %v910_v47 = vld [vmem:[#allocation4] sm:$0xff]  ;;  %v913_v57 = vld [vmem:[#allocation4 + $0x18] sm:$0xff]  ;;  %v912_v4 = vld [vmem:[#allocation4 + $0x10] sm:$0xff] }
 0x156   :  { %4821 = vmatpush1.bf16.msra.mxu0 %v7033_v49  ;;  %8304 = vst [vmem:[#allocation52_spill] sm:$0xff] %v7064_v35  ;;  %v914_v55 = vld [vmem:[#allocation4 + $0x20] sm:$0xff]  ;;  %v917_v63 = vld [vmem:[#allocation4 + $0x38] sm:$0xff]  ;;  %v916_v5 = vld [vmem:[#allocation4 + $0x30] sm:$0xff] }
 0x157   :  { %4823 = vmatprep.subr.bf16.mxu0 %v7036_v50  ;;  %8305 = vst [vmem:[#allocation53_spill] sm:$0xff] %v7068_v41  ;;  %8306 = vst [vmem:[#allocation54_spill] sm:$0xff] %v7076_v46  ;;  %v7078_v60 = vpack.c.bf16 %v914_v55, %v910_v47  ;;  %v7081_v9 = vpack.c.bf16 %v917_v63, %v913_v57  ;;  %v7083_v10 = vpack.c.bf16 %v916_v5, %v912_v4  ;;  %v919_v14 = vld [vmem:[#allocation4 + $0x48] sm:$0xff]  ;;  %v918_v23 = vld [vmem:[#allocation4 + $0x40] sm:$0xff] }
 0x158   :  { %4853 = vmatpush1.bf16.msra.mxu1 %v7051_v19  ;;  %v923_v15 = vld [vmem:[#allocation4 + $0x68] sm:$0xff]  ;;  %v922_v26 = vld [vmem:[#allocation4 + $0x60] sm:$0xff]  ;;  %v921_v27 = vld [vmem:[#allocation4 + $0x58] sm:$0xff] }
 0x159   :  { %4855 = vmatprep.subr.bf16.mxu1 %v7054_v21  ;;  %8307 = vst [vmem:[#allocation55_spill] sm:$0xff] %v7078_v60  ;;  %8308 = vst [vmem:[#allocation56_spill] sm:$0xff] %v7081_v9  ;;  %v7087_v16 = vpack.c.bf16 %v923_v15, %v919_v14  ;;  %v7090_v36 = vpack.c.bf16 %v922_v26, %v918_v23  ;;  %v925_v38 = vld [vmem:[#allocation4 + $0x78] sm:$0xff]  ;;  %v920_v44 = vld [vmem:[#allocation4 + $0x50] sm:$0xff] }
 0x15a   :  { %4825 = vmatpush1.bf16.msra.mxu0 %v7045_v11  ;;  %8309 = vst [vmem:[#allocation57_spill] sm:$0xff] %v7083_v10  ;;  %v924_v45 = vld [vmem:[#allocation4 + $0x70] sm:$0xff]  ;;  %v7093_v47 = vpack.c.bf16 %v925_v38, %v921_v27  ;;  %v927_v57 = vld [vmem:[#allocation4 + $0x88] sm:$0xff]  ;;  %v926_v5 = vld [vmem:[#allocation4 + $0x80] sm:$0xff] }
 0x15b   :  { %4827 = vmatprep.subr.bf16.mxu0 %v7048_v12  ;;  %8310 = vst [vmem:[#allocation58_spill] sm:$0xff] %v7087_v16  ;;  %8311 = vst [vmem:[#allocation59_spill] sm:$0xff] %v7090_v36  ;;  %v7095_v55 = vpack.c.bf16 %v924_v45, %v920_v44  ;;  %v931_v63 = vld [vmem:[#allocation4 + $0xa8] sm:$0xff]  ;;  %v930_v14 = vld [vmem:[#allocation4 + $0xa0] sm:$0xff] }
 0x15c   :  { %4857 = vmatpush1.bf16.msra.mxu1 %v7061_v31  ;;  %8312 = vst [vmem:[#allocation60_spill] sm:$0xff] %v7093_v47  ;;  %v7099_v4 = vpack.c.bf16 %v931_v63, %v927_v57  ;;  %v929_v15 = vld [vmem:[#allocation4 + $0x98] sm:$0xff]  ;;  %v7102_v23 = vpack.c.bf16 %v930_v14, %v926_v5  ;;  %v928_v27 = vld [vmem:[#allocation4 + $0x90] sm:$0xff]  ;;  %v935_v57 = vld [vmem:[#allocation4 + $0xc8] sm:$0xff] }
 0x15d   :  { %4859 = vmatprep.subr.bf16.mxu1 %v7064_v35  ;;  %8313 = vst [vmem:[#allocation61_spill] sm:$0xff] %v7095_v55  ;;  %v933_v26 = vld [vmem:[#allocation4 + $0xb8] sm:$0xff]  ;;  %v932_v38 = vld [vmem:[#allocation4 + $0xb0] sm:$0xff]  ;;  %v939_v63 = vld [vmem:[#allocation4 + $0xe8] sm:$0xff] }
 0x15e   :  { %4829 = vmatpush1.bf16.msra.mxu0 %v7057_v30  ;;  %8314 = vst [vmem:[#allocation62_spill] sm:$0xff] %v7099_v4  ;;  %8315 = vst [vmem:[#allocation63_spill] sm:$0xff] %v7102_v23  ;;  %v7105_v44 = vpack.c.bf16 %v933_v26, %v929_v15  ;;  %v7107_v45 = vpack.c.bf16 %v932_v38, %v928_v27  ;;  %v7111_v2 = vpack.c.bf16 %v939_v63, %v935_v57  ;;  %v938_v5 = vld [vmem:[#allocation4 + $0xe0] sm:$0xff]  ;;  %v937_v14 = vld [vmem:[#allocation4 + $0xd8] sm:$0xff] }
 0x15f   :  { %4863 = vmatprep.subr.bf16.mxu0 %v7076_v46  ;;  %v936_v15 = vld [vmem:[#allocation4 + $0xd0] sm:$0xff]  ;;  %v943_v57 = vld [vmem:[#allocation4 + $0x108] sm:$0xff] }
 0x160   :  { %4861 = vmatpush1.bf16.msra.mxu1 %v7068_v41  ;;  %8316 = vst [vmem:[#allocation64_spill] sm:$0xff] %v7105_v44  ;;  %8317 = vst [vmem:[#allocation65_spill] sm:$0xff] %v7107_v45  ;;  %v940_v26 = vld [vmem:[#allocation4 + $0xf0] sm:$0xff]  ;;  %v947_v63 = vld [vmem:[#allocation4 + $0x128] sm:$0xff] }
 0x161   :  { %805 = vmatmul.mubr.f32.vlgmr.msra.gmra.mrb[16].mxu0 %v6972_v25  ;;  %4895 = vmatprep.subr.bf16.mxu1 %v7081_v9  ;;  %8318 = vst [vmem:[#allocation66_spill] sm:$0xff] %v7111_v2  ;;  %v7119_v38 = vpack.c.bf16 %v940_v26, %v936_v15 }
 0x162   :  { %1038 = vmatprep.mubr.f32.mxu0 %v8103_v0  ;;  %4865 = vmatpush1.bf16.msra.mxu0 %v7078_v60 }
 0x163   :  { %876 = vmatmul.mubr.f32.vlgmr.msra.gmra.mrb[16].mxu1 %v6972_v25  ;;  %4867 = vmatprep.subr.bf16.mxu0 %v7087_v16  ;;  %8321 = vst [vmem:[#allocation69_spill] sm:$0xff] %v7119_v38  ;;  %v1139_v16 = vld [vmem:[#allocation7 + $0x98] sm:$0xff] }
 0x164   :  { %1109 = vmatprep.mubr.f32.mxu1 %v8103_v0  ;;  %4897 = vmatpush1.bf16.msra.mxu1 %v7083_v10  ;;  %v934_v0 = vld [vmem:[#allocation4 + $0xc0] sm:$0xff]  ;;  %v1143_v10 = vld [vmem:[#allocation7 + $0xb8] sm:$0xff] }
 0x165   :  { %4899 = vmatprep.subr.bf16.mxu1 %v7093_v47 }
 0x166   :  { %4869 = vmatpush1.bf16.msra.mxu0 %v7090_v36  ;;  %v962_v36 = vld [vmem:[#allocation4 + $0x1a0] sm:$0xff] }
 0x167   :  { %4871 = vmatprep.subr.bf16.mxu0 %v7099_v4  ;;  %v941_v4 = vld [vmem:[#allocation4 + $0xf8] sm:$0xff] }
 0x168   :  { %4901 = vmatpush1.bf16.msra.mxu1 %v7095_v55  ;;  %v7114_v55 = vpack.c.bf16 %v938_v5, %v934_v0  ;;  %v7117_v27 = vpack.c.bf16 %v941_v4, %v937_v14  ;;  %v946_v0 = vld [vmem:[#allocation4 + $0x120] sm:$0xff]  ;;  %v945_v5 = vld [vmem:[#allocation4 + $0x118] sm:$0xff]  ;;  %v944_v4 = vld [vmem:[#allocation4 + $0x110] sm:$0xff] }
 0x169   :  { %4903 = vmatprep.subr.bf16.mxu1 %v7105_v44  ;;  %v948_v14 = vld [vmem:[#allocation4 + $0x130] sm:$0xff] }
 0x16a   :  { %4873 = vmatpush1.bf16.msra.mxu0 %v7102_v23  ;;  %8319 = vst [vmem:[#allocation67_spill] sm:$0xff] %v7114_v55  ;;  %8320 = vst [vmem:[#allocation68_spill] sm:$0xff] %v7117_v27  ;;  %v7123_v23 = vpack.c.bf16 %v947_v63, %v943_v57  ;;  %v7131_v26 = vpack.c.bf16 %v948_v14, %v944_v4  ;;  %v951_v57 = vld [vmem:[#allocation4 + $0x148] sm:$0xff] }
 0x16b   :  { %4875 = vmatprep.subr.bf16.mxu0 %v7111_v2  ;;  %v949_v2 = vld [vmem:[#allocation4 + $0x138] sm:$0xff]  ;;  %v955_v63 = vld [vmem:[#allocation4 + $0x168] sm:$0xff] }
 0x16c   :  { %4905 = vmatpush1.bf16.msra.mxu1 %v7107_v45  ;;  %8322 = vst [vmem:[#allocation70_spill] sm:$0xff] %v7123_v23  ;;  %v942_v45 = vld [vmem:[#allocation4 + $0x100] sm:$0xff]  ;;  %v7129_v15 = vpack.c.bf16 %v949_v2, %v945_v5  ;;  %8325 = vst [vmem:[#allocation73_spill] sm:$0xff] %v7131_v26  ;;  %v952_v2 = vld [vmem:[#allocation4 + $0x150] sm:$0xff] }
 0x16d   :  { %4907 = vmatprep.subr.bf16.mxu1 %v7117_v27  ;;  %v7126_v44 = vpack.c.bf16 %v946_v0, %v942_v45  ;;  %v954_v45 = vld [vmem:[#allocation4 + $0x160] sm:$0xff]  ;;  %v953_v0 = vld [vmem:[#allocation4 + $0x158] sm:$0xff]  ;;  %v956_v5 = vld [vmem:[#allocation4 + $0x170] sm:$0xff] }
 0x16e   :  { %4877 = vmatpush1.bf16.msra.mxu0 %v7114_v55  ;;  %8324 = vst [vmem:[#allocation72_spill] sm:$0xff] %v7129_v15  ;;  %v7135_v55 = vpack.c.bf16 %v955_v63, %v951_v57  ;;  %v7143_v14 = vpack.c.bf16 %v956_v5, %v952_v2  ;;  %v958_v57 = vld [vmem:[#allocation4 + $0x180] sm:$0xff]  ;;  %v967_v2 = vld [vmem:[#allocation4 + $0x1c8] sm:$0xff] }
 0x16f   :  { %8323 = vst [vmem:[#allocation71_spill] sm:$0xff] %v7126_v44  ;;  %4879 = vmatprep.subr.bf16.mxu0 %v7123_v23  ;;  %v957_v23 = vld [vmem:[#allocation4 + $0x178] sm:$0xff] }
 0x170   :  { %4909 = vmatpush1.bf16.msra.mxu1 %v7119_v38  ;;  %8326 = vst [vmem:[#allocation74_spill] sm:$0xff] %v7135_v55  ;;  %v950_v38 = vld [vmem:[#allocation4 + $0x140] sm:$0xff]  ;;  %v7141_v4 = vpack.c.bf16 %v957_v23, %v953_v0  ;;  %8329 = vst [vmem:[#allocation77_spill] sm:$0xff] %v7143_v14  ;;  %v960_v23 = vld [vmem:[#allocation4 + $0x190] sm:$0xff] }
 0x171   :  { %4911 = vmatprep.subr.bf16.mxu1 %v7129_v15  ;;  %v7138_v27 = vpack.c.bf16 %v954_v45, %v950_v38  ;;  %v963_v15 = vld [vmem:[#allocation4 + $0x1a8] sm:$0xff]  ;;  %v965_v38 = vld [vmem:[#allocation4 + $0x1b8] sm:$0xff]  ;;  %v7149_v45 = vpack.c.bf16 %v962_v36, %v958_v57  ;;  %v964_v0 = vld [vmem:[#allocation4 + $0x1b0] sm:$0xff] }
 0x172   :  { %4881 = vmatpush1.bf16.msra.mxu0 %v7126_v44  ;;  %8328 = vst [vmem:[#allocation76_spill] sm:$0xff] %v7141_v4  ;;  %v959_v44 = vld [vmem:[#allocation4 + $0x188] sm:$0xff]  ;;  %v7155_v5 = vpack.c.bf16 %v964_v0, %v960_v23  ;;  %v969_v36 = vld [vmem:[#allocation4 + $0x1d8] sm:$0xff] }
 0x173   :  { %8327 = vst [vmem:[#allocation75_spill] sm:$0xff] %v7138_v27  ;;  %4883 = vmatprep.subr.bf16.mxu0 %v7135_v55  ;;  %v7146_v63 = vpack.c.bf16 %v963_v15, %v959_v44  ;;  %8331 = vst [vmem:[#allocation79_spill] sm:$0xff] %v7149_v45  ;;  %v971_v44 = vld [vmem:[#allocation4 + $0x1e8] sm:$0xff]  ;;  %v966_v15 = vld [vmem:[#allocation4 + $0x1c0] sm:$0xff] }
 0x174   :  { %4913 = vmatpush1.bf16.msra.mxu1 %v7131_v26  ;;  %v961_v26 = vld [vmem:[#allocation4 + $0x198] sm:$0xff]  ;;  %8333 = vst [vmem:[#allocation81_spill] sm:$0xff] %v7155_v5  ;;  %v7158_v55 = vpack.c.bf16 %v971_v44, %v967_v2  ;;  %v1125_v23 = vld [vmem:[#allocation7 + $0x28] sm:$0xff] }
 0x175   :  { %8330 = vst [vmem:[#allocation78_spill] sm:$0xff] %v7146_v63  ;;  %4915 = vmatprep.subr.bf16.mxu1 %v7141_v4  ;;  %v7151_v47 = vpack.c.bf16 %v965_v38, %v961_v26  ;;  %v973_v57 = vld [vmem:[#allocation4 + $0x1f8] sm:$0xff]  ;;  %v968_v26 = vld [vmem:[#allocation4 + $0x1d0] sm:$0xff] }
 0x176   :  { %4885 = vmatpush1.bf16.msra.mxu0 %v7138_v27  ;;  %v970_v27 = vld [vmem:[#allocation4 + $0x1e0] sm:$0xff]  ;;  %8334 = vst [vmem:[#allocation82_spill] sm:$0xff] %v7158_v55  ;;  %v7163_v4 = vpack.c.bf16 %v973_v57, %v969_v36  ;;  %v1127_v44 = vld [vmem:[#allocation7 + $0x38] sm:$0xff] }
 0x177   :  { %8332 = vst [vmem:[#allocation80_spill] sm:$0xff] %v7151_v47  ;;  %4887 = vmatprep.subr.bf16.mxu0 %v7146_v63  ;;  %v7161_v38 = vpack.c.bf16 %v970_v27, %v966_v15  ;;  %v1121_v63 = vld [vmem:[#allocation7 + $0x8] sm:$0xff]  ;;  %v1123_v27 = vld [vmem:[#allocation7 + $0x18] sm:$0xff] }
 0x178   :  { %4917 = vmatpush1.bf16.msra.mxu1 %v7143_v14  ;;  %8336 = vst [vmem:[#allocation84_spill] sm:$0xff] %v7163_v4  ;;  %v972_v14 = vld [vmem:[#allocation4 + $0x1f0] sm:$0xff]  ;;  %v7166_v0 = vpack.c.bf16 %v1125_v23, %v1121_v63  ;;  %v7175_v15 = vpack.c.bf16 %v1127_v44, %v1123_v27 }
 0x179   :  { %4919 = vmatprep.subr.bf16.mxu1 %v7151_v47  ;;  %8335 = vst [vmem:[#allocation83_spill] sm:$0xff] %v7161_v38  ;;  %v7169_v2 = vpack.c.bf16 %v972_v14, %v968_v26  ;;  %v1141_v47 = vld [vmem:[#allocation7 + $0xa8] sm:$0xff] }
 0x17a   :  { %4889 = vmatpush1.bf16.msra.mxu0 %v7149_v45  ;;  %8337 = vst [vmem:[#allocation85_spill] sm:$0xff] %v7166_v0  ;;  %8339 = vst [vmem:[#allocation87_spill] sm:$0xff] %v7175_v15  ;;  %v1134_v45 = vld [vmem:[#allocation7 + $0x70] sm:$0xff] }
 0x17b   :  { %4891 = vmatprep.subr.bf16.mxu0 %v7158_v55  ;;  %8338 = vst [vmem:[#allocation86_spill] sm:$0xff] %v7169_v2 }
 0x17c   :  { %4921 = vmatpush1.bf16.msra.mxu1 %v7155_v5 }
 0x17d   :  { %4923 = vmatprep.subr.bf16.mxu1 %v7163_v4 }
 0x17e   :  { %4893 = vmatpush1.bf16.msra.mxu0 %v7161_v38 }
 0x17f   :  { %4927 = vmatprep.subr.bf16.mxu0 %v7166_v0 }
 0x180   :  { %4925 = vmatpush1.bf16.msra.mxu1 %v7169_v2 }
 0x181   :  { %4959 = vmatprep.subr.bf16.mxu1 %v7175_v15 }
 0x234   :  { %v806_v63 = vpop.f32.mrb[16].mxu0 }
 0x235   :  { %v882_v36 = vadd.f32 %v806_v63, %v6886_v37  ;;  %v808_v57 = vpop.f32.mrb[17].mxu0 }
 0x236   :  { %v883_v14 = vadd.f32 %v808_v57, %v6909_v54  ;;  %v877_v38 = vpop.f32.mrb[16].mxu1 }
 0x237   :  { %v4632_v26 = vmul.f32 -1.442695, %v882_v36  ;;  %v879_v0 = vpop.f32.mrb[17].mxu1  ;;  %v884_v27 = vadd.f32 %v877_v38, %v6907_v53  ;;  %v1120_v38 = vld [vmem:[#allocation7] sm:$0xff] }
 0x238   :  { %v4631_v23 = vmul.f32 -1.442695, %v883_v14  ;;  %v885_v2 = vadd.f32 %v879_v0, %v6912_v56  ;;  %v1129_v0 = vld [vmem:[#allocation7 + $0x48] sm:$0xff] }
 0x239   :  { %6378 = vpow2.f32 %v4632_v26 }
 0x23a   :  { %6380 = vpow2.f32 %v4631_v23  ;;  %v4633_v4 = vmul.f32 -1.442695, %v885_v2  ;;  %v1122_v2 = vld [vmem:[#allocation7 + $0x10] sm:$0xff] }
 0x23c   :  { %6382 = vpow2.f32 %v4633_v4  ;;  %v1124_v4 = vld [vmem:[#allocation7 + $0x20] sm:$0xff] }
 0x23d   :  { %6384 = vtanh.f32 %v884_v27  ;;  %v1126_v27 = vld [vmem:[#allocation7 + $0x30] sm:$0xff]  ;;  %v7185_v56 = vpack.c.bf16 %v1124_v4, %v1120_v38  ;;  %v1136_v4 = vld [vmem:[#allocation7 + $0x80] sm:$0xff] }
 0x23f   :  { %8341 = vst [vmem:[#allocation89_spill] sm:$0xff] %v7185_v56 }
 0x243   :  { %v6379_v44 = vpop.eup %6378 }
 0x244   :  { %v6381_v15 = vpop.eup %6380  ;;  %v896_v55 = vadd.f32 1.0, %v6379_v44  ;;  %v1131_v44 = vld [vmem:[#allocation7 + $0x58] sm:$0xff] }
 0x245   :  { %v889_v63 = vadd.f32 1.0, %v6381_v15 }
 0x246   :  { %6386 = vrcp.f32 %v896_v55  ;;  %v6383_v57 = vpop.eup %6382  ;;  %v1133_v55 = vld [vmem:[#allocation7 + $0x68] sm:$0xff] }
 0x247   :  { %6388 = vrcp.f32 %v889_v63  ;;  %v6385_v36 = vpop.eup %6384  ;;  %v905_v26 = vadd.f32 1.0, %v6383_v57  ;;  %v1135_v63 = vld [vmem:[#allocation7 + $0x78] sm:$0xff]  ;;  %v1128_v57 = vld [vmem:[#allocation7 + $0x40] sm:$0xff] }
 0x249   :  { %6390 = vrcp.f32 %v905_v26  ;;  %v1137_v26 = vld [vmem:[#allocation7 + $0x88] sm:$0xff] }
 0x250   :  { %v6387_v14 = vpop.eup %6386 }
 0x251   :  { %v6389_v54 = vpop.eup %6388  ;;  %v900_v23 = vmul.f32 %v6387_v14, %v6385_v36  ;;  %v1132_v36 = vld [vmem:[#allocation7 + $0x60] sm:$0xff]  ;;  %v7189_v14 = vpack.c.bf16 %v1133_v55, %v1129_v0  ;;  %v7200_v0 = vpack.c.bf16 %v1141_v47, %v1137_v26  ;;  %v1138_v55 = vld [vmem:[#allocation7 + $0x90] sm:$0xff] }
 0x252   :  { %v892_v37 = vmul.f32 0.0, %v6389_v54  ;;  %v7187_v54 = vpack.c.bf16 %v1126_v27, %v1122_v2  ;;  %v7194_v38 = vpack.c.bf16 %v1132_v36, %v1128_v57  ;;  %v1140_v2 = vld [vmem:[#allocation7 + $0xa0] sm:$0xff]  ;;  %v1145_v27 = vld [vmem:[#allocation7 + $0xc8] sm:$0xff]  ;;  %v1147_v57 = vld [vmem:[#allocation7 + $0xd8] sm:$0xff] }
 0x253   :  { %v6391_v15 = vpop.eup %6390  ;;  %8343 = vst [vmem:[#allocation91_spill] sm:$0xff] %v7189_v14  ;;  %8347 = vst [vmem:[#allocation95_spill] sm:$0xff] %v7200_v0  ;;  %v1151_v36 = vld [vmem:[#allocation7 + $0xf8] sm:$0xff]  ;;  %v1144_v47 = vld [vmem:[#allocation7 + $0xc0] sm:$0xff] }
 0x254   :  { %v7182_v5 = vadd.f32 %v900_v23, %v892_v37  ;;  %8342 = vst [vmem:[#allocation90_spill] sm:$0xff] %v7187_v54  ;;  %v7191_v23 = vpack.c.bf16 %v1135_v63, %v1131_v44  ;;  %8345 = vst [vmem:[#allocation93_spill] sm:$0xff] %v7194_v38  ;;  %v1142_v44 = vld [vmem:[#allocation7 + $0xb0] sm:$0xff]  ;;  %v1149_v63 = vld [vmem:[#allocation7 + $0xe8] sm:$0xff] }
 0x255   :  { %v7211_v26 = vpack.c.bf16 %v1142_v44, %v1138_v55  ;;  %v1152_v55 = vld [vmem:[#allocation7 + $0x100] sm:$0xff] }
 0x256   :  { %8340 = vst [vmem:[#allocation88_spill] sm:$0xff] %v7182_v5  ;;  %6392 = vtanh.f32 %v7182_v5  ;;  %8344 = vst [vmem:[#allocation92_spill] sm:$0xff] %v7191_v23  ;;  %v1130_v5 = vld [vmem:[#allocation7 + $0x50] sm:$0xff]  ;;  %v1156_v44 = vld [vmem:[#allocation7 + $0x120] sm:$0xff] }
 0x257   :  { %8351 = vst [vmem:[#allocation98_spill] sm:$0xff] %v7211_v26 }
 0x260   :  { %v6393_v53 = vpop.eup %6392 }
 0x261   :  { %v909_v37 = vmul.f32 %v6393_v53, %v6391_v15  ;;  %v7197_v53 = vpack.c.bf16 %v1134_v45, %v1130_v5  ;;  %v7203_v15 = vpack.c.bf16 %v1143_v10, %v1139_v16  ;;  %v7208_v45 = vpack.c.bf16 %v1140_v2, %v1136_v4  ;;  %v1148_v5 = vld [vmem:[#allocation7 + $0xe0] sm:$0xff]  ;;  %v1153_v16 = vld [vmem:[#allocation7 + $0x108] sm:$0xff]  ;;  %v1155_v4 = vld [vmem:[#allocation7 + $0x118] sm:$0xff] }
 0x262   :  { %v7214_v10 = vpack.c.bf16 %v1149_v63, %v1145_v27  ;;  %v1159_v2 = vld [vmem:[#allocation7 + $0x138] sm:$0xff] }
 0x263   :  { %1039 = vmatmul.mubr.f32.vlgmr.msra.gmra.mrb[18].mxu0 %v909_v37  ;;  %1110 = vmatmul.mubr.f32.vlgmr.msra.gmra.mrb[18].mxu1 %v909_v37  ;;  %8346 = vst [vmem:[#allocation94_spill] sm:$0xff] %v7197_v53  ;;  %8348 = vst [vmem:[#allocation96_spill] sm:$0xff] %v7203_v15  ;;  %v8349_v37 = vmov 0.0  }
 0x264   :  { %4929 = vmatpush1.bf16.msra.mxu0 %v7185_v56  ;;  %4961 = vmatpush1.bf16.msra.mxu1 %v7187_v54  ;;  %8350 = vst [vmem:[#allocation97_spill] sm:$0xff] %v7208_v45  ;;  %8352 = vst [vmem:[#allocation99_spill] sm:$0xff] %v7214_v10  ;;  %v1150_v54 = vld [vmem:[#allocation7 + $0xf0] sm:$0xff]  ;;  %v7220_v56 = vpack.c.bf16 %v1148_v5, %v1144_v47  ;;  %v1163_v47 = vld [vmem:[#allocation7 + $0x158] sm:$0xff] }
 0x265   :  { %4931 = vmatprep.subr.bf16.mxu0 %v7189_v14  ;;  %4963 = vmatprep.subr.bf16.mxu1 %v7191_v23  ;;  %v7217_v23 = vpack.c.bf16 %v1151_v36, %v1147_v57  ;;  %v1146_v14 = vld [vmem:[#allocation7 + $0xd0] sm:$0xff]  ;;  %v1161_v57 = vld [vmem:[#allocation7 + $0x148] sm:$0xff]  ;;  %v7229_v36 = vpack.c.bf16 %v1159_v2, %v1155_v4  ;;  %v1167_v5 = vld [vmem:[#allocation7 + $0x178] sm:$0xff] }
 0x266   :  { %1248 = vmatprep.mubr.f32.mxu0 %v8349_v37  ;;  %1319 = vmatprep.mubr.f32.mxu1 %v8349_v37  ;;  %8354 = vst [vmem:[#allocation101_spill] sm:$0xff] %v7220_v56  ;;  %v7223_v27 = vpack.c.bf16 %v1150_v54, %v1146_v14  ;;  %v1160_v54 = vld [vmem:[#allocation7 + $0x140] sm:$0xff]  ;;  %v1169_v4 = vld [vmem:[#allocation7 + $0x188] sm:$0xff]  ;;  %v7241_v2 = vpack.c.bf16 %v1167_v5, %v1163_v47 }
 0x267   :  { %8353 = vst [vmem:[#allocation100_spill] sm:$0xff] %v7217_v23  ;;  %8357 = vst [vmem:[#allocation104_spill] sm:$0xff] %v7229_v36  ;;  %v1164_v14 = vld [vmem:[#allocation7 + $0x160] sm:$0xff]  ;;  %v1177_v47 = vld [vmem:[#allocation7 + $0x1c8] sm:$0xff] }
 0x268   :  { %4933 = vmatpush1.bf16.msra.mxu0 %v7194_v38  ;;  %4965 = vmatpush1.bf16.msra.mxu1 %v7197_v53  ;;  %v1157_v38 = vld [vmem:[#allocation7 + $0x128] sm:$0xff]  ;;  %8355 = vst [vmem:[#allocation102_spill] sm:$0xff] %v7223_v27  ;;  %v7232_v53 = vpack.c.bf16 %v1156_v44, %v1152_v55  ;;  %8359 = vst [vmem:[#allocation106_spill] sm:$0xff] %v7241_v2  ;;  %v1171_v55 = vld [vmem:[#allocation7 + $0x198] sm:$0xff] }
 0x269   :  { %4935 = vmatprep.subr.bf16.mxu0 %v7200_v0  ;;  %4967 = vmatprep.subr.bf16.mxu1 %v7203_v15  ;;  %v7226_v63 = vpack.c.bf16 %v1157_v38, %v1153_v16  ;;  %v1154_v15 = vld [vmem:[#allocation7 + $0x110] sm:$0xff]  ;;  %v1175_v44 = vld [vmem:[#allocation7 + $0x1b8] sm:$0xff] }
 0x26a   :  { %v1158_v0 = vld [vmem:[#allocation7 + $0x130] sm:$0xff]  ;;  %8358 = vst [vmem:[#allocation105_spill] sm:$0xff] %v7232_v53  ;;  %v7253_v5 = vpack.c.bf16 %v1175_v44, %v1171_v55 }
 0x26b   :  { %8356 = vst [vmem:[#allocation103_spill] sm:$0xff] %v7226_v63  ;;  %v7235_v38 = vpack.c.bf16 %v1158_v0, %v1154_v15  ;;  %v1168_v0 = vld [vmem:[#allocation7 + $0x180] sm:$0xff]  ;;  %v1178_v44 = vld [vmem:[#allocation7 + $0x1d0] sm:$0xff] }
 0x26c   :  { %4937 = vmatpush1.bf16.msra.mxu0 %v7208_v45  ;;  %4969 = vmatpush1.bf16.msra.mxu1 %v7211_v26  ;;  %v1165_v45 = vld [vmem:[#allocation7 + $0x168] sm:$0xff]  ;;  %v7244_v26 = vpack.c.bf16 %v1164_v14, %v1160_v54  ;;  %v1172_v15 = vld [vmem:[#allocation7 + $0x1a0] sm:$0xff]  ;;  %v1179_v54 = vld [vmem:[#allocation7 + $0x1d8] sm:$0xff] }
 0x26d   :  { %4939 = vmatprep.subr.bf16.mxu0 %v7214_v10  ;;  %4971 = vmatprep.subr.bf16.mxu1 %v7217_v23  ;;  %v7238_v16 = vpack.c.bf16 %v1165_v45, %v1161_v57  ;;  %v1162_v23 = vld [vmem:[#allocation7 + $0x150] sm:$0xff]  ;;  %v1183_v14 = vld [vmem:[#allocation7 + $0x1f8] sm:$0xff] }
 0x26e   :  { %v1166_v10 = vld [vmem:[#allocation7 + $0x170] sm:$0xff]  ;;  %v7265_v55 = vpack.c.bf16 %v1183_v14, %v1179_v54 }
 0x26f   :  { %v7247_v45 = vpack.c.bf16 %v1166_v10, %v1162_v23  ;;  %v1176_v23 = vld [vmem:[#allocation7 + $0x1c0] sm:$0xff] }
 0x270   :  { %4941 = vmatpush1.bf16.msra.mxu0 %v7220_v56  ;;  %4973 = vmatpush1.bf16.msra.mxu1 %v7223_v27  ;;  %v1173_v56 = vld [vmem:[#allocation7 + $0x1a8] sm:$0xff]  ;;  %v7256_v27 = vpack.c.bf16 %v1172_v15, %v1168_v0 }
 0x271   :  { %4943 = vmatprep.subr.bf16.mxu0 %v7226_v63  ;;  %4975 = vmatprep.subr.bf16.mxu1 %v7229_v36  ;;  %v7250_v57 = vpack.c.bf16 %v1173_v56, %v1169_v4  ;;  %v1170_v36 = vld [vmem:[#allocation7 + $0x190] sm:$0xff]  ;;  %v1180_v4 = vld [vmem:[#allocation7 + $0x1e0] sm:$0xff] }
 0x272   :  { %v1174_v63 = vld [vmem:[#allocation7 + $0x1b0] sm:$0xff]  ;;  %v7268_v0 = vpack.c.bf16 %v1180_v4, %v1176_v23 }
 0x273   :  { %v7259_v10 = vpack.c.bf16 %v1174_v63, %v1170_v36 }
 0x274   :  { %4945 = vmatpush1.bf16.msra.mxu0 %v7232_v53  ;;  %4977 = vmatpush1.bf16.msra.mxu1 %v7235_v38  ;;  %v1181_v53 = vld [vmem:[#allocation7 + $0x1e8] sm:$0xff] }
 0x275   :  { %4947 = vmatprep.subr.bf16.mxu0 %v7238_v16  ;;  %4979 = vmatprep.subr.bf16.mxu1 %v7241_v2  ;;  %v7262_v56 = vpack.c.bf16 %v1181_v53, %v1177_v47  ;;  %v1182_v2 = vld [vmem:[#allocation7 + $0x1f0] sm:$0xff] }
 0x276   :  { %v7271_v15 = vpack.c.bf16 %v1182_v2, %v1178_v44 }
 0x278   :  { %4949 = vmatpush1.bf16.msra.mxu0 %v7244_v26  ;;  %4981 = vmatpush1.bf16.msra.mxu1 %v7247_v45 }
 0x279   :  { %4951 = vmatprep.subr.bf16.mxu0 %v7250_v57  ;;  %4983 = vmatprep.subr.bf16.mxu1 %v7253_v5 }
 0x27c   :  { %4953 = vmatpush1.bf16.msra.mxu0 %v7256_v27  ;;  %4985 = vmatpush1.bf16.msra.mxu1 %v7259_v10 }
 0x27d   :  { %4955 = vmatprep.subr.bf16.mxu0 %v7262_v56  ;;  %4987 = vmatprep.subr.bf16.mxu1 %v7265_v55 }
 0x280   :  { %4957 = vmatpush1.bf16.msra.mxu0 %v7268_v0  ;;  %4989 = vmatpush1.bf16.msra.mxu1 %v7271_v15 }
 0x281   :  { %4991 = vmatprep.subr.bf16.mxu0 %v6976_v29  ;;  %5023 = vmatprep.subr.bf16.mxu1 %v6989_v48 }
 0x283   :  { %1249 = vmatmul.mubr.f32.vlgmr.msra.gmra.mrb[2].mxu0 %v6972_v25  ;;  %1320 = vmatmul.mubr.f32.vlgmr.msra.gmra.mrb[2].mxu1 %v6972_v25 }
 0x284   :  { %4993 = vmatpush1.bf16.msra.mxu0 %v6978_v33  ;;  %5025 = vmatpush1.bf16.msra.mxu1 %v6991_v51 }
 0x285   :  { %4995 = vmatprep.subr.bf16.mxu0 %v6980_v34  ;;  %5027 = vmatprep.subr.bf16.mxu1 %v7001_v1 }
 0x286   :  { %1418 = vmatprep.mubr.f32.mxu0 %v8349_v37  ;;  %1489 = vmatprep.mubr.f32.mxu1 %v8349_v37 }
 0x288   :  { %4997 = vmatpush1.bf16.msra.mxu0 %v6984_v40  ;;  %5029 = vmatpush1.bf16.msra.mxu1 %v7003_v7 }
 0x289   :  { %4999 = vmatprep.subr.bf16.mxu0 %v6987_v43  ;;  %5031 = vmatprep.subr.bf16.mxu1 %v7009_v17 }
 0x28c   :  { %5001 = vmatpush1.bf16.msra.mxu0 %v6994_v52  ;;  %5033 = vmatpush1.bf16.msra.mxu1 %v7015_v20 }
 0x28d   :  { %5003 = vmatprep.subr.bf16.mxu0 %v6998_v61  ;;  %5035 = vmatprep.subr.bf16.mxu1 %v7018_v24 }
 0x290   :  { %5005 = vmatpush1.bf16.msra.mxu0 %v7007_v13  ;;  %5037 = vmatpush1.bf16.msra.mxu1 %v7027_v39 }
 0x291   :  { %5007 = vmatprep.subr.bf16.mxu0 %v7012_v18  ;;  %5039 = vmatprep.subr.bf16.mxu1 %v7030_v42 }
 0x294   :  { %5009 = vmatpush1.bf16.msra.mxu0 %v7021_v28  ;;  %5041 = vmatpush1.bf16.msra.mxu1 %v7039_v62 }
 0x295   :  { %5011 = vmatprep.subr.bf16.mxu0 %v7024_v32  ;;  %5043 = vmatprep.subr.bf16.mxu1 %v7042_v3 }
 0x298   :  { %5013 = vmatpush1.bf16.msra.mxu0 %v7033_v49  ;;  %5045 = vmatpush1.bf16.msra.mxu1 %v7051_v19 }
 0x299   :  { %5015 = vmatprep.subr.bf16.mxu0 %v7036_v50  ;;  %5047 = vmatprep.subr.bf16.mxu1 %v7054_v21 }
 0x29c   :  { %5017 = vmatpush1.bf16.msra.mxu0 %v7045_v11  ;;  %5049 = vmatpush1.bf16.msra.mxu1 %v7061_v31 }
 0x29d   :  { %5019 = vmatprep.subr.bf16.mxu0 %v7048_v12  ;;  %5051 = vmatprep.subr.bf16.mxu1 %v7064_v35 }
 0x2a0   :  { %5021 = vmatpush1.bf16.msra.mxu0 %v7057_v30  ;;  %5053 = vmatpush1.bf16.msra.mxu1 %v7068_v41 }
 0x2a1   :  { %5055 = vmatprep.subr.bf16.mxu0 %v7076_v46  ;;  %5087 = vmatprep.subr.bf16.mxu1 %v7081_v9 }
 0x356   :  { %v1250_v25 = vpop.f32.mrb[2].mxu0  ;;  %v1321_v53 = vpop.f32.mrb[2].mxu1 }
 0x357   :  { %v6232_v63 = vadd.f32 %v1250_v25, %v6955_v58  ;;  %v1252_v36 = vpop.f32.mrb[3].mxu0  ;;  %v1323_v2 = vpop.f32.mrb[3].mxu1  ;;  %v6248_v44 = vadd.f32 %v1321_v53, %v6966_v8 }
 0x358   :  { %v6233_v47 = vadd.f32 %v1252_v36, %v6957_v59  ;;  %v6249_v23 = vadd.f32 %v1323_v2, %v6961_v6 }
 0x359   :  { %v4635_v54 = vmul.f32 -1.442695, %v6232_v63 }
 0x35a   :  { %v4634_v14 = vmul.f32 -1.442695, %v6233_v47  ;;  %v4636_v4 = vmul.f32 -1.442695, %v6249_v23 }
 0x35b   :  { %6394 = vpow2.f32 %v4635_v54 }
 0x35c   :  { %6396 = vpow2.f32 %v4634_v14 }
 0x35d   :  { %6398 = vpow2.f32 %v4636_v4  ;;  %v8366_v4 = vld [vmem:[#allocation62_spill] sm:$0xff] }
 0x35e   :  { %6400 = vtanh.f32 %v6248_v44  ;;  %v8367_v44 = vld [vmem:[#allocation64_spill] sm:$0xff] }
 0x365   :  { %v6395_v46 = vpop.eup %6394 }
 0x366   :  { %v6397_v9 = vpop.eup %6396  ;;  %v1340_v41 = vadd.f32 1.0, %v6395_v46 }
 0x367   :  { %v1333_v30 = vadd.f32 1.0, %v6397_v9  ;;  %v6399_v25 = vpop.eup %6398  ;;  %v8365_v9 = vld [vmem:[#allocation61_spill] sm:$0xff] }
 0x368   :  { %6402 = vrcp.f32 %v1340_v41  ;;  %v6401_v58 = vpop.eup %6400  ;;  %v1349_v63 = vadd.f32 1.0, %v6399_v25  ;;  %v8364_v41 = vld [vmem:[#allocation59_spill] sm:$0xff] }
 0x369   :  { %6404 = vrcp.f32 %v1333_v30  ;;  %v8361_v30 = vld [vmem:[#allocation57_spill] sm:$0xff]  ;;  %v8368_v25 = vld [vmem:[#allocation63_spill] sm:$0xff] }
 0x36a   :  { %6406 = vrcp.f32 %v1349_v63  ;;  %v8370_v63 = vld [vmem:[#allocation66_spill] sm:$0xff] }
 0x372   :  { %v6403_v36 = vpop.eup %6402 }
 0x373   :  { %v6405_v47 = vpop.eup %6404  ;;  %v1344_v54 = vmul.f32 %v6403_v36, %v6401_v58  ;;  %v8362_v58 = vld [vmem:[#allocation58_spill] sm:$0xff]  ;;  %v8369_v36 = vld [vmem:[#allocation65_spill] sm:$0xff] }
 0x374   :  { %v1336_v14 = vmul.f32 %v6405_v47, %v6969_v22  ;;  %v6407_v53 = vpop.eup %6406  ;;  %v8363_v22 = vld [vmem:[#allocation60_spill] sm:$0xff] }
 0x375   :  { %v8371_v47 = vld [vmem:[#allocation68_spill] sm:$0xff] }
 0x376   :  { %v7320_v2 = vadd.f32 %v1344_v54, %v1336_v14  ;;  %v8372_v54 = vld [vmem:[#allocation67_spill] sm:$0xff]  ;;  %v8373_v14 = vld [vmem:[#allocation69_spill] sm:$0xff] }
 0x378   :  { %8360 = vst [vmem:[#allocation107_spill] sm:$0xff] %v7320_v2  ;;  %6408 = vtanh.f32 %v7320_v2 }
 0x382   :  { %v6409_v23 = vpop.eup %6408 }
 0x383   :  { %v7323_v46 = vmul.f32 %v6409_v23, %v6407_v53  ;;  %v8374_v53 = vld [vmem:[#allocation70_spill] sm:$0xff]  ;;  %v8375_v23 = vld [vmem:[#allocation72_spill] sm:$0xff] }
 0x385   :  { %1419 = vmatmul.mubr.f32.vlgmr.msra.gmra.mrb[18].mxu0 %v7323_v46  ;;  %1490 = vmatmul.mubr.f32.vlgmr.msra.gmra.mrb[18].mxu1 %v7323_v46 }
 0x386   :  { %5057 = vmatpush1.bf16.msra.mxu0 %v7078_v60  ;;  %5089 = vmatpush1.bf16.msra.mxu1 %v8361_v30 }
 0x387   :  { %5059 = vmatprep.subr.bf16.mxu0 %v8362_v58  ;;  %5091 = vmatprep.subr.bf16.mxu1 %v8363_v22  ;;  %v8393_v58 = vld [vmem:[#allocation26_spill] sm:$0xff] }
 0x388   :  { %1588 = vmatprep.mubr.f32.mxu0 %v8349_v37  ;;  %1659 = vmatprep.mubr.f32.mxu1 %v8349_v37 }
 0x38a   :  { %5061 = vmatpush1.bf16.msra.mxu0 %v8364_v41  ;;  %5093 = vmatpush1.bf16.msra.mxu1 %v8365_v9  ;;  %v8376_v9 = vld [vmem:[#allocation71_spill] sm:$0xff]  ;;  %v8392_v41 = vld [vmem:[#allocation24_spill] sm:$0xff] }
 0x38b   :  { %5063 = vmatprep.subr.bf16.mxu0 %v8366_v4  ;;  %5095 = vmatprep.subr.bf16.mxu1 %v8367_v44  ;;  %v8377_v4 = vld [vmem:[#allocation73_spill] sm:$0xff]  ;;  %v8378_v44 = vld [vmem:[#allocation74_spill] sm:$0xff] }
 0x38e   :  { %5065 = vmatpush1.bf16.msra.mxu0 %v8368_v25  ;;  %5097 = vmatpush1.bf16.msra.mxu1 %v8369_v36  ;;  %v8379_v25 = vld [vmem:[#allocation76_spill] sm:$0xff]  ;;  %v8380_v36 = vld [vmem:[#allocation75_spill] sm:$0xff] }
 0x38f   :  { %5067 = vmatprep.subr.bf16.mxu0 %v8370_v63  ;;  %5099 = vmatprep.subr.bf16.mxu1 %v8371_v47  ;;  %v8381_v63 = vld [vmem:[#allocation77_spill] sm:$0xff]  ;;  %v8382_v47 = vld [vmem:[#allocation78_spill] sm:$0xff] }
 0x392   :  { %5069 = vmatpush1.bf16.msra.mxu0 %v8372_v54  ;;  %5101 = vmatpush1.bf16.msra.mxu1 %v8373_v14  ;;  %v8383_v54 = vld [vmem:[#allocation80_spill] sm:$0xff]  ;;  %v8384_v14 = vld [vmem:[#allocation79_spill] sm:$0xff] }
 0x393   :  { %5071 = vmatprep.subr.bf16.mxu0 %v8374_v53  ;;  %5103 = vmatprep.subr.bf16.mxu1 %v8375_v23  ;;  %v8385_v53 = vld [vmem:[#allocation81_spill] sm:$0xff]  ;;  %v8386_v23 = vld [vmem:[#allocation82_spill] sm:$0xff] }
 0x396   :  { %5073 = vmatpush1.bf16.msra.mxu0 %v8376_v9  ;;  %5105 = vmatpush1.bf16.msra.mxu1 %v8377_v4  ;;  %v8387_v9 = vld [vmem:[#allocation84_spill] sm:$0xff]  ;;  %v8388_v4 = vld [vmem:[#allocation83_spill] sm:$0xff] }
 0x397   :  { %5075 = vmatprep.subr.bf16.mxu0 %v8378_v44  ;;  %5107 = vmatprep.subr.bf16.mxu1 %v8379_v25  ;;  %v8389_v44 = vld [vmem:[#allocation86_spill] sm:$0xff]  ;;  %v8390_v25 = vld [vmem:[#allocation85_spill] sm:$0xff] }
 0x39a   :  { %5077 = vmatpush1.bf16.msra.mxu0 %v8380_v36  ;;  %5109 = vmatpush1.bf16.msra.mxu1 %v8381_v63  ;;  %v8391_v36 = vld [vmem:[#allocation87_spill] sm:$0xff] }
 0x39b   :  { %5079 = vmatprep.subr.bf16.mxu0 %v8382_v47  ;;  %5111 = vmatprep.subr.bf16.mxu1 %v8383_v54 }
 0x39e   :  { %5081 = vmatpush1.bf16.msra.mxu0 %v8384_v14  ;;  %5113 = vmatpush1.bf16.msra.mxu1 %v8385_v53 }
 0x39f   :  { %5083 = vmatprep.subr.bf16.mxu0 %v8386_v23  ;;  %5115 = vmatprep.subr.bf16.mxu1 %v8387_v9  ;;  %v8394_v9 = vld [vmem:[#allocation27_spill] sm:$0xff] }
 0x3a2   :  { %5085 = vmatpush1.bf16.msra.mxu0 %v8388_v4  ;;  %5117 = vmatpush1.bf16.msra.mxu1 %v8389_v44  ;;  %v8395_v44 = vld [vmem:[#allocation25_spill] sm:$0xff] }
 0x3a3   :  { %5119 = vmatprep.subr.bf16.mxu0 %v8390_v25  ;;  %5151 = vmatprep.subr.bf16.mxu1 %v8391_v36 }
 0x458   :  { %v1420_v63 = vpop.f32.mrb[18].mxu0  ;;  %v1491_v47 = vpop.f32.mrb[18].mxu1 }
 0x459   :  { %v6262_v54 = vadd.f32 %v1420_v63, %v8392_v41  ;;  %v1422_v22 = vpop.f32.mrb[19].mxu0  ;;  %v1493_v14 = vpop.f32.mrb[19].mxu1  ;;  %v6264_v2 = vadd.f32 %v1491_v47, %v8395_v44  ;;  %v8403_v47 = vld [vmem:[#allocation95_spill] sm:$0xff] }
 0x45a   :  { %v6263_v53 = vadd.f32 %v1422_v22, %v8393_v58  ;;  %v6265_v4 = vadd.f32 %v1493_v14, %v8394_v9 }
 0x45b   :  { %v4638_v30 = vmul.f32 -1.442695, %v6262_v54 }
 0x45c   :  { %v4637_v23 = vmul.f32 -1.442695, %v6263_v53  ;;  %v4639_v60 = vmul.f32 -1.442695, %v6265_v4 }
 0x45d   :  { %6410 = vpow2.f32 %v4638_v30 }
 0x45e   :  { %6412 = vpow2.f32 %v4637_v23  ;;  %v8396_v23 = vld [vmem:[#allocation88_spill] sm:$0xff] }
 0x45f   :  { %6414 = vpow2.f32 %v4639_v60 }
 0x460   :  { %6416 = vtanh.f32 %v6264_v2  ;;  %v8399_v2 = vld [vmem:[#allocation91_spill] sm:$0xff] }
 0x467   :  { %v6411_v25 = vpop.eup %6410 }
 0x468   :  { %v6413_v8 = vpop.eup %6412  ;;  %v1510_v36 = vadd.f32 1.0, %v6411_v25 }
 0x469   :  { %v1503_v6 = vadd.f32 1.0, %v6413_v8  ;;  %v6415_v63 = vpop.eup %6414  ;;  %v8397_v8 = vld [vmem:[#allocation89_spill] sm:$0xff] }
 0x46a   :  { %6418 = vrcp.f32 %v1510_v36  ;;  %v6417_v41 = vpop.eup %6416  ;;  %v1519_v30 = vadd.f32 1.0, %v6415_v63  ;;  %v8402_v36 = vld [vmem:[#allocation94_spill] sm:$0xff]  ;;  %v8404_v63 = vld [vmem:[#allocation96_spill] sm:$0xff] }
 0x46b   :  { %6420 = vrcp.f32 %v1503_v6  ;;  %v8398_v6 = vld [vmem:[#allocation90_spill] sm:$0xff] }
 0x46c   :  { %6422 = vrcp.f32 %v1519_v30  ;;  %v8408_v30 = vld [vmem:[#allocation100_spill] sm:$0xff] }
 0x474   :  { %v6419_v22 = vpop.eup %6418 }
 0x475   :  { %v6421_v54 = vpop.eup %6420  ;;  %v1514_v53 = vmul.f32 %v6419_v22, %v6417_v41  ;;  %v8400_v41 = vld [vmem:[#allocation92_spill] sm:$0xff]  ;;  %v8405_v22 = vld [vmem:[#allocation97_spill] sm:$0xff] }
 0x476   :  { %v1506_v58 = vmul.f32 %v6421_v54, %v8396_v23  ;;  %v6423_v4 = vpop.eup %6422  ;;  %v8406_v54 = vld [vmem:[#allocation98_spill] sm:$0xff]  ;;  %v8409_v23 = vld [vmem:[#allocation101_spill] sm:$0xff] }
 0x478   :  { %v7366_v14 = vadd.f32 %v1514_v53, %v1506_v58  ;;  %v8401_v58 = vld [vmem:[#allocation93_spill] sm:$0xff]  ;;  %v8407_v53 = vld [vmem:[#allocation99_spill] sm:$0xff] }
 0x47a   :  { %6424 = vtanh.f32 %v7366_v14 }
 0x484   :  { %v6425_v25 = vpop.eup %6424 }
 0x485   :  { %v1523_v60 = vmul.f32 %v6425_v25, %v6423_v4  ;;  %v8410_v4 = vld [vmem:[#allocation102_spill] sm:$0xff]  ;;  %v8411_v25 = vld [vmem:[#allocation103_spill] sm:$0xff] }
 0x487   :  { %1589 = vmatmul.mubr.f32.vlgmr.msra.gmra.mrb[20].mxu0 %v1523_v60  ;;  %1660 = vmatmul.mubr.f32.vlgmr.msra.gmra.mrb[20].mxu1 %v1523_v60  ;;  %v8412_v60 = vld [vmem:[#allocation104_spill] sm:$0xff] }
 0x488   :  { %5121 = vmatpush1.bf16.msra.mxu0 %v8397_v8  ;;  %5153 = vmatpush1.bf16.msra.mxu1 %v8398_v6 }
 0x489   :  { %5123 = vmatprep.subr.bf16.mxu0 %v8399_v2  ;;  %5155 = vmatprep.subr.bf16.mxu1 %v8400_v41 }
 0x48a   :  { %1734 = vmatprep.mubr.f32.mxu0 %v8349_v37  ;;  %1805 = vmatprep.mubr.f32.mxu1 %v8349_v37 }
 0x48c   :  { %5125 = vmatpush1.bf16.msra.mxu0 %v8401_v58  ;;  %5157 = vmatpush1.bf16.msra.mxu1 %v8402_v36  ;;  %v8413_v36 = vld [vmem:[#allocation105_spill] sm:$0xff] }
 0x48d   :  { %5127 = vmatprep.subr.bf16.mxu0 %v8403_v47  ;;  %5159 = vmatprep.subr.bf16.mxu1 %v8404_v63 }
 0x490   :  { %5129 = vmatpush1.bf16.msra.mxu0 %v8405_v22  ;;  %5161 = vmatpush1.bf16.msra.mxu1 %v8406_v54  ;;  %v8414_v22 = vld [vmem:[#allocation106_spill] sm:$0xff] }
 0x491   :  { %5131 = vmatprep.subr.bf16.mxu0 %v8407_v53  ;;  %5163 = vmatprep.subr.bf16.mxu1 %v8408_v30 }
 0x494   :  { %5133 = vmatpush1.bf16.msra.mxu0 %v8409_v23  ;;  %5165 = vmatpush1.bf16.msra.mxu1 %v8410_v4 }
 0x495   :  { %5135 = vmatprep.subr.bf16.mxu0 %v8411_v25  ;;  %5167 = vmatprep.subr.bf16.mxu1 %v8412_v60 }
 0x498   :  { %5137 = vmatpush1.bf16.msra.mxu0 %v8413_v36  ;;  %5169 = vmatpush1.bf16.msra.mxu1 %v7235_v38 }
 0x499   :  { %5139 = vmatprep.subr.bf16.mxu0 %v7238_v16  ;;  %5171 = vmatprep.subr.bf16.mxu1 %v8414_v22 }
 0x49c   :  { %5141 = vmatpush1.bf16.msra.mxu0 %v7244_v26  ;;  %5173 = vmatpush1.bf16.msra.mxu1 %v7247_v45 }
 0x49d   :  { %5143 = vmatprep.subr.bf16.mxu0 %v7250_v57  ;;  %5175 = vmatprep.subr.bf16.mxu1 %v7253_v5 }
 0x4a0   :  { %5145 = vmatpush1.bf16.msra.mxu0 %v7256_v27  ;;  %5177 = vmatpush1.bf16.msra.mxu1 %v7259_v10 }
 0x4a1   :  { %5147 = vmatprep.subr.bf16.mxu0 %v7262_v56  ;;  %5179 = vmatprep.subr.bf16.mxu1 %v7265_v55 }
 0x4a4   :  { %5149 = vmatpush1.bf16.msra.mxu0 %v7268_v0  ;;  %5181 = vmatpush1.bf16.msra.mxu1 %v7271_v15 }
 0x4a5   :  { %5183 = vmatprep.subr.bf16.mxu0 %v6976_v29  ;;  %5215 = vmatprep.subr.bf16.mxu1 %v6989_v48 }
 0x4a7   :  { %1735 = vmatmul.mubr.f32.vlgmr.msra.gmra.mrb[4].mxu0 %v7323_v46  ;;  %1806 = vmatmul.mubr.f32.vlgmr.msra.gmra.mrb[4].mxu1 %v7323_v46  ;;  %v8415_v46 = vld [vmem:[#allocation50_spill] sm:$0xff] }
 0x4a8   :  { %5185 = vmatpush1.bf16.msra.mxu0 %v6978_v33  ;;  %5217 = vmatpush1.bf16.msra.mxu1 %v6991_v51 }
 0x4a9   :  { %5187 = vmatprep.subr.bf16.mxu0 %v6980_v34  ;;  %5219 = vmatprep.subr.bf16.mxu1 %v7001_v1 }
 0x4aa   :  { %1904 = vmatprep.mubr.f32.mxu0 %v8349_v37  ;;  %1975 = vmatprep.mubr.f32.mxu1 %v8349_v37 }
 0x4ac   :  { %5189 = vmatpush1.bf16.msra.mxu0 %v6984_v40  ;;  %5221 = vmatpush1.bf16.msra.mxu1 %v7003_v7 }
 0x4ad   :  { %5191 = vmatprep.subr.bf16.mxu0 %v6987_v43  ;;  %5223 = vmatprep.subr.bf16.mxu1 %v7009_v17 }
 0x4b0   :  { %5193 = vmatpush1.bf16.msra.mxu0 %v6994_v52  ;;  %5225 = vmatpush1.bf16.msra.mxu1 %v7015_v20 }
 0x4b1   :  { %5195 = vmatprep.subr.bf16.mxu0 %v6998_v61  ;;  %5227 = vmatprep.subr.bf16.mxu1 %v7018_v24 }
 0x4b4   :  { %5197 = vmatpush1.bf16.msra.mxu0 %v7007_v13  ;;  %5229 = vmatpush1.bf16.msra.mxu1 %v7027_v39 }
 0x4b5   :  { %5199 = vmatprep.subr.bf16.mxu0 %v7012_v18  ;;  %5231 = vmatprep.subr.bf16.mxu1 %v7030_v42 }
 0x4b8   :  { %5201 = vmatpush1.bf16.msra.mxu0 %v7021_v28  ;;  %5233 = vmatpush1.bf16.msra.mxu1 %v7039_v62  ;;  %v8419_v62 = vld [vmem:[#allocation28_spill] sm:$0xff] }
 0x4b9   :  { %5203 = vmatprep.subr.bf16.mxu0 %v7024_v32  ;;  %5235 = vmatprep.subr.bf16.mxu1 %v7042_v3  ;;  %v8416_v32 = vld [vmem:[#allocation53_spill] sm:$0xff]  ;;  %v8417_v3 = vld [vmem:[#allocation54_spill] sm:$0xff] }
 0x4bc   :  { %5205 = vmatpush1.bf16.msra.mxu0 %v7033_v49  ;;  %5237 = vmatpush1.bf16.msra.mxu1 %v7051_v19  ;;  %v8418_v49 = vld [vmem:[#allocation56_spill] sm:$0xff] }
 0x4bd   :  { %5207 = vmatprep.subr.bf16.mxu0 %v7036_v50  ;;  %5239 = vmatprep.subr.bf16.mxu1 %v7054_v21 }
 0x4c0   :  { %5209 = vmatpush1.bf16.msra.mxu0 %v7045_v11  ;;  %5241 = vmatpush1.bf16.msra.mxu1 %v7061_v31 }
 0x4c1   :  { %5211 = vmatprep.subr.bf16.mxu0 %v7048_v12  ;;  %5243 = vmatprep.subr.bf16.mxu1 %v7064_v35  ;;  %v8420_v35 = vld [vmem:[#allocation30_spill] sm:$0xff] }
 0x4c4   :  { %5213 = vmatpush1.bf16.msra.mxu0 %v8415_v46  ;;  %5245 = vmatpush1.bf16.msra.mxu1 %v8416_v32  ;;  %v8421_v32 = vld [vmem:[#allocation31_spill] sm:$0xff] }
 0x4c5   :  { %5247 = vmatprep.subr.bf16.mxu0 %v8417_v3  ;;  %5279 = vmatprep.subr.bf16.mxu1 %v8418_v49 }
 0x57a   :  { %v1736_v19 = vpop.f32.mrb[4].mxu0  ;;  %v1807_v50 = vpop.f32.mrb[4].mxu1 }
 0x57b   :  { %v6234_v21 = vadd.f32 %v1736_v19, %v8419_v62  ;;  %v1738_v28 = vpop.f32.mrb[5].mxu0  ;;  %v1809_v11 = vpop.f32.mrb[5].mxu1  ;;  %v6250_v39 = vadd.f32 %v1807_v50, %v8421_v32 }
 0x57c   :  { %v6235_v31 = vadd.f32 %v1738_v28, %v6957_v59  ;;  %v6251_v46 = vadd.f32 %v1809_v11, %v8420_v35 }
 0x57d   :  { %v4641_v42 = vmul.f32 -1.442695, %v6234_v21 }
 0x57e   :  { %v4640_v12 = vmul.f32 -1.442695, %v6235_v31  ;;  %v4642_v18 = vmul.f32 -1.442695, %v6251_v46  ;;  %v8430_v46 = vld [vmem:[#allocation62_spill] sm:$0xff] }
 0x57f   :  { %6426 = vpow2.f32 %v4641_v42 }
 0x580   :  { %6428 = vpow2.f32 %v4640_v12  ;;  %v8422_v12 = vld [vmem:[#allocation107_spill] sm:$0xff] }
 0x581   :  { %6430 = vpow2.f32 %v4642_v18 }
 0x582   :  { %6432 = vtanh.f32 %v6250_v39  ;;  %v8426_v39 = vld [vmem:[#allocation58_spill] sm:$0xff] }
 0x589   :  { %v6427_v3 = vpop.eup %6426 }
 0x58a   :  { %v6429_v13 = vpop.eup %6428  ;;  %v1826_v49 = vadd.f32 1.0, %v6427_v3 }
 0x58b   :  { %v1819_v24 = vadd.f32 1.0, %v6429_v13  ;;  %v6431_v19 = vpop.eup %6430  ;;  %v8424_v13 = vld [vmem:[#allocation55_spill] sm:$0xff] }
 0x58c   :  { %6434 = vrcp.f32 %v1826_v49  ;;  %v6433_v62 = vpop.eup %6432  ;;  %v1835_v42 = vadd.f32 1.0, %v6431_v19  ;;  %v8427_v49 = vld [vmem:[#allocation60_spill] sm:$0xff] }
 0x58d   :  { %6436 = vrcp.f32 %v1819_v24  ;;  %v8425_v24 = vld [vmem:[#allocation57_spill] sm:$0xff]  ;;  %v8431_v19 = vld [vmem:[#allocation64_spill] sm:$0xff] }
 0x58e   :  { %6438 = vrcp.f32 %v1835_v42  ;;  %v8435_v42 = vld [vmem:[#allocation68_spill] sm:$0xff] }
 0x596   :  { %v6435_v28 = vpop.eup %6434 }
 0x597   :  { %v6437_v21 = vpop.eup %6436  ;;  %v1830_v31 = vmul.f32 %v6435_v28, %v6433_v62  ;;  %v8429_v62 = vld [vmem:[#allocation61_spill] sm:$0xff]  ;;  %v8432_v28 = vld [vmem:[#allocation63_spill] sm:$0xff] }
 0x598   :  { %v1822_v59 = vmul.f32 %v6437_v21, %v8422_v12  ;;  %v6439_v50 = vpop.eup %6438  ;;  %v8433_v21 = vld [vmem:[#allocation65_spill] sm:$0xff]  ;;  %v8436_v12 = vld [vmem:[#allocation67_spill] sm:$0xff] }
 0x59a   :  { %v7444_v11 = vadd.f32 %v1830_v31, %v1822_v59  ;;  %v8428_v59 = vld [vmem:[#allocation59_spill] sm:$0xff]  ;;  %v8434_v31 = vld [vmem:[#allocation66_spill] sm:$0xff] }
 0x59c   :  { %8423 = vst [vmem:[#allocation27_spill] sm:$0xff] %v7444_v11  ;;  %6440 = vtanh.f32 %v7444_v11 }
 0x5a6   :  { %v6441_v3 = vpop.eup %6440 }
 0x5a7   :  { %v7447_v18 = vmul.f32 %v6441_v3, %v6439_v50  ;;  %v8437_v50 = vld [vmem:[#allocation69_spill] sm:$0xff]  ;;  %v8438_v3 = vld [vmem:[#allocation70_spill] sm:$0xff] }
 0x5a9   :  { %1905 = vmatmul.mubr.f32.vlgmr.msra.gmra.mrb[20].mxu0 %v7447_v18  ;;  %1976 = vmatmul.mubr.f32.vlgmr.msra.gmra.mrb[20].mxu1 %v7447_v18 }
 0x5aa   :  { %5249 = vmatpush1.bf16.msra.mxu0 %v8424_v13  ;;  %5281 = vmatpush1.bf16.msra.mxu1 %v8425_v24  ;;  %v8457_v24 = vld [vmem:[#allocation26_spill] sm:$0xff] }
 0x5ab   :  { %5251 = vmatprep.subr.bf16.mxu0 %v8426_v39  ;;  %5283 = vmatprep.subr.bf16.mxu1 %v8427_v49  ;;  %v8456_v49 = vld [vmem:[#allocation24_spill] sm:$0xff] }
 0x5ac   :  { %2074 = vmatprep.mubr.f32.mxu0 %v8349_v37  ;;  %2145 = vmatprep.mubr.f32.mxu1 %v8349_v37 }
 0x5ae   :  { %5253 = vmatpush1.bf16.msra.mxu0 %v8428_v59  ;;  %5285 = vmatpush1.bf16.msra.mxu1 %v8429_v62  ;;  %v8439_v59 = vld [vmem:[#allocation72_spill] sm:$0xff]  ;;  %v8440_v62 = vld [vmem:[#allocation71_spill] sm:$0xff] }
 0x5af   :  { %5255 = vmatprep.subr.bf16.mxu0 %v8430_v46  ;;  %5287 = vmatprep.subr.bf16.mxu1 %v8431_v19  ;;  %v8441_v46 = vld [vmem:[#allocation73_spill] sm:$0xff]  ;;  %v8442_v19 = vld [vmem:[#allocation74_spill] sm:$0xff] }
 0x5b2   :  { %5257 = vmatpush1.bf16.msra.mxu0 %v8432_v28  ;;  %5289 = vmatpush1.bf16.msra.mxu1 %v8433_v21  ;;  %v8443_v28 = vld [vmem:[#allocation76_spill] sm:$0xff]  ;;  %v8444_v21 = vld [vmem:[#allocation75_spill] sm:$0xff] }
 0x5b3   :  { %5259 = vmatprep.subr.bf16.mxu0 %v8434_v31  ;;  %5291 = vmatprep.subr.bf16.mxu1 %v8435_v42  ;;  %v8445_v31 = vld [vmem:[#allocation77_spill] sm:$0xff]  ;;  %v8446_v42 = vld [vmem:[#allocation78_spill] sm:$0xff] }
 0x5b6   :  { %5261 = vmatpush1.bf16.msra.mxu0 %v8436_v12  ;;  %5293 = vmatpush1.bf16.msra.mxu1 %v8437_v50  ;;  %v8447_v12 = vld [vmem:[#allocation80_spill] sm:$0xff]  ;;  %v8448_v50 = vld [vmem:[#allocation79_spill] sm:$0xff] }
 0x5b7   :  { %5263 = vmatprep.subr.bf16.mxu0 %v8438_v3  ;;  %5295 = vmatprep.subr.bf16.mxu1 %v8439_v59  ;;  %v8449_v3 = vld [vmem:[#allocation81_spill] sm:$0xff]  ;;  %v8450_v59 = vld [vmem:[#allocation82_spill] sm:$0xff] }
 0x5ba   :  { %5265 = vmatpush1.bf16.msra.mxu0 %v8440_v62  ;;  %5297 = vmatpush1.bf16.msra.mxu1 %v8441_v46  ;;  %v8451_v62 = vld [vmem:[#allocation84_spill] sm:$0xff]  ;;  %v8452_v46 = vld [vmem:[#allocation83_spill] sm:$0xff] }
 0x5bb   :  { %5267 = vmatprep.subr.bf16.mxu0 %v8442_v19  ;;  %5299 = vmatprep.subr.bf16.mxu1 %v8443_v28  ;;  %v8453_v19 = vld [vmem:[#allocation86_spill] sm:$0xff]  ;;  %v8454_v28 = vld [vmem:[#allocation85_spill] sm:$0xff] }
 0x5be   :  { %5269 = vmatpush1.bf16.msra.mxu0 %v8444_v21  ;;  %5301 = vmatpush1.bf16.msra.mxu1 %v8445_v31  ;;  %v8455_v21 = vld [vmem:[#allocation87_spill] sm:$0xff] }
 0x5bf   :  { %5271 = vmatprep.subr.bf16.mxu0 %v8446_v42  ;;  %5303 = vmatprep.subr.bf16.mxu1 %v8447_v12 }
 0x5c2   :  { %5273 = vmatpush1.bf16.msra.mxu0 %v8448_v50  ;;  %5305 = vmatpush1.bf16.msra.mxu1 %v8449_v3 }
 0x5c3   :  { %5275 = vmatprep.subr.bf16.mxu0 %v8450_v59  ;;  %5307 = vmatprep.subr.bf16.mxu1 %v8451_v62 }
 0x5c6   :  { %5277 = vmatpush1.bf16.msra.mxu0 %v8452_v46  ;;  %5309 = vmatpush1.bf16.msra.mxu1 %v8453_v19 }
 0x5c7   :  { %5311 = vmatprep.subr.bf16.mxu0 %v8454_v28  ;;  %5343 = vmatprep.subr.bf16.mxu1 %v8455_v21 }
 0x67c   :  { %v1906_v31 = vpop.f32.mrb[20].mxu0  ;;  %v1977_v42 = vpop.f32.mrb[20].mxu1 }
 0x67d   :  { %v6266_v12 = vadd.f32 %v1906_v31, %v8456_v49  ;;  %v1908_v39 = vpop.f32.mrb[21].mxu0  ;;  %v1979_v50 = vpop.f32.mrb[21].mxu1  ;;  %v6268_v19 = vadd.f32 %v1977_v42, %v8395_v44  ;;  %v8465_v42 = vld [vmem:[#allocation38_spill] sm:$0xff] }
 0x67e   :  { %v6267_v3 = vadd.f32 %v1908_v39, %v8457_v24  ;;  %v6269_v46 = vadd.f32 %v1979_v50, %v8394_v9 }
 0x67f   :  { %v4644_v13 = vmul.f32 -1.442695, %v6266_v12 }
 0x680   :  { %v4643_v59 = vmul.f32 -1.442695, %v6267_v3  ;;  %v4645_v62 = vmul.f32 -1.442695, %v6269_v46 }
 0x681   :  { %6442 = vpow2.f32 %v4644_v13 }
 0x682   :  { %6444 = vpow2.f32 %v4643_v59 }
 0x683   :  { %6446 = vpow2.f32 %v4645_v62 }
 0x684   :  { %6448 = vtanh.f32 %v6268_v19  ;;  %v8463_v19 = vld [vmem:[#allocation35_spill] sm:$0xff] }
 0x68b   :  { %v6443_v28 = vpop.eup %6442 }
 0x68c   :  { %v6445_v11 = vpop.eup %6444  ;;  %v1996_v21 = vadd.f32 1.0, %v6443_v28 }
 0x68d   :  { %v1989_v32 = vadd.f32 1.0, %v6445_v11  ;;  %v6447_v31 = vpop.eup %6446  ;;  %v8460_v11 = vld [vmem:[#allocation37_spill] sm:$0xff] }
 0x68e   :  { %6450 = vrcp.f32 %v1996_v21  ;;  %v6449_v49 = vpop.eup %6448  ;;  %v2005_v13 = vadd.f32 1.0, %v6447_v31  ;;  %v8464_v21 = vld [vmem:[#allocation41_spill] sm:$0xff]  ;;  %v8466_v31 = vld [vmem:[#allocation44_spill] sm:$0xff] }
 0x68f   :  { %6452 = vrcp.f32 %v1989_v32  ;;  %v8458_v32 = vld [vmem:[#allocation94_spill] sm:$0xff] }
 0x690   :  { %6454 = vrcp.f32 %v2005_v13  ;;  %v8470_v13 = vld [vmem:[#allocation48_spill] sm:$0xff] }
 0x698   :  { %v6451_v39 = vpop.eup %6450 }
 0x699   :  { %v6453_v12 = vpop.eup %6452  ;;  %v2000_v3 = vmul.f32 %v6451_v39, %v6449_v49  ;;  %v8462_v49 = vld [vmem:[#allocation40_spill] sm:$0xff]  ;;  %v8467_v39 = vld [vmem:[#allocation39_spill] sm:$0xff] }
 0x69a   :  { %v1992_v59 = vmul.f32 %v6453_v12, %v7366_v14  ;;  %v6455_v46 = vpop.eup %6454  ;;  %v8459_v14 = vld [vmem:[#allocation97_spill] sm:$0xff] }
 0x69b   :  { %v8468_v12 = vld [vmem:[#allocation45_spill] sm:$0xff] }
 0x69c   :  { %v7490_v50 = vadd.f32 %v2000_v3, %v1992_v59  ;;  %v8469_v3 = vld [vmem:[#allocation42_spill] sm:$0xff]  ;;  %v8471_v59 = vld [vmem:[#allocation43_spill] sm:$0xff] }
 0x69e   :  { %6456 = vtanh.f32 %v7490_v50 }
 0x6a8   :  { %v6457_v28 = vpop.eup %6456 }
 0x6a9   :  { %v2009_v62 = vmul.f32 %v6457_v28, %v6455_v46  ;;  %v8472_v46 = vld [vmem:[#allocation49_spill] sm:$0xff]  ;;  %v8473_v28 = vld [vmem:[#allocation46_spill] sm:$0xff] }
 0x6ab   :  { %2075 = vmatmul.mubr.f32.vlgmr.msra.gmra.mrb[22].mxu0 %v2009_v62  ;;  %2146 = vmatmul.mubr.f32.vlgmr.msra.gmra.mrb[22].mxu1 %v2009_v62  ;;  %v8474_v62 = vld [vmem:[#allocation51_spill] sm:$0xff] }
 0x6ac   :  { %5313 = vmatpush1.bf16.msra.mxu0 %v8397_v8  ;;  %5345 = vmatpush1.bf16.msra.mxu1 %v8398_v6 }
 0x6ad   :  { %5315 = vmatprep.subr.bf16.mxu0 %v8399_v2  ;;  %5347 = vmatprep.subr.bf16.mxu1 %v8400_v41 }
 0x6ae   :  { %2220 = vmatprep.mubr.f32.mxu0 %v8349_v37  ;;  %2291 = vmatprep.mubr.f32.mxu1 %v8349_v37 }
 0x6b0   :  { %5317 = vmatpush1.bf16.msra.mxu0 %v8401_v58  ;;  %5349 = vmatpush1.bf16.msra.mxu1 %v8458_v32 }
 0x6b1   :  { %5319 = vmatprep.subr.bf16.mxu0 %v8403_v47  ;;  %5351 = vmatprep.subr.bf16.mxu1 %v8404_v63 }
 0x6b4   :  { %5321 = vmatpush1.bf16.msra.mxu0 %v8459_v14  ;;  %5353 = vmatpush1.bf16.msra.mxu1 %v8406_v54 }
 0x6b5   :  { %5323 = vmatprep.subr.bf16.mxu0 %v8407_v53  ;;  %5355 = vmatprep.subr.bf16.mxu1 %v8408_v30 }
 0x6b8   :  { %5325 = vmatpush1.bf16.msra.mxu0 %v8409_v23  ;;  %5357 = vmatpush1.bf16.msra.mxu1 %v8410_v4 }
 0x6b9   :  { %5327 = vmatprep.subr.bf16.mxu0 %v8411_v25  ;;  %5359 = vmatprep.subr.bf16.mxu1 %v8412_v60 }
 0x6bc   :  { %5329 = vmatpush1.bf16.msra.mxu0 %v8413_v36  ;;  %5361 = vmatpush1.bf16.msra.mxu1 %v7235_v38 }
 0x6bd   :  { %5331 = vmatprep.subr.bf16.mxu0 %v7238_v16  ;;  %5363 = vmatprep.subr.bf16.mxu1 %v8414_v22 }
 0x6c0   :  { %5333 = vmatpush1.bf16.msra.mxu0 %v7244_v26  ;;  %5365 = vmatpush1.bf16.msra.mxu1 %v7247_v45 }
 0x6c1   :  { %5335 = vmatprep.subr.bf16.mxu0 %v7250_v57  ;;  %5367 = vmatprep.subr.bf16.mxu1 %v7253_v5 }
 0x6c4   :  { %5337 = vmatpush1.bf16.msra.mxu0 %v7256_v27  ;;  %5369 = vmatpush1.bf16.msra.mxu1 %v7259_v10 }
 0x6c5   :  { %5339 = vmatprep.subr.bf16.mxu0 %v7262_v56  ;;  %5371 = vmatprep.subr.bf16.mxu1 %v7265_v55 }
 0x6c8   :  { %5341 = vmatpush1.bf16.msra.mxu0 %v7268_v0  ;;  %5373 = vmatpush1.bf16.msra.mxu1 %v7271_v15 }
 0x6c9   :  { %5375 = vmatprep.subr.bf16.mxu0 %v6976_v29  ;;  %5407 = vmatprep.subr.bf16.mxu1 %v6989_v48 }
 0x6cb   :  { %2221 = vmatmul.mubr.f32.vlgmr.msra.gmra.mrb[6].mxu0 %v7447_v18  ;;  %2292 = vmatmul.mubr.f32.vlgmr.msra.gmra.mrb[6].mxu1 %v7447_v18  ;;  %v8461_v18 = vld [vmem:[#allocation34_spill] sm:$0xff] }
 0x6cc   :  { %5377 = vmatpush1.bf16.msra.mxu0 %v6978_v33  ;;  %5409 = vmatpush1.bf16.msra.mxu1 %v6991_v51 }
 0x6cd   :  { %5379 = vmatprep.subr.bf16.mxu0 %v6980_v34  ;;  %5411 = vmatprep.subr.bf16.mxu1 %v7001_v1 }
 0x6ce   :  { %2390 = vmatprep.mubr.f32.mxu0 %v8349_v37  ;;  %2461 = vmatprep.mubr.f32.mxu1 %v8349_v37 }
 0x6d0   :  { %5381 = vmatpush1.bf16.msra.mxu0 %v6984_v40  ;;  %5413 = vmatpush1.bf16.msra.mxu1 %v7003_v7 }
 0x6d1   :  { %5383 = vmatprep.subr.bf16.mxu0 %v6987_v43  ;;  %5415 = vmatprep.subr.bf16.mxu1 %v7009_v17 }
 0x6d4   :  { %5385 = vmatpush1.bf16.msra.mxu0 %v6994_v52  ;;  %5417 = vmatpush1.bf16.msra.mxu1 %v7015_v20 }
 0x6d5   :  { %5387 = vmatprep.subr.bf16.mxu0 %v6998_v61  ;;  %5419 = vmatprep.subr.bf16.mxu1 %v8460_v11 }
 0x6d8   :  { %5389 = vmatpush1.bf16.msra.mxu0 %v8461_v18  ;;  %5421 = vmatpush1.bf16.msra.mxu1 %v8462_v49  ;;  %v8482_v18 = vld [vmem:[#allocation29_spill] sm:$0xff] }
 0x6d9   :  { %5391 = vmatprep.subr.bf16.mxu0 %v8463_v19  ;;  %5423 = vmatprep.subr.bf16.mxu1 %v8464_v21  ;;  %v8475_v21 = vld [vmem:[#allocation47_spill] sm:$0xff]  ;;  %v8481_v19 = vld [vmem:[#allocation28_spill] sm:$0xff] }
 0x6dc   :  { %5393 = vmatpush1.bf16.msra.mxu0 %v8465_v42  ;;  %5425 = vmatpush1.bf16.msra.mxu1 %v8466_v31  ;;  %v8476_v42 = vld [vmem:[#allocation52_spill] sm:$0xff]  ;;  %v8477_v31 = vld [vmem:[#allocation50_spill] sm:$0xff] }
 0x6dd   :  { %5395 = vmatprep.subr.bf16.mxu0 %v8467_v39  ;;  %5427 = vmatprep.subr.bf16.mxu1 %v8468_v12  ;;  %v8478_v39 = vld [vmem:[#allocation53_spill] sm:$0xff]  ;;  %v8479_v12 = vld [vmem:[#allocation54_spill] sm:$0xff] }
 0x6e0   :  { %5397 = vmatpush1.bf16.msra.mxu0 %v8469_v3  ;;  %5429 = vmatpush1.bf16.msra.mxu1 %v8470_v13  ;;  %v8480_v3 = vld [vmem:[#allocation56_spill] sm:$0xff] }
 0x6e1   :  { %5399 = vmatprep.subr.bf16.mxu0 %v8471_v59  ;;  %5431 = vmatprep.subr.bf16.mxu1 %v8472_v46 }
 0x6e4   :  { %5401 = vmatpush1.bf16.msra.mxu0 %v8473_v28  ;;  %5433 = vmatpush1.bf16.msra.mxu1 %v8474_v62 }
 0x6e5   :  { %5403 = vmatprep.subr.bf16.mxu0 %v8475_v21  ;;  %5435 = vmatprep.subr.bf16.mxu1 %v8476_v42 }
 0x6e8   :  { %5405 = vmatpush1.bf16.msra.mxu0 %v8477_v31  ;;  %5437 = vmatpush1.bf16.msra.mxu1 %v8478_v39  ;;  %v8483_v39 = vld [vmem:[#allocation31_spill] sm:$0xff] }
 0x6e9   :  { %5439 = vmatprep.subr.bf16.mxu0 %v8479_v12  ;;  %5471 = vmatprep.subr.bf16.mxu1 %v8480_v3 }
 0x79e   :  { %v2222_v13 = vpop.f32.mrb[6].mxu0  ;;  %v2293_v59 = vpop.f32.mrb[6].mxu1 }
 0x79f   :  { %v6236_v46 = vadd.f32 %v2222_v13, %v8481_v19  ;;  %v2224_v49 = vpop.f32.mrb[7].mxu0  ;;  %v2295_v28 = vpop.f32.mrb[7].mxu1  ;;  %v6252_v61 = vadd.f32 %v2293_v59, %v8483_v39  ;;  %v8492_v59 = vld [vmem:[#allocation62_spill] sm:$0xff] }
 0x7a0   :  { %v6237_v62 = vadd.f32 %v2224_v49, %v8482_v18  ;;  %v6253_v31 = vadd.f32 %v2295_v28, %v8420_v35 }
 0x7a1   :  { %v4647_v11 = vmul.f32 -1.442695, %v6236_v46 }
 0x7a2   :  { %v4646_v21 = vmul.f32 -1.442695, %v6237_v62  ;;  %v4648_v42 = vmul.f32 -1.442695, %v6253_v31 }
 0x7a3   :  { %6458 = vpow2.f32 %v4647_v11 }
 0x7a4   :  { %6460 = vpow2.f32 %v4646_v21  ;;  %v8484_v21 = vld [vmem:[#allocation27_spill] sm:$0xff] }
 0x7a5   :  { %6462 = vpow2.f32 %v4648_v42 }
 0x7a6   :  { %6464 = vtanh.f32 %v6252_v61  ;;  %v8487_v61 = vld [vmem:[#allocation57_spill] sm:$0xff] }
 0x7ad   :  { %v6459_v12 = vpop.eup %6458 }
 0x7ae   :  { %v6461_v20 = vpop.eup %6460  ;;  %v2312_v3 = vadd.f32 1.0, %v6459_v12 }
 0x7af   :  { %v2305_v52 = vadd.f32 1.0, %v6461_v20  ;;  %v6463_v13 = vpop.eup %6462  ;;  %v8488_v20 = vld [vmem:[#allocation58_spill] sm:$0xff] }
 0x7b0   :  { %6466 = vrcp.f32 %v2312_v3  ;;  %v6465_v19 = vpop.eup %6464  ;;  %v2321_v11 = vadd.f32 1.0, %v6463_v13  ;;  %v8491_v3 = vld [vmem:[#allocation61_spill] sm:$0xff]  ;;  %v8493_v13 = vld [vmem:[#allocation64_spill] sm:$0xff] }
 0x7b1   :  { %6468 = vrcp.f32 %v2305_v52  ;;  %v8486_v52 = vld [vmem:[#allocation55_spill] sm:$0xff] }
 0x7b2   :  { %6470 = vrcp.f32 %v2321_v11  ;;  %v8497_v11 = vld [vmem:[#allocation68_spill] sm:$0xff] }
 0x7ba   :  { %v6467_v49 = vpop.eup %6466 }
 0x7bb   :  { %v6469_v46 = vpop.eup %6468  ;;  %v2316_v62 = vmul.f32 %v6467_v49, %v6465_v19  ;;  %v8489_v19 = vld [vmem:[#allocation60_spill] sm:$0xff]  ;;  %v8494_v49 = vld [vmem:[#allocation63_spill] sm:$0xff] }
 0x7bc   :  { %v2308_v18 = vmul.f32 %v6469_v46, %v8484_v21  ;;  %v6471_v31 = vpop.eup %6470  ;;  %v8495_v46 = vld [vmem:[#allocation65_spill] sm:$0xff]  ;;  %v8498_v21 = vld [vmem:[#allocation67_spill] sm:$0xff] }
 0x7be   :  { %v7568_v28 = vadd.f32 %v2316_v62, %v2308_v18  ;;  %v8490_v18 = vld [vmem:[#allocation59_spill] sm:$0xff]  ;;  %v8496_v62 = vld [vmem:[#allocation66_spill] sm:$0xff] }
 0x7c0   :  { %8485 = vst [vmem:[#allocation25_spill] sm:$0xff] %v7568_v28  ;;  %6472 = vtanh.f32 %v7568_v28 }
 0x7ca   :  { %v6473_v12 = vpop.eup %6472 }
 0x7cb   :  { %v7571_v42 = vmul.f32 %v6473_v12, %v6471_v31  ;;  %v8499_v31 = vld [vmem:[#allocation69_spill] sm:$0xff]  ;;  %v8500_v12 = vld [vmem:[#allocation70_spill] sm:$0xff] }
 0x7cd   :  { %2391 = vmatmul.mubr.f32.vlgmr.msra.gmra.mrb[22].mxu0 %v7571_v42  ;;  %2462 = vmatmul.mubr.f32.vlgmr.msra.gmra.mrb[22].mxu1 %v7571_v42 }
 0x7ce   :  { %5441 = vmatpush1.bf16.msra.mxu0 %v8486_v52  ;;  %5473 = vmatpush1.bf16.msra.mxu1 %v8487_v61 }
 0x7cf   :  { %5443 = vmatprep.subr.bf16.mxu0 %v8488_v20  ;;  %5475 = vmatprep.subr.bf16.mxu1 %v8489_v19  ;;  %v8518_v19 = vld [vmem:[#allocation24_spill] sm:$0xff] }
 0x7d0   :  { %2560 = vmatprep.mubr.f32.mxu0 %v8349_v37  ;;  %2631 = vmatprep.mubr.f32.mxu1 %v8349_v37 }
 0x7d2   :  { %5445 = vmatpush1.bf16.msra.mxu0 %v8490_v18  ;;  %5477 = vmatpush1.bf16.msra.mxu1 %v8491_v3  ;;  %v8501_v18 = vld [vmem:[#allocation72_spill] sm:$0xff]  ;;  %v8502_v3 = vld [vmem:[#allocation71_spill] sm:$0xff] }
 0x7d3   :  { %5447 = vmatprep.subr.bf16.mxu0 %v8492_v59  ;;  %5479 = vmatprep.subr.bf16.mxu1 %v8493_v13  ;;  %v8503_v59 = vld [vmem:[#allocation73_spill] sm:$0xff]  ;;  %v8504_v13 = vld [vmem:[#allocation74_spill] sm:$0xff] }
 0x7d6   :  { %5449 = vmatpush1.bf16.msra.mxu0 %v8494_v49  ;;  %5481 = vmatpush1.bf16.msra.mxu1 %v8495_v46  ;;  %v8505_v49 = vld [vmem:[#allocation76_spill] sm:$0xff]  ;;  %v8506_v46 = vld [vmem:[#allocation75_spill] sm:$0xff] }
 0x7d7   :  { %5451 = vmatprep.subr.bf16.mxu0 %v8496_v62  ;;  %5483 = vmatprep.subr.bf16.mxu1 %v8497_v11  ;;  %v8507_v62 = vld [vmem:[#allocation77_spill] sm:$0xff]  ;;  %v8508_v11 = vld [vmem:[#allocation78_spill] sm:$0xff] }
 0x7da   :  { %5453 = vmatpush1.bf16.msra.mxu0 %v8498_v21  ;;  %5485 = vmatpush1.bf16.msra.mxu1 %v8499_v31  ;;  %v8509_v21 = vld [vmem:[#allocation80_spill] sm:$0xff]  ;;  %v8510_v31 = vld [vmem:[#allocation79_spill] sm:$0xff] }
 0x7db   :  { %5455 = vmatprep.subr.bf16.mxu0 %v8500_v12  ;;  %5487 = vmatprep.subr.bf16.mxu1 %v8501_v18  ;;  %v8511_v12 = vld [vmem:[#allocation81_spill] sm:$0xff]  ;;  %v8512_v18 = vld [vmem:[#allocation82_spill] sm:$0xff] }
 0x7de   :  { %5457 = vmatpush1.bf16.msra.mxu0 %v8502_v3  ;;  %5489 = vmatpush1.bf16.msra.mxu1 %v8503_v59  ;;  %v8513_v3 = vld [vmem:[#allocation84_spill] sm:$0xff]  ;;  %v8514_v59 = vld [vmem:[#allocation83_spill] sm:$0xff] }
 0x7df   :  { %5459 = vmatprep.subr.bf16.mxu0 %v8504_v13  ;;  %5491 = vmatprep.subr.bf16.mxu1 %v8505_v49  ;;  %v8515_v13 = vld [vmem:[#allocation86_spill] sm:$0xff]  ;;  %v8516_v49 = vld [vmem:[#allocation85_spill] sm:$0xff] }
 0x7e2   :  { %5461 = vmatpush1.bf16.msra.mxu0 %v8506_v46  ;;  %5493 = vmatpush1.bf16.msra.mxu1 %v8507_v62  ;;  %v8517_v46 = vld [vmem:[#allocation87_spill] sm:$0xff] }
 0x7e3   :  { %5463 = vmatprep.subr.bf16.mxu0 %v8508_v11  ;;  %5495 = vmatprep.subr.bf16.mxu1 %v8509_v21 }
 0x7e6   :  { %5465 = vmatpush1.bf16.msra.mxu0 %v8510_v31  ;;  %5497 = vmatpush1.bf16.msra.mxu1 %v8511_v12 }
 0x7e7   :  { %5467 = vmatprep.subr.bf16.mxu0 %v8512_v18  ;;  %5499 = vmatprep.subr.bf16.mxu1 %v8513_v3 }
 0x7ea   :  { %5469 = vmatpush1.bf16.msra.mxu0 %v8514_v59  ;;  %5501 = vmatpush1.bf16.msra.mxu1 %v8515_v13 }
 0x7eb   :  { %5503 = vmatprep.subr.bf16.mxu0 %v8516_v49  ;;  %5535 = vmatprep.subr.bf16.mxu1 %v8517_v46 }
 0x8a0   :  { %v2392_v62 = vpop.f32.mrb[22].mxu0  ;;  %v2463_v11 = vpop.f32.mrb[22].mxu1 }
 0x8a1   :  { %v6270_v21 = vadd.f32 %v2392_v62, %v8518_v19  ;;  %v2394_v20 = vpop.f32.mrb[23].mxu0  ;;  %v2465_v31 = vpop.f32.mrb[23].mxu1  ;;  %v6272_v13 = vadd.f32 %v2463_v11, %v8395_v44  ;;  %v8526_v11 = vld [vmem:[#allocation41_spill] sm:$0xff] }
 0x8a2   :  { %v6271_v12 = vadd.f32 %v2394_v20, %v8457_v24  ;;  %v6273_v59 = vadd.f32 %v2465_v31, %v8394_v9 }
 0x8a3   :  { %v4650_v61 = vmul.f32 -1.442695, %v6270_v21 }
 0x8a4   :  { %v4649_v18 = vmul.f32 -1.442695, %v6271_v12  ;;  %v4651_v3 = vmul.f32 -1.442695, %v6273_v59 }
 0x8a5   :  { %6474 = vpow2.f32 %v4650_v61 }
 0x8a6   :  { %6476 = vpow2.f32 %v4649_v18 }
 0x8a7   :  { %6478 = vpow2.f32 %v4651_v3 }
 0x8a8   :  { %6480 = vtanh.f32 %v6272_v13  ;;  %v8524_v13 = vld [vmem:[#allocation40_spill] sm:$0xff] }
 0x8af   :  { %v6475_v49 = vpop.eup %6474 }
 0x8b0   :  { %v6477_v52 = vpop.eup %6476  ;;  %v2482_v46 = vadd.f32 1.0, %v6475_v49 }
 0x8b1   :  { %v2475_v28 = vadd.f32 1.0, %v6477_v52  ;;  %v6479_v62 = vpop.eup %6478  ;;  %v8522_v52 = vld [vmem:[#allocation37_spill] sm:$0xff] }
 0x8b2   :  { %6482 = vrcp.f32 %v2482_v46  ;;  %v6481_v19 = vpop.eup %6480  ;;  %v2491_v61 = vadd.f32 1.0, %v6479_v62  ;;  %v8525_v46 = vld [vmem:[#allocation35_spill] sm:$0xff]  ;;  %v8527_v62 = vld [vmem:[#allocation38_spill] sm:$0xff] }
 0x8b3   :  { %6484 = vrcp.f32 %v2475_v28  ;;  %v8520_v28 = vld [vmem:[#allocation36_spill] sm:$0xff] }
 0x8b4   :  { %6486 = vrcp.f32 %v2491_v61  ;;  %v8531_v61 = vld [vmem:[#allocation42_spill] sm:$0xff] }
 0x8bc   :  { %v6483_v20 = vpop.eup %6482 }
 0x8bd   :  { %v6485_v21 = vpop.eup %6484  ;;  %v2486_v12 = vmul.f32 %v6483_v20, %v6481_v19  ;;  %v8523_v19 = vld [vmem:[#allocation34_spill] sm:$0xff]  ;;  %v8528_v20 = vld [vmem:[#allocation44_spill] sm:$0xff] }
 0x8be   :  { %v2478_v18 = vmul.f32 %v6485_v21, %v7490_v50  ;;  %v6487_v59 = vpop.eup %6486  ;;  %v8519_v50 = vld [vmem:[#allocation32_spill] sm:$0xff]  ;;  %v8529_v21 = vld [vmem:[#allocation39_spill] sm:$0xff] }
 0x8c0   :  { %v7614_v31 = vadd.f32 %v2486_v12, %v2478_v18  ;;  %v8530_v12 = vld [vmem:[#allocation45_spill] sm:$0xff]  ;;  %v8532_v18 = vld [vmem:[#allocation48_spill] sm:$0xff] }
 0x8c2   :  { %6488 = vtanh.f32 %v7614_v31 }
 0x8cc   :  { %v6489_v49 = vpop.eup %6488 }
 0x8cd   :  { %v2495_v3 = vmul.f32 %v6489_v49, %v6487_v59  ;;  %v8533_v59 = vld [vmem:[#allocation43_spill] sm:$0xff]  ;;  %v8534_v49 = vld [vmem:[#allocation49_spill] sm:$0xff] }
 0x8cf   :  { %2561 = vmatmul.mubr.f32.vlgmr.msra.gmra.mrb[24].mxu0 %v2495_v3  ;;  %2632 = vmatmul.mubr.f32.vlgmr.msra.gmra.mrb[24].mxu1 %v2495_v3  ;;  %v8535_v3 = vld [vmem:[#allocation46_spill] sm:$0xff] }
 0x8d0   :  { %5505 = vmatpush1.bf16.msra.mxu0 %v8397_v8  ;;  %5537 = vmatpush1.bf16.msra.mxu1 %v8398_v6 }
 0x8d1   :  { %5507 = vmatprep.subr.bf16.mxu0 %v8399_v2  ;;  %5539 = vmatprep.subr.bf16.mxu1 %v8400_v41 }
 0x8d2   :  { %2706 = vmatprep.mubr.f32.mxu0 %v8349_v37  ;;  %2777 = vmatprep.mubr.f32.mxu1 %v8349_v37 }
 0x8d4   :  { %5509 = vmatpush1.bf16.msra.mxu0 %v8401_v58  ;;  %5541 = vmatpush1.bf16.msra.mxu1 %v8458_v32 }
 0x8d5   :  { %5511 = vmatprep.subr.bf16.mxu0 %v8403_v47  ;;  %5543 = vmatprep.subr.bf16.mxu1 %v8404_v63 }
 0x8d8   :  { %5513 = vmatpush1.bf16.msra.mxu0 %v8459_v14  ;;  %5545 = vmatpush1.bf16.msra.mxu1 %v8406_v54 }
 0x8d9   :  { %5515 = vmatprep.subr.bf16.mxu0 %v8407_v53  ;;  %5547 = vmatprep.subr.bf16.mxu1 %v8408_v30 }
 0x8dc   :  { %5517 = vmatpush1.bf16.msra.mxu0 %v8409_v23  ;;  %5549 = vmatpush1.bf16.msra.mxu1 %v8410_v4 }
 0x8dd   :  { %5519 = vmatprep.subr.bf16.mxu0 %v8411_v25  ;;  %5551 = vmatprep.subr.bf16.mxu1 %v8412_v60 }
 0x8e0   :  { %5521 = vmatpush1.bf16.msra.mxu0 %v8413_v36  ;;  %5553 = vmatpush1.bf16.msra.mxu1 %v7235_v38 }
 0x8e1   :  { %5523 = vmatprep.subr.bf16.mxu0 %v7238_v16  ;;  %5555 = vmatprep.subr.bf16.mxu1 %v8414_v22 }
 0x8e4   :  { %5525 = vmatpush1.bf16.msra.mxu0 %v7244_v26  ;;  %5557 = vmatpush1.bf16.msra.mxu1 %v7247_v45 }
 0x8e5   :  { %5527 = vmatprep.subr.bf16.mxu0 %v7250_v57  ;;  %5559 = vmatprep.subr.bf16.mxu1 %v7253_v5 }
 0x8e8   :  { %5529 = vmatpush1.bf16.msra.mxu0 %v7256_v27  ;;  %5561 = vmatpush1.bf16.msra.mxu1 %v7259_v10 }
 0x8e9   :  { %5531 = vmatprep.subr.bf16.mxu0 %v7262_v56  ;;  %5563 = vmatprep.subr.bf16.mxu1 %v7265_v55 }
 0x8ec   :  { %5533 = vmatpush1.bf16.msra.mxu0 %v7268_v0  ;;  %5565 = vmatpush1.bf16.msra.mxu1 %v7271_v15 }
 0x8ed   :  { %5567 = vmatprep.subr.bf16.mxu0 %v6976_v29  ;;  %5599 = vmatprep.subr.bf16.mxu1 %v6989_v48 }
 0x8ef   :  { %2707 = vmatmul.mubr.f32.vlgmr.msra.gmra.mrb[8].mxu0 %v7571_v42  ;;  %2778 = vmatmul.mubr.f32.vlgmr.msra.gmra.mrb[8].mxu1 %v7571_v42  ;;  %v8521_v42 = vld [vmem:[#allocation33_spill] sm:$0xff] }
 0x8f0   :  { %5569 = vmatpush1.bf16.msra.mxu0 %v6978_v33  ;;  %5601 = vmatpush1.bf16.msra.mxu1 %v6991_v51 }
 0x8f1   :  { %5571 = vmatprep.subr.bf16.mxu0 %v6980_v34  ;;  %5603 = vmatprep.subr.bf16.mxu1 %v7001_v1 }
 0x8f2   :  { %2876 = vmatprep.mubr.f32.mxu0 %v8349_v37  ;;  %2947 = vmatprep.mubr.f32.mxu1 %v8349_v37 }
 0x8f4   :  { %5573 = vmatpush1.bf16.msra.mxu0 %v6984_v40  ;;  %5605 = vmatpush1.bf16.msra.mxu1 %v7003_v7 }
 0x8f5   :  { %5575 = vmatprep.subr.bf16.mxu0 %v6987_v43  ;;  %5607 = vmatprep.subr.bf16.mxu1 %v7009_v17 }
 0x8f8   :  { %5577 = vmatpush1.bf16.msra.mxu0 %v8519_v50  ;;  %5609 = vmatpush1.bf16.msra.mxu1 %v8520_v28 }
 0x8f9   :  { %5579 = vmatprep.subr.bf16.mxu0 %v8521_v42  ;;  %5611 = vmatprep.subr.bf16.mxu1 %v8522_v52  ;;  %v8544_v52 = vld [vmem:[#allocation29_spill] sm:$0xff] }
 0x8fc   :  { %5581 = vmatpush1.bf16.msra.mxu0 %v8523_v19  ;;  %5613 = vmatpush1.bf16.msra.mxu1 %v8524_v13  ;;  %v8543_v13 = vld [vmem:[#allocation28_spill] sm:$0xff] }
 0x8fd   :  { %5583 = vmatprep.subr.bf16.mxu0 %v8525_v46  ;;  %5615 = vmatprep.subr.bf16.mxu1 %v8526_v11  ;;  %v8536_v46 = vld [vmem:[#allocation51_spill] sm:$0xff] }
 0x8fe   :  { %v8537_v11 = vld [vmem:[#allocation47_spill] sm:$0xff] }
 0x900   :  { %5585 = vmatpush1.bf16.msra.mxu0 %v8527_v62  ;;  %5617 = vmatpush1.bf16.msra.mxu1 %v8528_v20  ;;  %v8538_v62 = vld [vmem:[#allocation52_spill] sm:$0xff]  ;;  %v8539_v20 = vld [vmem:[#allocation50_spill] sm:$0xff] }
 0x901   :  { %5587 = vmatprep.subr.bf16.mxu0 %v8529_v21  ;;  %5619 = vmatprep.subr.bf16.mxu1 %v8530_v12  ;;  %v8540_v21 = vld [vmem:[#allocation53_spill] sm:$0xff]  ;;  %v8541_v12 = vld [vmem:[#allocation54_spill] sm:$0xff] }
 0x904   :  { %5589 = vmatpush1.bf16.msra.mxu0 %v8531_v61  ;;  %5621 = vmatpush1.bf16.msra.mxu1 %v8532_v18  ;;  %v8542_v61 = vld [vmem:[#allocation56_spill] sm:$0xff] }
 0x905   :  { %5591 = vmatprep.subr.bf16.mxu0 %v8533_v59  ;;  %5623 = vmatprep.subr.bf16.mxu1 %v8534_v49 }
 0x908   :  { %5593 = vmatpush1.bf16.msra.mxu0 %v8535_v3  ;;  %5625 = vmatpush1.bf16.msra.mxu1 %v8536_v46 }
 0x909   :  { %5595 = vmatprep.subr.bf16.mxu0 %v8537_v11  ;;  %5627 = vmatprep.subr.bf16.mxu1 %v8538_v62 }
 0x90c   :  { %5597 = vmatpush1.bf16.msra.mxu0 %v8539_v20  ;;  %5629 = vmatpush1.bf16.msra.mxu1 %v8540_v21 }
 0x90d   :  { %5631 = vmatprep.subr.bf16.mxu0 %v8541_v12  ;;  %5663 = vmatprep.subr.bf16.mxu1 %v8542_v61 }
 0x9c2   :  { %v2708_v18 = vpop.f32.mrb[8].mxu0  ;;  %v2779_v59 = vpop.f32.mrb[8].mxu1 }
 0x9c3   :  { %v6238_v49 = vadd.f32 %v2708_v18, %v8543_v13  ;;  %v2710_v19 = vpop.f32.mrb[9].mxu0  ;;  %v2781_v3 = vpop.f32.mrb[9].mxu1  ;;  %v6254_v21 = vadd.f32 %v2779_v59, %v8483_v39  ;;  %v8553_v59 = vld [vmem:[#allocation62_spill] sm:$0xff] }
 0x9c4   :  { %v6239_v46 = vadd.f32 %v2710_v19, %v8544_v52  ;;  %v6255_v20 = vadd.f32 %v2781_v3, %v8420_v35 }
 0x9c5   :  { %v4653_v42 = vmul.f32 -1.442695, %v6238_v49 }
 0x9c6   :  { %v4652_v11 = vmul.f32 -1.442695, %v6239_v46  ;;  %v4654_v62 = vmul.f32 -1.442695, %v6255_v20 }
 0x9c7   :  { %6490 = vpow2.f32 %v4653_v42 }
 0x9c8   :  { %6492 = vpow2.f32 %v4652_v11  ;;  %v8545_v11 = vld [vmem:[#allocation25_spill] sm:$0xff] }
 0x9c9   :  { %6494 = vpow2.f32 %v4654_v62 }
 0x9ca   :  { %6496 = vtanh.f32 %v6254_v21  ;;  %v8550_v21 = vld [vmem:[#allocation60_spill] sm:$0xff] }
 0x9d1   :  { %v6491_v12 = vpop.eup %6490 }
 0x9d2   :  { %v6493_v28 = vpop.eup %6492  ;;  %v2798_v61 = vadd.f32 1.0, %v6491_v12 }
 0x9d3   :  { %v2791_v50 = vadd.f32 1.0, %v6493_v28  ;;  %v6495_v18 = vpop.eup %6494  ;;  %v8548_v28 = vld [vmem:[#allocation57_spill] sm:$0xff] }
 0x9d4   :  { %6498 = vrcp.f32 %v2798_v61  ;;  %v6497_v13 = vpop.eup %6496  ;;  %v2807_v42 = vadd.f32 1.0, %v6495_v18  ;;  %v8552_v61 = vld [vmem:[#allocation61_spill] sm:$0xff]  ;;  %v8554_v18 = vld [vmem:[#allocation64_spill] sm:$0xff] }
 0x9d5   :  { %6500 = vrcp.f32 %v2791_v50  ;;  %v8547_v50 = vld [vmem:[#allocation55_spill] sm:$0xff] }
 0x9d6   :  { %6502 = vrcp.f32 %v2807_v42  ;;  %v8558_v42 = vld [vmem:[#allocation68_spill] sm:$0xff] }
 0x9de   :  { %v6499_v19 = vpop.eup %6498 }
 0x9df   :  { %v6501_v49 = vpop.eup %6500  ;;  %v2802_v46 = vmul.f32 %v6499_v19, %v6497_v13  ;;  %v8549_v13 = vld [vmem:[#allocation58_spill] sm:$0xff]  ;;  %v8555_v19 = vld [vmem:[#allocation63_spill] sm:$0xff] }
 0x9e0   :  { %v2794_v52 = vmul.f32 %v6501_v49, %v8545_v11  ;;  %v6503_v20 = vpop.eup %6502  ;;  %v8556_v49 = vld [vmem:[#allocation65_spill] sm:$0xff]  ;;  %v8559_v11 = vld [vmem:[#allocation67_spill] sm:$0xff] }
 0x9e2   :  { %v7692_v3 = vadd.f32 %v2802_v46, %v2794_v52  ;;  %v8551_v52 = vld [vmem:[#allocation59_spill] sm:$0xff]  ;;  %v8557_v46 = vld [vmem:[#allocation66_spill] sm:$0xff] }
 0x9e4   :  { %8546 = vst [vmem:[#allocation88_spill] sm:$0xff] %v7692_v3  ;;  %6504 = vtanh.f32 %v7692_v3 }
 0x9ee   :  { %v6505_v12 = vpop.eup %6504 }
 0x9ef   :  { %v7695_v62 = vmul.f32 %v6505_v12, %v6503_v20  ;;  %v8560_v20 = vld [vmem:[#allocation69_spill] sm:$0xff]  ;;  %v8561_v12 = vld [vmem:[#allocation70_spill] sm:$0xff] }
 0x9f1   :  { %2877 = vmatmul.mubr.f32.vlgmr.msra.gmra.mrb[24].mxu0 %v7695_v62  ;;  %2948 = vmatmul.mubr.f32.vlgmr.msra.gmra.mrb[24].mxu1 %v7695_v62 }
 0x9f2   :  { %5633 = vmatpush1.bf16.msra.mxu0 %v8547_v50  ;;  %5665 = vmatpush1.bf16.msra.mxu1 %v8548_v28 }
 0x9f3   :  { %5635 = vmatprep.subr.bf16.mxu0 %v8549_v13  ;;  %5667 = vmatprep.subr.bf16.mxu1 %v8550_v21  ;;  %v8579_v21 = vld [vmem:[#allocation24_spill] sm:$0xff] }
 0x9f4   :  { %3046 = vmatprep.mubr.f32.mxu0 %v8349_v37  ;;  %3117 = vmatprep.mubr.f32.mxu1 %v8349_v37 }
 0x9f6   :  { %5637 = vmatpush1.bf16.msra.mxu0 %v8551_v52  ;;  %5669 = vmatpush1.bf16.msra.mxu1 %v8552_v61  ;;  %v8562_v52 = vld [vmem:[#allocation72_spill] sm:$0xff]  ;;  %v8563_v61 = vld [vmem:[#allocation71_spill] sm:$0xff] }
 0x9f7   :  { %5639 = vmatprep.subr.bf16.mxu0 %v8553_v59  ;;  %5671 = vmatprep.subr.bf16.mxu1 %v8554_v18  ;;  %v8564_v59 = vld [vmem:[#allocation73_spill] sm:$0xff]  ;;  %v8565_v18 = vld [vmem:[#allocation74_spill] sm:$0xff] }
 0x9fa   :  { %5641 = vmatpush1.bf16.msra.mxu0 %v8555_v19  ;;  %5673 = vmatpush1.bf16.msra.mxu1 %v8556_v49  ;;  %v8566_v19 = vld [vmem:[#allocation76_spill] sm:$0xff]  ;;  %v8567_v49 = vld [vmem:[#allocation75_spill] sm:$0xff] }
 0x9fb   :  { %5643 = vmatprep.subr.bf16.mxu0 %v8557_v46  ;;  %5675 = vmatprep.subr.bf16.mxu1 %v8558_v42  ;;  %v8568_v46 = vld [vmem:[#allocation77_spill] sm:$0xff]  ;;  %v8569_v42 = vld [vmem:[#allocation78_spill] sm:$0xff] }
 0x9fe   :  { %5645 = vmatpush1.bf16.msra.mxu0 %v8559_v11  ;;  %5677 = vmatpush1.bf16.msra.mxu1 %v8560_v20  ;;  %v8570_v11 = vld [vmem:[#allocation80_spill] sm:$0xff]  ;;  %v8571_v20 = vld [vmem:[#allocation79_spill] sm:$0xff] }
 0x9ff   :  { %5647 = vmatprep.subr.bf16.mxu0 %v8561_v12  ;;  %5679 = vmatprep.subr.bf16.mxu1 %v8562_v52  ;;  %v8572_v12 = vld [vmem:[#allocation81_spill] sm:$0xff]  ;;  %v8573_v52 = vld [vmem:[#allocation82_spill] sm:$0xff] }
 0xa02   :  { %5649 = vmatpush1.bf16.msra.mxu0 %v8563_v61  ;;  %5681 = vmatpush1.bf16.msra.mxu1 %v8564_v59  ;;  %v8574_v61 = vld [vmem:[#allocation84_spill] sm:$0xff]  ;;  %v8575_v59 = vld [vmem:[#allocation83_spill] sm:$0xff] }
 0xa03   :  { %5651 = vmatprep.subr.bf16.mxu0 %v8565_v18  ;;  %5683 = vmatprep.subr.bf16.mxu1 %v8566_v19  ;;  %v8576_v18 = vld [vmem:[#allocation86_spill] sm:$0xff]  ;;  %v8577_v19 = vld [vmem:[#allocation85_spill] sm:$0xff] }
 0xa06   :  { %5653 = vmatpush1.bf16.msra.mxu0 %v8567_v49  ;;  %5685 = vmatpush1.bf16.msra.mxu1 %v8568_v46  ;;  %v8578_v49 = vld [vmem:[#allocation87_spill] sm:$0xff] }
 0xa07   :  { %5655 = vmatprep.subr.bf16.mxu0 %v8569_v42  ;;  %5687 = vmatprep.subr.bf16.mxu1 %v8570_v11 }
 0xa0a   :  { %5657 = vmatpush1.bf16.msra.mxu0 %v8571_v20  ;;  %5689 = vmatpush1.bf16.msra.mxu1 %v8572_v12 }
 0xa0b   :  { %5659 = vmatprep.subr.bf16.mxu0 %v8573_v52  ;;  %5691 = vmatprep.subr.bf16.mxu1 %v8574_v61 }
 0xa0e   :  { %5661 = vmatpush1.bf16.msra.mxu0 %v8575_v59  ;;  %5693 = vmatpush1.bf16.msra.mxu1 %v8576_v18 }
 0xa0f   :  { %5695 = vmatprep.subr.bf16.mxu0 %v8577_v19  ;;  %5727 = vmatprep.subr.bf16.mxu1 %v8578_v49 }
 0xac4   :  { %v2878_v46 = vpop.f32.mrb[24].mxu0  ;;  %v2949_v42 = vpop.f32.mrb[24].mxu1 }
 0xac5   :  { %v6274_v11 = vadd.f32 %v2878_v46, %v8579_v21  ;;  %v2880_v13 = vpop.f32.mrb[25].mxu0  ;;  %v2951_v20 = vpop.f32.mrb[25].mxu1  ;;  %v6276_v18 = vadd.f32 %v2949_v42, %v8395_v44  ;;  %v8587_v42 = vld [vmem:[#allocation41_spill] sm:$0xff] }
 0xac6   :  { %v6275_v12 = vadd.f32 %v2880_v13, %v8457_v24  ;;  %v6277_v59 = vadd.f32 %v2951_v20, %v8394_v9 }
 0xac7   :  { %v4656_v28 = vmul.f32 -1.442695, %v6274_v11 }
 0xac8   :  { %v4655_v52 = vmul.f32 -1.442695, %v6275_v12  ;;  %v4657_v61 = vmul.f32 -1.442695, %v6277_v59 }
 0xac9   :  { %6506 = vpow2.f32 %v4656_v28 }
 0xaca   :  { %6508 = vpow2.f32 %v4655_v52 }
 0xacb   :  { %6510 = vpow2.f32 %v4657_v61 }
 0xacc   :  { %6512 = vtanh.f32 %v6276_v18  ;;  %v8585_v18 = vld [vmem:[#allocation40_spill] sm:$0xff] }
 0xad3   :  { %v6507_v19 = vpop.eup %6506 }
 0xad4   :  { %v6509_v50 = vpop.eup %6508  ;;  %v2968_v49 = vadd.f32 1.0, %v6507_v19 }
 0xad5   :  { %v2961_v3 = vadd.f32 1.0, %v6509_v50  ;;  %v6511_v46 = vpop.eup %6510  ;;  %v8583_v50 = vld [vmem:[#allocation37_spill] sm:$0xff] }
 0xad6   :  { %6514 = vrcp.f32 %v2968_v49  ;;  %v6513_v21 = vpop.eup %6512  ;;  %v2977_v28 = vadd.f32 1.0, %v6511_v46  ;;  %v8586_v49 = vld [vmem:[#allocation35_spill] sm:$0xff]  ;;  %v8588_v46 = vld [vmem:[#allocation38_spill] sm:$0xff] }
 0xad7   :  { %6516 = vrcp.f32 %v2961_v3  ;;  %v8581_v3 = vld [vmem:[#allocation36_spill] sm:$0xff] }
 0xad8   :  { %6518 = vrcp.f32 %v2977_v28  ;;  %v8592_v28 = vld [vmem:[#allocation42_spill] sm:$0xff] }
 0xae0   :  { %v6515_v13 = vpop.eup %6514 }
 0xae1   :  { %v6517_v11 = vpop.eup %6516  ;;  %v2972_v12 = vmul.f32 %v6515_v13, %v6513_v21  ;;  %v8584_v21 = vld [vmem:[#allocation34_spill] sm:$0xff]  ;;  %v8589_v13 = vld [vmem:[#allocation44_spill] sm:$0xff] }
 0xae2   :  { %v2964_v52 = vmul.f32 %v6517_v11, %v7614_v31  ;;  %v6519_v59 = vpop.eup %6518  ;;  %v8580_v31 = vld [vmem:[#allocation32_spill] sm:$0xff]  ;;  %v8590_v11 = vld [vmem:[#allocation39_spill] sm:$0xff] }
 0xae4   :  { %v7738_v20 = vadd.f32 %v2972_v12, %v2964_v52  ;;  %v8591_v12 = vld [vmem:[#allocation45_spill] sm:$0xff]  ;;  %v8593_v52 = vld [vmem:[#allocation48_spill] sm:$0xff] }
 0xae6   :  { %6520 = vtanh.f32 %v7738_v20 }
 0xaf0   :  { %v6521_v19 = vpop.eup %6520 }
 0xaf1   :  { %v2981_v61 = vmul.f32 %v6521_v19, %v6519_v59  ;;  %v8594_v59 = vld [vmem:[#allocation43_spill] sm:$0xff]  ;;  %v8595_v19 = vld [vmem:[#allocation49_spill] sm:$0xff] }
 0xaf3   :  { %3047 = vmatmul.mubr.f32.vlgmr.msra.gmra.mrb[26].mxu0 %v2981_v61  ;;  %3118 = vmatmul.mubr.f32.vlgmr.msra.gmra.mrb[26].mxu1 %v2981_v61  ;;  %v8596_v61 = vld [vmem:[#allocation46_spill] sm:$0xff] }
 0xaf4   :  { %5697 = vmatpush1.bf16.msra.mxu0 %v8397_v8  ;;  %5729 = vmatpush1.bf16.msra.mxu1 %v8398_v6 }
 0xaf5   :  { %5699 = vmatprep.subr.bf16.mxu0 %v8399_v2  ;;  %5731 = vmatprep.subr.bf16.mxu1 %v8400_v41 }
 0xaf6   :  { %3192 = vmatprep.mubr.f32.mxu0 %v8349_v37  ;;  %3263 = vmatprep.mubr.f32.mxu1 %v8349_v37 }
 0xaf8   :  { %5701 = vmatpush1.bf16.msra.mxu0 %v8401_v58  ;;  %5733 = vmatpush1.bf16.msra.mxu1 %v8458_v32 }
 0xaf9   :  { %5703 = vmatprep.subr.bf16.mxu0 %v8403_v47  ;;  %5735 = vmatprep.subr.bf16.mxu1 %v8404_v63 }
 0xafc   :  { %5705 = vmatpush1.bf16.msra.mxu0 %v8459_v14  ;;  %5737 = vmatpush1.bf16.msra.mxu1 %v8406_v54 }
 0xafd   :  { %5707 = vmatprep.subr.bf16.mxu0 %v8407_v53  ;;  %5739 = vmatprep.subr.bf16.mxu1 %v8408_v30 }
 0xb00   :  { %5709 = vmatpush1.bf16.msra.mxu0 %v8409_v23  ;;  %5741 = vmatpush1.bf16.msra.mxu1 %v8410_v4 }
 0xb01   :  { %5711 = vmatprep.subr.bf16.mxu0 %v8411_v25  ;;  %5743 = vmatprep.subr.bf16.mxu1 %v8412_v60 }
 0xb04   :  { %5713 = vmatpush1.bf16.msra.mxu0 %v8413_v36  ;;  %5745 = vmatpush1.bf16.msra.mxu1 %v7235_v38 }
 0xb05   :  { %5715 = vmatprep.subr.bf16.mxu0 %v7238_v16  ;;  %5747 = vmatprep.subr.bf16.mxu1 %v8414_v22 }
 0xb08   :  { %5717 = vmatpush1.bf16.msra.mxu0 %v7244_v26  ;;  %5749 = vmatpush1.bf16.msra.mxu1 %v7247_v45 }
 0xb09   :  { %5719 = vmatprep.subr.bf16.mxu0 %v7250_v57  ;;  %5751 = vmatprep.subr.bf16.mxu1 %v7253_v5 }
 0xb0c   :  { %5721 = vmatpush1.bf16.msra.mxu0 %v7256_v27  ;;  %5753 = vmatpush1.bf16.msra.mxu1 %v7259_v10 }
 0xb0d   :  { %5723 = vmatprep.subr.bf16.mxu0 %v7262_v56  ;;  %5755 = vmatprep.subr.bf16.mxu1 %v7265_v55 }
 0xb10   :  { %5725 = vmatpush1.bf16.msra.mxu0 %v7268_v0  ;;  %5757 = vmatpush1.bf16.msra.mxu1 %v7271_v15 }
 0xb11   :  { %5759 = vmatprep.subr.bf16.mxu0 %v6976_v29  ;;  %5791 = vmatprep.subr.bf16.mxu1 %v6989_v48 }
 0xb13   :  { %3193 = vmatmul.mubr.f32.vlgmr.msra.gmra.mrb[10].mxu0 %v7695_v62  ;;  %3264 = vmatmul.mubr.f32.vlgmr.msra.gmra.mrb[10].mxu1 %v7695_v62  ;;  %v8582_v62 = vld [vmem:[#allocation33_spill] sm:$0xff] }
 0xb14   :  { %5761 = vmatpush1.bf16.msra.mxu0 %v6978_v33  ;;  %5793 = vmatpush1.bf16.msra.mxu1 %v6991_v51 }
 0xb15   :  { %5763 = vmatprep.subr.bf16.mxu0 %v6980_v34  ;;  %5795 = vmatprep.subr.bf16.mxu1 %v7001_v1 }
 0xb16   :  { %3362 = vmatprep.mubr.f32.mxu0 %v8349_v37  ;;  %3433 = vmatprep.mubr.f32.mxu1 %v8349_v37 }
 0xb18   :  { %5765 = vmatpush1.bf16.msra.mxu0 %v6984_v40  ;;  %5797 = vmatpush1.bf16.msra.mxu1 %v7003_v7 }
 0xb19   :  { %5767 = vmatprep.subr.bf16.mxu0 %v6987_v43  ;;  %5799 = vmatprep.subr.bf16.mxu1 %v7009_v17 }
 0xb1c   :  { %5769 = vmatpush1.bf16.msra.mxu0 %v8580_v31  ;;  %5801 = vmatpush1.bf16.msra.mxu1 %v8581_v3 }
 0xb1d   :  { %5771 = vmatprep.subr.bf16.mxu0 %v8582_v62  ;;  %5803 = vmatprep.subr.bf16.mxu1 %v8583_v50  ;;  %v8605_v50 = vld [vmem:[#allocation29_spill] sm:$0xff] }
 0xb20   :  { %5773 = vmatpush1.bf16.msra.mxu0 %v8584_v21  ;;  %5805 = vmatpush1.bf16.msra.mxu1 %v8585_v18  ;;  %v8604_v18 = vld [vmem:[#allocation28_spill] sm:$0xff] }
 0xb21   :  { %5775 = vmatprep.subr.bf16.mxu0 %v8586_v49  ;;  %5807 = vmatprep.subr.bf16.mxu1 %v8587_v42  ;;  %v8597_v49 = vld [vmem:[#allocation51_spill] sm:$0xff] }
 0xb22   :  { %v8598_v42 = vld [vmem:[#allocation47_spill] sm:$0xff] }
 0xb24   :  { %5777 = vmatpush1.bf16.msra.mxu0 %v8588_v46  ;;  %5809 = vmatpush1.bf16.msra.mxu1 %v8589_v13  ;;  %v8599_v46 = vld [vmem:[#allocation52_spill] sm:$0xff]  ;;  %v8600_v13 = vld [vmem:[#allocation50_spill] sm:$0xff] }
 0xb25   :  { %5779 = vmatprep.subr.bf16.mxu0 %v8590_v11  ;;  %5811 = vmatprep.subr.bf16.mxu1 %v8591_v12  ;;  %v8601_v11 = vld [vmem:[#allocation53_spill] sm:$0xff]  ;;  %v8602_v12 = vld [vmem:[#allocation54_spill] sm:$0xff] }
 0xb28   :  { %5781 = vmatpush1.bf16.msra.mxu0 %v8592_v28  ;;  %5813 = vmatpush1.bf16.msra.mxu1 %v8593_v52  ;;  %v8603_v28 = vld [vmem:[#allocation56_spill] sm:$0xff] }
 0xb29   :  { %5783 = vmatprep.subr.bf16.mxu0 %v8594_v59  ;;  %5815 = vmatprep.subr.bf16.mxu1 %v8595_v19 }
 0xb2c   :  { %5785 = vmatpush1.bf16.msra.mxu0 %v8596_v61  ;;  %5817 = vmatpush1.bf16.msra.mxu1 %v8597_v49 }
 0xb2d   :  { %5787 = vmatprep.subr.bf16.mxu0 %v8598_v42  ;;  %5819 = vmatprep.subr.bf16.mxu1 %v8599_v46 }
 0xb30   :  { %5789 = vmatpush1.bf16.msra.mxu0 %v8600_v13  ;;  %5821 = vmatpush1.bf16.msra.mxu1 %v8601_v11 }
 0xb31   :  { %5823 = vmatprep.subr.bf16.mxu0 %v8602_v12  ;;  %5855 = vmatprep.subr.bf16.mxu1 %v8603_v28 }
 0xbe6   :  { %v3194_v52 = vpop.f32.mrb[10].mxu0  ;;  %v3265_v59 = vpop.f32.mrb[10].mxu1 }
 0xbe7   :  { %v6240_v19 = vadd.f32 %v3194_v52, %v8604_v18  ;;  %v3196_v21 = vpop.f32.mrb[11].mxu0  ;;  %v3267_v61 = vpop.f32.mrb[11].mxu1  ;;  %v6256_v11 = vadd.f32 %v3265_v59, %v8483_v39  ;;  %v8614_v59 = vld [vmem:[#allocation62_spill] sm:$0xff] }
 0xbe8   :  { %v6241_v49 = vadd.f32 %v3196_v21, %v8605_v50  ;;  %v6257_v13 = vadd.f32 %v3267_v61, %v8420_v35 }
 0xbe9   :  { %v4659_v62 = vmul.f32 -1.442695, %v6240_v19 }
 0xbea   :  { %v4658_v42 = vmul.f32 -1.442695, %v6241_v49  ;;  %v4660_v46 = vmul.f32 -1.442695, %v6257_v13 }
 0xbeb   :  { %6522 = vpow2.f32 %v4659_v62 }
 0xbec   :  { %6524 = vpow2.f32 %v4658_v42  ;;  %v8606_v42 = vld [vmem:[#allocation88_spill] sm:$0xff] }
 0xbed   :  { %6526 = vpow2.f32 %v4660_v46 }
 0xbee   :  { %6528 = vtanh.f32 %v6256_v11  ;;  %v8611_v11 = vld [vmem:[#allocation60_spill] sm:$0xff] }
 0xbf5   :  { %v6523_v12 = vpop.eup %6522 }
 0xbf6   :  { %v6525_v3 = vpop.eup %6524  ;;  %v3284_v28 = vadd.f32 1.0, %v6523_v12 }
 0xbf7   :  { %v3277_v31 = vadd.f32 1.0, %v6525_v3  ;;  %v6527_v52 = vpop.eup %6526  ;;  %v8609_v3 = vld [vmem:[#allocation57_spill] sm:$0xff] }
 0xbf8   :  { %6530 = vrcp.f32 %v3284_v28  ;;  %v6529_v18 = vpop.eup %6528  ;;  %v3293_v62 = vadd.f32 1.0, %v6527_v52  ;;  %v8613_v28 = vld [vmem:[#allocation61_spill] sm:$0xff]  ;;  %v8615_v52 = vld [vmem:[#allocation64_spill] sm:$0xff] }
 0xbf9   :  { %6532 = vrcp.f32 %v3277_v31  ;;  %v8608_v31 = vld [vmem:[#allocation55_spill] sm:$0xff] }
 0xbfa   :  { %6534 = vrcp.f32 %v3293_v62  ;;  %v8619_v62 = vld [vmem:[#allocation68_spill] sm:$0xff] }
 0xc02   :  { %v6531_v21 = vpop.eup %6530 }
 0xc03   :  { %v6533_v19 = vpop.eup %6532  ;;  %v3288_v49 = vmul.f32 %v6531_v21, %v6529_v18  ;;  %v8610_v18 = vld [vmem:[#allocation58_spill] sm:$0xff]  ;;  %v8616_v21 = vld [vmem:[#allocation63_spill] sm:$0xff] }
 0xc04   :  { %v3280_v50 = vmul.f32 %v6533_v19, %v8606_v42  ;;  %v6535_v13 = vpop.eup %6534  ;;  %v8617_v19 = vld [vmem:[#allocation65_spill] sm:$0xff]  ;;  %v8620_v42 = vld [vmem:[#allocation67_spill] sm:$0xff] }
 0xc06   :  { %v7816_v61 = vadd.f32 %v3288_v49, %v3280_v50  ;;  %v8612_v50 = vld [vmem:[#allocation59_spill] sm:$0xff]  ;;  %v8618_v49 = vld [vmem:[#allocation66_spill] sm:$0xff] }
 0xc08   :  { %8607 = vst [vmem:[#allocation89_spill] sm:$0xff] %v7816_v61  ;;  %6536 = vtanh.f32 %v7816_v61 }
 0xc12   :  { %v6537_v12 = vpop.eup %6536 }
 0xc13   :  { %v7819_v46 = vmul.f32 %v6537_v12, %v6535_v13  ;;  %v8621_v13 = vld [vmem:[#allocation69_spill] sm:$0xff]  ;;  %v8622_v12 = vld [vmem:[#allocation70_spill] sm:$0xff] }
 0xc15   :  { %3363 = vmatmul.mubr.f32.vlgmr.msra.gmra.mrb[26].mxu0 %v7819_v46  ;;  %3434 = vmatmul.mubr.f32.vlgmr.msra.gmra.mrb[26].mxu1 %v7819_v46 }
 0xc16   :  { %5825 = vmatpush1.bf16.msra.mxu0 %v8608_v31  ;;  %5857 = vmatpush1.bf16.msra.mxu1 %v8609_v3 }
 0xc17   :  { %5827 = vmatprep.subr.bf16.mxu0 %v8610_v18  ;;  %5859 = vmatprep.subr.bf16.mxu1 %v8611_v11  ;;  %v8640_v11 = vld [vmem:[#allocation24_spill] sm:$0xff] }
 0xc18   :  { %3532 = vmatprep.mubr.f32.mxu0 %v8349_v37  ;;  %3603 = vmatprep.mubr.f32.mxu1 %v8349_v37 }
 0xc1a   :  { %5829 = vmatpush1.bf16.msra.mxu0 %v8612_v50  ;;  %5861 = vmatpush1.bf16.msra.mxu1 %v8613_v28  ;;  %v8623_v50 = vld [vmem:[#allocation72_spill] sm:$0xff]  ;;  %v8624_v28 = vld [vmem:[#allocation71_spill] sm:$0xff] }
 0xc1b   :  { %5831 = vmatprep.subr.bf16.mxu0 %v8614_v59  ;;  %5863 = vmatprep.subr.bf16.mxu1 %v8615_v52  ;;  %v8625_v59 = vld [vmem:[#allocation73_spill] sm:$0xff]  ;;  %v8626_v52 = vld [vmem:[#allocation74_spill] sm:$0xff] }
 0xc1e   :  { %5833 = vmatpush1.bf16.msra.mxu0 %v8616_v21  ;;  %5865 = vmatpush1.bf16.msra.mxu1 %v8617_v19  ;;  %v8627_v21 = vld [vmem:[#allocation76_spill] sm:$0xff]  ;;  %v8628_v19 = vld [vmem:[#allocation75_spill] sm:$0xff] }
 0xc1f   :  { %5835 = vmatprep.subr.bf16.mxu0 %v8618_v49  ;;  %5867 = vmatprep.subr.bf16.mxu1 %v8619_v62  ;;  %v8629_v49 = vld [vmem:[#allocation77_spill] sm:$0xff]  ;;  %v8630_v62 = vld [vmem:[#allocation78_spill] sm:$0xff] }
 0xc22   :  { %5837 = vmatpush1.bf16.msra.mxu0 %v8620_v42  ;;  %5869 = vmatpush1.bf16.msra.mxu1 %v8621_v13  ;;  %v8631_v42 = vld [vmem:[#allocation80_spill] sm:$0xff]  ;;  %v8632_v13 = vld [vmem:[#allocation79_spill] sm:$0xff] }
 0xc23   :  { %5839 = vmatprep.subr.bf16.mxu0 %v8622_v12  ;;  %5871 = vmatprep.subr.bf16.mxu1 %v8623_v50  ;;  %v8633_v12 = vld [vmem:[#allocation81_spill] sm:$0xff]  ;;  %v8634_v50 = vld [vmem:[#allocation82_spill] sm:$0xff] }
 0xc26   :  { %5841 = vmatpush1.bf16.msra.mxu0 %v8624_v28  ;;  %5873 = vmatpush1.bf16.msra.mxu1 %v8625_v59  ;;  %v8635_v28 = vld [vmem:[#allocation84_spill] sm:$0xff]  ;;  %v8636_v59 = vld [vmem:[#allocation83_spill] sm:$0xff] }
 0xc27   :  { %5843 = vmatprep.subr.bf16.mxu0 %v8626_v52  ;;  %5875 = vmatprep.subr.bf16.mxu1 %v8627_v21  ;;  %v8637_v52 = vld [vmem:[#allocation86_spill] sm:$0xff]  ;;  %v8638_v21 = vld [vmem:[#allocation85_spill] sm:$0xff] }
 0xc2a   :  { %5845 = vmatpush1.bf16.msra.mxu0 %v8628_v19  ;;  %5877 = vmatpush1.bf16.msra.mxu1 %v8629_v49  ;;  %v8639_v19 = vld [vmem:[#allocation87_spill] sm:$0xff] }
 0xc2b   :  { %5847 = vmatprep.subr.bf16.mxu0 %v8630_v62  ;;  %5879 = vmatprep.subr.bf16.mxu1 %v8631_v42 }
 0xc2e   :  { %5849 = vmatpush1.bf16.msra.mxu0 %v8632_v13  ;;  %5881 = vmatpush1.bf16.msra.mxu1 %v8633_v12 }
 0xc2f   :  { %5851 = vmatprep.subr.bf16.mxu0 %v8634_v50  ;;  %5883 = vmatprep.subr.bf16.mxu1 %v8635_v28 }
 0xc32   :  { %5853 = vmatpush1.bf16.msra.mxu0 %v8636_v59  ;;  %5885 = vmatpush1.bf16.msra.mxu1 %v8637_v52 }
 0xc33   :  { %5887 = vmatprep.subr.bf16.mxu0 %v8638_v21  ;;  %5919 = vmatprep.subr.bf16.mxu1 %v8639_v19 }
 0xce8   :  { %v3364_v49 = vpop.f32.mrb[26].mxu0  ;;  %v3435_v62 = vpop.f32.mrb[26].mxu1 }
 0xce9   :  { %v6278_v42 = vadd.f32 %v3364_v49, %v8640_v11  ;;  %v3366_v18 = vpop.f32.mrb[27].mxu0  ;;  %v3437_v13 = vpop.f32.mrb[27].mxu1  ;;  %v6280_v52 = vadd.f32 %v3435_v62, %v8395_v44  ;;  %v8648_v62 = vld [vmem:[#allocation41_spill] sm:$0xff] }
 0xcea   :  { %v6279_v12 = vadd.f32 %v3366_v18, %v8457_v24  ;;  %v6281_v59 = vadd.f32 %v3437_v13, %v8394_v9 }
 0xceb   :  { %v4662_v3 = vmul.f32 -1.442695, %v6278_v42 }
 0xcec   :  { %v4661_v50 = vmul.f32 -1.442695, %v6279_v12  ;;  %v4663_v28 = vmul.f32 -1.442695, %v6281_v59 }
 0xced   :  { %6538 = vpow2.f32 %v4662_v3 }
 0xcee   :  { %6540 = vpow2.f32 %v4661_v50 }
 0xcef   :  { %6542 = vpow2.f32 %v4663_v28 }
 0xcf0   :  { %6544 = vtanh.f32 %v6280_v52  ;;  %v8646_v52 = vld [vmem:[#allocation40_spill] sm:$0xff] }
 0xcf7   :  { %v6539_v21 = vpop.eup %6538 }
 0xcf8   :  { %v6541_v31 = vpop.eup %6540  ;;  %v3454_v19 = vadd.f32 1.0, %v6539_v21 }
 0xcf9   :  { %v3447_v61 = vadd.f32 1.0, %v6541_v31  ;;  %v6543_v49 = vpop.eup %6542  ;;  %v8644_v31 = vld [vmem:[#allocation37_spill] sm:$0xff] }
 0xcfa   :  { %6546 = vrcp.f32 %v3454_v19  ;;  %v6545_v11 = vpop.eup %6544  ;;  %v3463_v3 = vadd.f32 1.0, %v6543_v49  ;;  %v8647_v19 = vld [vmem:[#allocation35_spill] sm:$0xff]  ;;  %v8649_v49 = vld [vmem:[#allocation38_spill] sm:$0xff] }
 0xcfb   :  { %6548 = vrcp.f32 %v3447_v61  ;;  %v8642_v61 = vld [vmem:[#allocation36_spill] sm:$0xff] }
 0xcfc   :  { %6550 = vrcp.f32 %v3463_v3  ;;  %v8653_v3 = vld [vmem:[#allocation42_spill] sm:$0xff] }
 0xd04   :  { %v6547_v18 = vpop.eup %6546 }
 0xd05   :  { %v6549_v42 = vpop.eup %6548  ;;  %v3458_v12 = vmul.f32 %v6547_v18, %v6545_v11  ;;  %v8645_v11 = vld [vmem:[#allocation34_spill] sm:$0xff]  ;;  %v8650_v18 = vld [vmem:[#allocation44_spill] sm:$0xff] }
 0xd06   :  { %v3450_v50 = vmul.f32 %v6549_v42, %v7738_v20  ;;  %v6551_v59 = vpop.eup %6550  ;;  %v8641_v20 = vld [vmem:[#allocation32_spill] sm:$0xff]  ;;  %v8651_v42 = vld [vmem:[#allocation39_spill] sm:$0xff] }
 0xd08   :  { %v7862_v13 = vadd.f32 %v3458_v12, %v3450_v50  ;;  %v8652_v12 = vld [vmem:[#allocation45_spill] sm:$0xff]  ;;  %v8654_v50 = vld [vmem:[#allocation48_spill] sm:$0xff] }
 0xd0a   :  { %6552 = vtanh.f32 %v7862_v13 }
 0xd14   :  { %v6553_v21 = vpop.eup %6552 }
 0xd15   :  { %v3467_v28 = vmul.f32 %v6553_v21, %v6551_v59  ;;  %v8655_v59 = vld [vmem:[#allocation43_spill] sm:$0xff]  ;;  %v8656_v21 = vld [vmem:[#allocation49_spill] sm:$0xff] }
 0xd17   :  { %3533 = vmatmul.mubr.f32.vlgmr.msra.gmra.mrb[28].mxu0 %v3467_v28  ;;  %3604 = vmatmul.mubr.f32.vlgmr.msra.gmra.mrb[28].mxu1 %v3467_v28  ;;  %v8657_v28 = vld [vmem:[#allocation46_spill] sm:$0xff] }
 0xd18   :  { %5889 = vmatpush1.bf16.msra.mxu0 %v8397_v8  ;;  %5921 = vmatpush1.bf16.msra.mxu1 %v8398_v6 }
 0xd19   :  { %5891 = vmatprep.subr.bf16.mxu0 %v8399_v2  ;;  %5923 = vmatprep.subr.bf16.mxu1 %v8400_v41 }
 0xd1a   :  { %3678 = vmatprep.mubr.f32.mxu0 %v8349_v37  ;;  %3749 = vmatprep.mubr.f32.mxu1 %v8349_v37 }
 0xd1c   :  { %5893 = vmatpush1.bf16.msra.mxu0 %v8401_v58  ;;  %5925 = vmatpush1.bf16.msra.mxu1 %v8458_v32 }
 0xd1d   :  { %5895 = vmatprep.subr.bf16.mxu0 %v8403_v47  ;;  %5927 = vmatprep.subr.bf16.mxu1 %v8404_v63 }
 0xd20   :  { %5897 = vmatpush1.bf16.msra.mxu0 %v8459_v14  ;;  %5929 = vmatpush1.bf16.msra.mxu1 %v8406_v54 }
 0xd21   :  { %5899 = vmatprep.subr.bf16.mxu0 %v8407_v53  ;;  %5931 = vmatprep.subr.bf16.mxu1 %v8408_v30 }
 0xd24   :  { %5901 = vmatpush1.bf16.msra.mxu0 %v8409_v23  ;;  %5933 = vmatpush1.bf16.msra.mxu1 %v8410_v4 }
 0xd25   :  { %5903 = vmatprep.subr.bf16.mxu0 %v8411_v25  ;;  %5935 = vmatprep.subr.bf16.mxu1 %v8412_v60 }
 0xd28   :  { %5905 = vmatpush1.bf16.msra.mxu0 %v8413_v36  ;;  %5937 = vmatpush1.bf16.msra.mxu1 %v7235_v38 }
 0xd29   :  { %5907 = vmatprep.subr.bf16.mxu0 %v7238_v16  ;;  %5939 = vmatprep.subr.bf16.mxu1 %v8414_v22 }
 0xd2c   :  { %5909 = vmatpush1.bf16.msra.mxu0 %v7244_v26  ;;  %5941 = vmatpush1.bf16.msra.mxu1 %v7247_v45 }
 0xd2d   :  { %5911 = vmatprep.subr.bf16.mxu0 %v7250_v57  ;;  %5943 = vmatprep.subr.bf16.mxu1 %v7253_v5 }
 0xd30   :  { %5913 = vmatpush1.bf16.msra.mxu0 %v7256_v27  ;;  %5945 = vmatpush1.bf16.msra.mxu1 %v7259_v10 }
 0xd31   :  { %5915 = vmatprep.subr.bf16.mxu0 %v7262_v56  ;;  %5947 = vmatprep.subr.bf16.mxu1 %v7265_v55 }
 0xd34   :  { %5917 = vmatpush1.bf16.msra.mxu0 %v7268_v0  ;;  %5949 = vmatpush1.bf16.msra.mxu1 %v7271_v15 }
 0xd35   :  { %5951 = vmatprep.subr.bf16.mxu0 %v6976_v29  ;;  %5983 = vmatprep.subr.bf16.mxu1 %v6989_v48 }
 0xd37   :  { %3679 = vmatmul.mubr.f32.vlgmr.msra.gmra.mrb[12].mxu0 %v7819_v46  ;;  %3750 = vmatmul.mubr.f32.vlgmr.msra.gmra.mrb[12].mxu1 %v7819_v46  ;;  %v8643_v46 = vld [vmem:[#allocation33_spill] sm:$0xff] }
 0xd38   :  { %5953 = vmatpush1.bf16.msra.mxu0 %v6978_v33  ;;  %5985 = vmatpush1.bf16.msra.mxu1 %v6991_v51 }
 0xd39   :  { %5955 = vmatprep.subr.bf16.mxu0 %v6980_v34  ;;  %5987 = vmatprep.subr.bf16.mxu1 %v7001_v1 }
 0xd3a   :  { %3848 = vmatprep.mubr.f32.mxu0 %v8349_v37  ;;  %3919 = vmatprep.mubr.f32.mxu1 %v8349_v37 }
 0xd3c   :  { %5957 = vmatpush1.bf16.msra.mxu0 %v6984_v40  ;;  %5989 = vmatpush1.bf16.msra.mxu1 %v7003_v7 }
 0xd3d   :  { %5959 = vmatprep.subr.bf16.mxu0 %v6987_v43  ;;  %5991 = vmatprep.subr.bf16.mxu1 %v7009_v17 }
 0xd40   :  { %5961 = vmatpush1.bf16.msra.mxu0 %v8641_v20  ;;  %5993 = vmatpush1.bf16.msra.mxu1 %v8642_v61 }
 0xd41   :  { %5963 = vmatprep.subr.bf16.mxu0 %v8643_v46  ;;  %5995 = vmatprep.subr.bf16.mxu1 %v8644_v31  ;;  %v8666_v31 = vld [vmem:[#allocation29_spill] sm:$0xff] }
 0xd44   :  { %5965 = vmatpush1.bf16.msra.mxu0 %v8645_v11  ;;  %5997 = vmatpush1.bf16.msra.mxu1 %v8646_v52  ;;  %v8665_v52 = vld [vmem:[#allocation28_spill] sm:$0xff] }
 0xd45   :  { %5967 = vmatprep.subr.bf16.mxu0 %v8647_v19  ;;  %5999 = vmatprep.subr.bf16.mxu1 %v8648_v62  ;;  %v8658_v19 = vld [vmem:[#allocation51_spill] sm:$0xff] }
 0xd46   :  { %v8659_v62 = vld [vmem:[#allocation47_spill] sm:$0xff] }
 0xd48   :  { %5969 = vmatpush1.bf16.msra.mxu0 %v8649_v49  ;;  %6001 = vmatpush1.bf16.msra.mxu1 %v8650_v18  ;;  %v8660_v49 = vld [vmem:[#allocation52_spill] sm:$0xff]  ;;  %v8661_v18 = vld [vmem:[#allocation50_spill] sm:$0xff] }
 0xd49   :  { %5971 = vmatprep.subr.bf16.mxu0 %v8651_v42  ;;  %6003 = vmatprep.subr.bf16.mxu1 %v8652_v12  ;;  %v8662_v42 = vld [vmem:[#allocation53_spill] sm:$0xff]  ;;  %v8663_v12 = vld [vmem:[#allocation54_spill] sm:$0xff] }
 0xd4c   :  { %5973 = vmatpush1.bf16.msra.mxu0 %v8653_v3  ;;  %6005 = vmatpush1.bf16.msra.mxu1 %v8654_v50  ;;  %v8664_v3 = vld [vmem:[#allocation56_spill] sm:$0xff] }
 0xd4d   :  { %5975 = vmatprep.subr.bf16.mxu0 %v8655_v59  ;;  %6007 = vmatprep.subr.bf16.mxu1 %v8656_v21 }
 0xd50   :  { %5977 = vmatpush1.bf16.msra.mxu0 %v8657_v28  ;;  %6009 = vmatpush1.bf16.msra.mxu1 %v8658_v19 }
 0xd51   :  { %5979 = vmatprep.subr.bf16.mxu0 %v8659_v62  ;;  %6011 = vmatprep.subr.bf16.mxu1 %v8660_v49 }
 0xd54   :  { %5981 = vmatpush1.bf16.msra.mxu0 %v8661_v18  ;;  %6013 = vmatpush1.bf16.msra.mxu1 %v8662_v42 }
 0xd55   :  { %6015 = vmatprep.subr.bf16.mxu0 %v8663_v12  ;;  %6047 = vmatprep.subr.bf16.mxu1 %v8664_v3 }
 0xe0a   :  { %v3680_v50 = vpop.f32.mrb[12].mxu0  ;;  %v3751_v59 = vpop.f32.mrb[12].mxu1 }
 0xe0b   :  { %v6242_v21 = vadd.f32 %v3680_v50, %v8665_v52  ;;  %v3682_v11 = vpop.f32.mrb[13].mxu0  ;;  %v3753_v28 = vpop.f32.mrb[13].mxu1  ;;  %v6258_v42 = vadd.f32 %v3751_v59, %v8483_v39 }
 0xe0c   :  { %v6243_v19 = vadd.f32 %v3682_v11, %v8666_v31  ;;  %v6259_v18 = vadd.f32 %v3753_v28, %v8420_v35 }
 0xe0d   :  { %v4665_v46 = vmul.f32 -1.442695, %v6242_v21 }
 0xe0e   :  { %v4664_v62 = vmul.f32 -1.442695, %v6243_v19  ;;  %v4666_v49 = vmul.f32 -1.442695, %v6259_v18 }
 0xe0f   :  { %6554 = vpow2.f32 %v4665_v46 }
 0xe10   :  { %6556 = vpow2.f32 %v4664_v62  ;;  %v8667_v62 = vld [vmem:[#allocation89_spill] sm:$0xff] }
 0xe11   :  { %6558 = vpow2.f32 %v4666_v49 }
 0xe12   :  { %6560 = vtanh.f32 %v6258_v42  ;;  %v8672_v42 = vld [vmem:[#allocation60_spill] sm:$0xff] }
 0xe19   :  { %v6555_v12 = vpop.eup %6554 }
 0xe1a   :  { %v6557_v61 = vpop.eup %6556  ;;  %v3770_v3 = vadd.f32 1.0, %v6555_v12  ;;  %v8674_v12 = vld [vmem:[#allocation61_spill] sm:$0xff] }
 0xe1b   :  { %v3763_v20 = vadd.f32 1.0, %v6557_v61  ;;  %v6559_v50 = vpop.eup %6558  ;;  %v8670_v61 = vld [vmem:[#allocation57_spill] sm:$0xff] }
 0xe1c   :  { %6562 = vrcp.f32 %v3770_v3  ;;  %v6561_v52 = vpop.eup %6560  ;;  %v3779_v46 = vadd.f32 1.0, %v6559_v50  ;;  %v8675_v3 = vld [vmem:[#allocation62_spill] sm:$0xff]  ;;  %v8676_v50 = vld [vmem:[#allocation64_spill] sm:$0xff] }
 0xe1d   :  { %6564 = vrcp.f32 %v3763_v20  ;;  %v8669_v20 = vld [vmem:[#allocation55_spill] sm:$0xff] }
 0xe1e   :  { %6566 = vrcp.f32 %v3779_v46  ;;  %v8680_v46 = vld [vmem:[#allocation68_spill] sm:$0xff] }
 0xe26   :  { %v6563_v11 = vpop.eup %6562 }
 0xe27   :  { %v6565_v21 = vpop.eup %6564  ;;  %v3774_v19 = vmul.f32 %v6563_v11, %v6561_v52  ;;  %v8671_v52 = vld [vmem:[#allocation58_spill] sm:$0xff]  ;;  %v8677_v11 = vld [vmem:[#allocation63_spill] sm:$0xff] }
 0xe28   :  { %v3766_v31 = vmul.f32 %v6565_v21, %v8667_v62  ;;  %v6567_v18 = vpop.eup %6566  ;;  %v8678_v21 = vld [vmem:[#allocation65_spill] sm:$0xff]  ;;  %v8681_v62 = vld [vmem:[#allocation67_spill] sm:$0xff] }
 0xe2a   :  { %v7940_v28 = vadd.f32 %v3774_v19, %v3766_v31  ;;  %v8673_v31 = vld [vmem:[#allocation59_spill] sm:$0xff]  ;;  %v8679_v19 = vld [vmem:[#allocation66_spill] sm:$0xff] }
 0xe2c   :  { %8668 = vst [vmem:[#allocation90_spill] sm:$0xff] %v7940_v28  ;;  %6568 = vtanh.f32 %v7940_v28 }
 0xe36   :  { %v6569_v59 = vpop.eup %6568 }
 0xe37   :  { %v7943_v49 = vmul.f32 %v6569_v59, %v6567_v18  ;;  %v8682_v18 = vld [vmem:[#allocation69_spill] sm:$0xff]  ;;  %v8683_v59 = vld [vmem:[#allocation70_spill] sm:$0xff] }
 0xe39   :  { %3849 = vmatmul.mubr.f32.vlgmr.msra.gmra.mrb[28].mxu0 %v7943_v49  ;;  %3920 = vmatmul.mubr.f32.vlgmr.msra.gmra.mrb[28].mxu1 %v7943_v49 }
 0xe3a   :  { %6017 = vmatpush1.bf16.msra.mxu0 %v8669_v20  ;;  %6049 = vmatpush1.bf16.msra.mxu1 %v8670_v61  ;;  %v8684_v20 = vld [vmem:[#allocation72_spill] sm:$0xff]  ;;  %v8685_v61 = vld [vmem:[#allocation71_spill] sm:$0xff] }
 0xe3b   :  { %6019 = vmatprep.subr.bf16.mxu0 %v8671_v52  ;;  %6051 = vmatprep.subr.bf16.mxu1 %v8672_v42  ;;  %v8686_v52 = vld [vmem:[#allocation73_spill] sm:$0xff]  ;;  %v8687_v42 = vld [vmem:[#allocation74_spill] sm:$0xff] }
 0xe3c   :  { %4018 = vmatprep.mubr.f32.mxu0 %v8349_v37  ;;  %4089 = vmatprep.mubr.f32.mxu1 %v8349_v37 }
 0xe3e   :  { %6021 = vmatpush1.bf16.msra.mxu0 %v8673_v31  ;;  %6053 = vmatpush1.bf16.msra.mxu1 %v8674_v12  ;;  %v8688_v31 = vld [vmem:[#allocation76_spill] sm:$0xff]  ;;  %v8689_v12 = vld [vmem:[#allocation75_spill] sm:$0xff] }
 0xe3f   :  { %6023 = vmatprep.subr.bf16.mxu0 %v8675_v3  ;;  %6055 = vmatprep.subr.bf16.mxu1 %v8676_v50  ;;  %v8690_v3 = vld [vmem:[#allocation77_spill] sm:$0xff]  ;;  %v8691_v50 = vld [vmem:[#allocation78_spill] sm:$0xff] }
 0xe42   :  { %6025 = vmatpush1.bf16.msra.mxu0 %v8677_v11  ;;  %6057 = vmatpush1.bf16.msra.mxu1 %v8678_v21  ;;  %v8692_v11 = vld [vmem:[#allocation80_spill] sm:$0xff]  ;;  %v8693_v21 = vld [vmem:[#allocation79_spill] sm:$0xff] }
 0xe43   :  { %6027 = vmatprep.subr.bf16.mxu0 %v8679_v19  ;;  %6059 = vmatprep.subr.bf16.mxu1 %v8680_v46  ;;  %v8694_v19 = vld [vmem:[#allocation81_spill] sm:$0xff]  ;;  %v8695_v46 = vld [vmem:[#allocation82_spill] sm:$0xff] }
 0xe46   :  { %6029 = vmatpush1.bf16.msra.mxu0 %v8681_v62  ;;  %6061 = vmatpush1.bf16.msra.mxu1 %v8682_v18  ;;  %v8696_v62 = vld [vmem:[#allocation84_spill] sm:$0xff]  ;;  %v8697_v18 = vld [vmem:[#allocation83_spill] sm:$0xff] }
 0xe47   :  { %6031 = vmatprep.subr.bf16.mxu0 %v8683_v59  ;;  %6063 = vmatprep.subr.bf16.mxu1 %v8684_v20  ;;  %v8698_v59 = vld [vmem:[#allocation86_spill] sm:$0xff]  ;;  %v8699_v20 = vld [vmem:[#allocation85_spill] sm:$0xff] }
 0xe4a   :  { %6033 = vmatpush1.bf16.msra.mxu0 %v8685_v61  ;;  %6065 = vmatpush1.bf16.msra.mxu1 %v8686_v52  ;;  %v8700_v61 = vld [vmem:[#allocation87_spill] sm:$0xff] }
 0xe4b   :  { %6035 = vmatprep.subr.bf16.mxu0 %v8687_v42  ;;  %6067 = vmatprep.subr.bf16.mxu1 %v8688_v31  ;;  %v8701_v31 = vld [vmem:[#allocation24_spill] sm:$0xff] }
 0xe4e   :  { %6037 = vmatpush1.bf16.msra.mxu0 %v8689_v12  ;;  %6069 = vmatpush1.bf16.msra.mxu1 %v8690_v3 }
 0xe4f   :  { %6039 = vmatprep.subr.bf16.mxu0 %v8691_v50  ;;  %6071 = vmatprep.subr.bf16.mxu1 %v8692_v11 }
 0xe52   :  { %6041 = vmatpush1.bf16.msra.mxu0 %v8693_v21  ;;  %6073 = vmatpush1.bf16.msra.mxu1 %v8694_v19 }
 0xe53   :  { %6043 = vmatprep.subr.bf16.mxu0 %v8695_v46  ;;  %6075 = vmatprep.subr.bf16.mxu1 %v8696_v62 }
 0xe56   :  { %6045 = vmatpush1.bf16.msra.mxu0 %v8697_v18  ;;  %6077 = vmatpush1.bf16.msra.mxu1 %v8698_v59 }
 0xe57   :  { %6079 = vmatprep.subr.bf16.mxu0 %v8699_v20  ;;  %6111 = vmatprep.subr.bf16.mxu1 %v8700_v61 }
 0xf0c   :  { %v3850_v52 = vpop.f32.mrb[28].mxu0  ;;  %v3921_v42 = vpop.f32.mrb[28].mxu1 }
 0xf0d   :  { %v6282_v12 = vadd.f32 %v3850_v52, %v8701_v31  ;;  %v3852_v3 = vpop.f32.mrb[29].mxu0  ;;  %v3923_v50 = vpop.f32.mrb[29].mxu1  ;;  %v6284_v18 = vadd.f32 %v3921_v42, %v8395_v44 }
 0xf0e   :  { %v6283_v11 = vadd.f32 %v3852_v3, %v8457_v24  ;;  %v6285_v46 = vadd.f32 %v3923_v50, %v8394_v9 }
 0xf0f   :  { %v4668_v21 = vmul.f32 -1.442695, %v6282_v12 }
 0xf10   :  { %v4667_v19 = vmul.f32 -1.442695, %v6283_v11  ;;  %v4669_v62 = vmul.f32 -1.442695, %v6285_v46 }
 0xf11   :  { %6570 = vpow2.f32 %v4668_v21 }
 0xf12   :  { %6572 = vpow2.f32 %v4667_v19 }
 0xf13   :  { %6574 = vpow2.f32 %v4669_v62 }
 0xf14   :  { %6576 = vtanh.f32 %v6284_v18 }
 0xf1b   :  { %v6571_v59 = vpop.eup %6570 }
 0xf1c   :  { %v6573_v20 = vpop.eup %6572  ;;  %v3940_v61 = vadd.f32 1.0, %v6571_v59  ;;  %v8726_v59 = vld [vmem:[#allocation90_spill] sm:$0xff] }
 0xf1d   :  { %v3933_v28 = vadd.f32 1.0, %v6573_v20  ;;  %v6575_v52 = vpop.eup %6574 }
 0xf1e   :  { %6578 = vrcp.f32 %v3940_v61  ;;  %v6577_v31 = vpop.eup %6576  ;;  %v3949_v21 = vadd.f32 1.0, %v6575_v52 }
 0xf1f   :  { %6580 = vrcp.f32 %v3933_v28 }
 0xf20   :  { %6582 = vrcp.f32 %v3949_v21 }
 0xf28   :  { %v6579_v3 = vpop.eup %6578 }
 0xf29   :  { %v6581_v12 = vpop.eup %6580  ;;  %v3944_v11 = vmul.f32 %v6579_v3, %v6577_v31 }
 0xf2a   :  { %v3936_v19 = vmul.f32 %v6581_v12, %v7862_v13  ;;  %v6583_v42 = vpop.eup %6582 }
 0xf2c   :  { %v7986_v50 = vadd.f32 %v3944_v11, %v3936_v19  ;;  %v8727_v11 = vld [vmem:[#allocation24_spill] sm:$0xff] }
 0xf2e   :  { %6584 = vtanh.f32 %v7986_v50 }
 0xf38   :  { %v6585_v46 = vpop.eup %6584 }
 0xf39   :  { %v3953_v62 = vmul.f32 %v6585_v46, %v6583_v42 }
 0xf3b   :  { %4019 = vmatmul.mubr.f32.vlgmr.msra.gmra.mrb[30].mxu0 %v3953_v62  ;;  %4090 = vmatmul.mubr.f32.vlgmr.msra.gmra.mrb[30].mxu1 %v3953_v62 }
 0xf3c   :  { %6081 = vmatpush1.bf16.msra.mxu0 %v8397_v8  ;;  %6113 = vmatpush1.bf16.msra.mxu1 %v8398_v6 }
 0xf3d   :  { %6083 = vmatprep.subr.bf16.mxu0 %v8399_v2  ;;  %6115 = vmatprep.subr.bf16.mxu1 %v8400_v41  ;;  %v8724_v2 = vld [vmem:[#allocation28_spill] sm:$0xff] }
 0xf3e   :  { %4164 = vmatprep.mubr.f32.mxu0 %v8349_v37  ;;  %4235 = vmatprep.mubr.f32.mxu1 %v8349_v37 }
 0xf40   :  { %6085 = vmatpush1.bf16.msra.mxu0 %v8401_v58  ;;  %6117 = vmatpush1.bf16.msra.mxu1 %v8458_v32 }
 0xf41   :  { %6087 = vmatprep.subr.bf16.mxu0 %v8403_v47  ;;  %6119 = vmatprep.subr.bf16.mxu1 %v8404_v63  ;;  %v8725_v47 = vld [vmem:[#allocation29_spill] sm:$0xff] }
 0xf44   :  { %6089 = vmatpush1.bf16.msra.mxu0 %v8459_v14  ;;  %6121 = vmatpush1.bf16.msra.mxu1 %v8406_v54 }
 0xf45   :  { %6091 = vmatprep.subr.bf16.mxu0 %v8407_v53  ;;  %6123 = vmatprep.subr.bf16.mxu1 %v8408_v30 }
 0xf48   :  { %6093 = vmatpush1.bf16.msra.mxu0 %v8409_v23  ;;  %6125 = vmatpush1.bf16.msra.mxu1 %v8410_v4 }
 0xf49   :  { %6095 = vmatprep.subr.bf16.mxu0 %v8411_v25  ;;  %6127 = vmatprep.subr.bf16.mxu1 %v8412_v60 }
 0xf4c   :  { %6097 = vmatpush1.bf16.msra.mxu0 %v8413_v36  ;;  %6129 = vmatpush1.bf16.msra.mxu1 %v7235_v38  ;;  %v8714_v38 = vld [vmem:[#allocation42_spill] sm:$0xff] }
 0xf4d   :  { %6099 = vmatprep.subr.bf16.mxu0 %v7238_v16  ;;  %6131 = vmatprep.subr.bf16.mxu1 %v8414_v22  ;;  %v8715_v16 = vld [vmem:[#allocation48_spill] sm:$0xff] }
 0xf50   :  { %6101 = vmatpush1.bf16.msra.mxu0 %v7244_v26  ;;  %6133 = vmatpush1.bf16.msra.mxu1 %v7247_v45  ;;  %v8708_v26 = vld [vmem:[#allocation35_spill] sm:$0xff] }
 0xf51   :  { %6103 = vmatprep.subr.bf16.mxu0 %v7250_v57  ;;  %6135 = vmatprep.subr.bf16.mxu1 %v7253_v5  ;;  %v8716_v45 = vld [vmem:[#allocation43_spill] sm:$0xff]  ;;  %v8717_v57 = vld [vmem:[#allocation49_spill] sm:$0xff]  ;;  %v8718_v5 = vld [vmem:[#allocation46_spill] sm:$0xff] }
 0xf54   :  { %6105 = vmatpush1.bf16.msra.mxu0 %v7256_v27  ;;  %6137 = vmatpush1.bf16.msra.mxu1 %v7259_v10  ;;  %v8713_v27 = vld [vmem:[#allocation45_spill] sm:$0xff]  ;;  %v8719_v10 = vld [vmem:[#allocation51_spill] sm:$0xff] }
 0xf55   :  { %6107 = vmatprep.subr.bf16.mxu0 %v7262_v56  ;;  %6139 = vmatprep.subr.bf16.mxu1 %v7265_v55  ;;  %v8720_v56 = vld [vmem:[#allocation47_spill] sm:$0xff]  ;;  %v8721_v55 = vld [vmem:[#allocation52_spill] sm:$0xff] }
 0xf58   :  { %6109 = vmatpush1.bf16.msra.mxu0 %v7268_v0  ;;  %6141 = vmatpush1.bf16.msra.mxu1 %v7271_v15  ;;  %v8722_v0 = vld [vmem:[#allocation50_spill] sm:$0xff]  ;;  %v8723_v15 = vld [vmem:[#allocation53_spill] sm:$0xff] }
 0xf59   :  { %6143 = vmatprep.subr.bf16.mxu0 %v6976_v29  ;;  %6175 = vmatprep.subr.bf16.mxu1 %v6989_v48  ;;  %v8702_v29 = vld [vmem:[#allocation32_spill] sm:$0xff]  ;;  %v8704_v48 = vld [vmem:[#allocation33_spill] sm:$0xff] }
 0xf5b   :  { %4165 = vmatmul.mubr.f32.vlgmr.msra.gmra.mrb[14].mxu0 %v7943_v49  ;;  %4236 = vmatmul.mubr.f32.vlgmr.msra.gmra.mrb[14].mxu1 %v7943_v49 }
 0xf5c   :  { %6145 = vmatpush1.bf16.msra.mxu0 %v6978_v33  ;;  %6177 = vmatpush1.bf16.msra.mxu1 %v6991_v51  ;;  %v8703_v33 = vld [vmem:[#allocation36_spill] sm:$0xff]  ;;  %v8706_v51 = vld [vmem:[#allocation34_spill] sm:$0xff] }
 0xf5d   :  { %6147 = vmatprep.subr.bf16.mxu0 %v6980_v34  ;;  %6179 = vmatprep.subr.bf16.mxu1 %v7001_v1  ;;  %v8705_v34 = vld [vmem:[#allocation37_spill] sm:$0xff]  ;;  %v8707_v1 = vld [vmem:[#allocation40_spill] sm:$0xff] }
 0xf5e   :  { %4334 = vmatprep.mubr.f32.mxu0 %v8349_v37  ;;  %4405 = vmatprep.mubr.f32.mxu1 %v8349_v37 }
 0xf60   :  { %6149 = vmatpush1.bf16.msra.mxu0 %v6984_v40  ;;  %6181 = vmatpush1.bf16.msra.mxu1 %v7003_v7  ;;  %v8709_v40 = vld [vmem:[#allocation41_spill] sm:$0xff]  ;;  %v8710_v7 = vld [vmem:[#allocation38_spill] sm:$0xff] }
 0xf61   :  { %6151 = vmatprep.subr.bf16.mxu0 %v6987_v43  ;;  %6183 = vmatprep.subr.bf16.mxu1 %v7009_v17  ;;  %v8711_v43 = vld [vmem:[#allocation44_spill] sm:$0xff]  ;;  %v8712_v17 = vld [vmem:[#allocation39_spill] sm:$0xff] }
 0xf64   :  { %6153 = vmatpush1.bf16.msra.mxu0 %v8702_v29  ;;  %6185 = vmatpush1.bf16.msra.mxu1 %v8703_v33 }
 0xf65   :  { %6155 = vmatprep.subr.bf16.mxu0 %v8704_v48  ;;  %6187 = vmatprep.subr.bf16.mxu1 %v8705_v34 }
 0xf68   :  { %6157 = vmatpush1.bf16.msra.mxu0 %v8706_v51  ;;  %6189 = vmatpush1.bf16.msra.mxu1 %v8707_v1 }
 0xf69   :  { %6159 = vmatprep.subr.bf16.mxu0 %v8708_v26  ;;  %6191 = vmatprep.subr.bf16.mxu1 %v8709_v40 }
 0xf6c   :  { %6161 = vmatpush1.bf16.msra.mxu0 %v8710_v7  ;;  %6193 = vmatpush1.bf16.msra.mxu1 %v8711_v43 }
 0xf6d   :  { %6163 = vmatprep.subr.bf16.mxu0 %v8712_v17  ;;  %6195 = vmatprep.subr.bf16.mxu1 %v8713_v27 }
 0xf70   :  { %6165 = vmatpush1.bf16.msra.mxu0 %v8714_v38  ;;  %6197 = vmatpush1.bf16.msra.mxu1 %v8715_v16 }
 0xf71   :  { %6167 = vmatprep.subr.bf16.mxu0 %v8716_v45  ;;  %6199 = vmatprep.subr.bf16.mxu1 %v8717_v57 }
 0xf74   :  { %6169 = vmatpush1.bf16.msra.mxu0 %v8718_v5  ;;  %6201 = vmatpush1.bf16.msra.mxu1 %v8719_v10 }
 0xf75   :  { %6171 = vmatprep.subr.bf16.mxu0 %v8720_v56  ;;  %6203 = vmatprep.subr.bf16.mxu1 %v8721_v55 }
 0xf78   :  { %6173 = vmatpush1.bf16.msra.mxu0 %v8722_v0  ;;  %6205 = vmatpush1.bf16.msra.mxu1 %v8723_v15 }
0x102e   :  { %v4166_v8 = vpop.f32.mrb[14].mxu0  ;;  %v4237_v6 = vpop.f32.mrb[14].mxu1 }
0x102f   :  { %v6244_v41 = vadd.f32 %v4166_v8, %v8724_v2  ;;  %v4168_v58 = vpop.f32.mrb[15].mxu0  ;;  %v4239_v36 = vpop.f32.mrb[15].mxu1  ;;  %v6260_v23 = vadd.f32 %v4237_v6, %v8483_v39 }
0x1030   :  { %v6245_v63 = vadd.f32 %v4168_v58, %v8725_v47  ;;  %v6261_v53 = vadd.f32 %v4239_v36, %v8420_v35  ;;  %v4676_v36 = vld [vmem:[%s8097_s7] ss:$0 sm:$0xff] }
0x1031   :  { %v4671_v22 = vmul.f32 -1.442695, %v6244_v41 }
0x1032   :  { %v4670_v54 = vmul.f32 -1.442695, %v6245_v63  ;;  %v4672_v30 = vmul.f32 -1.442695, %v6261_v53  ;;  %v4677_v63 = vld [vmem:[%s8098_s8] ss:$0 sm:$0xff] }
0x1033   :  { %6586 = vpow2.f32 %v4671_v22 }
0x1034   :  { %6588 = vpow2.f32 %v4670_v54 }
0x1035   :  { %6590 = vpow2.f32 %v4672_v30 }
0x1036   :  { %6592 = vtanh.f32 %v6260_v23 }
0x103d   :  { %v6587_v4 = vpop.eup %6586 }
0x103e   :  { %v6589_v25 = vpop.eup %6588  ;;  %v4256_v60 = vadd.f32 1.0, %v6587_v4 }
0x103f   :  { %v4249_v32 = vadd.f32 1.0, %v6589_v25  ;;  %v6591_v14 = vpop.eup %6590 }
0x1040   :  { %6594 = vrcp.f32 %v4256_v60  ;;  %v6593_v13 = vpop.eup %6592  ;;  %v4265_v18 = vadd.f32 1.0, %v6591_v14 }
0x1041   :  { %6596 = vrcp.f32 %v4249_v32 }
0x1042   :  { %6598 = vrcp.f32 %v4265_v18 }
0x104a   :  { %v6595_v28 = vpop.eup %6594 }
0x104b   :  { %v6597_v49 = vpop.eup %6596  ;;  %v4260_v31 = vmul.f32 %v6595_v28, %v6593_v13 }
0x104c   :  { %v4252_v20 = vmul.f32 %v6597_v49, %v8726_v59  ;;  %v6599_v39 = vpop.eup %6598 }
0x104e   :  { %v4261_v35 = vadd.f32 %v4260_v31, %v4252_v20 }
0x1050   :  { %6600 = vtanh.f32 %v4261_v35 }
0x105a   :  { %v6601_v61 = vpop.eup %6600 }
0x105b   :  { %v4269_v52 = vmul.f32 %v6601_v61, %v6599_v39 }
0x105d   :  { %4335 = vmatmul.mubr.f32.vlgmr.msra.gmra.mrb[30].mxu0 %v4269_v52  ;;  %4406 = vmatmul.mubr.f32.vlgmr.msra.gmra.mrb[30].mxu1 %v4269_v52 }
0x1130   :  { %v4336_v3 = vpop.f32.mrb[30].mxu0  ;;  %v4407_v12 = vpop.f32.mrb[30].mxu1 }
0x1131   :  { %v6286_v21 = vadd.f32 %v4336_v3, %v8727_v11  ;;  %v4338_v19 = vpop.f32.mrb[31].mxu0  ;;  %v4409_v42 = vpop.f32.mrb[31].mxu1  ;;  %v6288_v34 = vadd.f32 %v4407_v12, %v8395_v44  ;;  %v8728_v44 = vlaneseq }
0x1132   :  { %v6287_v46 = vadd.f32 %v4338_v19, %v8457_v24  ;;  %v6289_v33 = vadd.f32 %v4409_v42, %v8394_v9 }
0x1133   :  { %v4674_v62 = vmul.f32 -1.442695, %v6286_v21  ;;  %v4441_v45 = vand.u32 127, %v8728_v44 }
0x1134   :  { %v4673_v29 = vmul.f32 -1.442695, %v6287_v46  ;;  %v4675_v48 = vmul.f32 -1.442695, %v6289_v33 }
0x1135   :  { %6602 = vpow2.f32 %v4674_v62  ;;  %vm4442_vm2 = vcmp.lt.s32.totalorder %v4441_v45, 96 }
0x1136   :  { %6604 = vpow2.f32 %v4673_v29 }
0x1137   :  { %6606 = vpow2.f32 %v4675_v48 }
0x1138   :  { %6608 = vtanh.f32 %v6288_v34 }
0x113f   :  { %v6603_v51 = vpop.eup %6602 }
0x1140   :  { %v6605_v1 = vpop.eup %6604  ;;  %v4426_v26 = vadd.f32 1.0, %v6603_v51 }
0x1141   :  { %v4419_v40 = vadd.f32 1.0, %v6605_v1  ;;  %v6607_v7 = vpop.eup %6606 }
0x1142   :  { %6610 = vrcp.f32 %v4426_v26  ;;  %v6609_v43 = vpop.eup %6608  ;;  %v4435_v38 = vadd.f32 1.0, %v6607_v7 }
0x1143   :  { %6612 = vrcp.f32 %v4419_v40 }
0x1144   :  { %6614 = vrcp.f32 %v4435_v38 }
0x114c   :  { %v6611_v24 = vpop.eup %6610 }
0x114d   :  { %v6613_v17 = vpop.eup %6612  ;;  %v4430_v27 = vmul.f32 %v6611_v24, %v6609_v43 }
0x114e   :  { %v4422_v16 = vmul.f32 %v6613_v17, %v7986_v50  ;;  %v6615_v57 = vpop.eup %6614 }
0x1150   :  { %v4431_v9 = vadd.f32 %v4430_v27, %v4422_v16 }
0x1152   :  { %6616 = vtanh.f32 %v4431_v9 }
0x115c   :  { %v6617_v5 = vpop.eup %6616 }
0x115d   :  { %v4439_v10 = vmul.f32 %v6617_v5, %v6615_v57 }
0x115f   :  { %v4445_v56 = vsel %vm4442_vm2, %v4439_v10, 0.0 }
0x1160   :  { %4446 = vadd.xlane.f32.xlu0 %v4445_v56 }
0x11ed   :  { %v4447_v55 = vpop.xlane.xlu0 %4446 }
0x11ee   :  { %v4449_v0 = vmul.f32 0.010416667, %v4447_v55 }
0x11f0   :  { %v4450_v15 = vsub.f32 %v4445_v56, %v4449_v0 }
0x11f2   :  { %v4451_v8 = vsel %vm4442_vm2, %v4450_v15, 0.0 }
0x11f3   :  { %v4452_v6 = vmul.f32 %v4451_v8, %v4451_v8 }
0x11f5   :  { %4453 = vadd.xlane.f32.xlu0 %v4452_v6 }
0x1282   :  { %v4454_v2 = vpop.xlane.xlu0 %4453 }
0x1283   :  { %v4455_v41 = vmul.f32 0.010416667, %v4454_v2 }
0x1285   :  { %v4456_v50 = vadd.f32 1e-05, %v4455_v41 }
0x1287   :  { %6618 = vrsqrt.f32 %v4456_v50 }
0x1291   :  { %v6619_v58 = vpop.eup %6618 }
0x1292   :  { %v4458_v47 = vmul.f32 %v6619_v58, %v4451_v8 }
0x1294   :  { %v4466_v22 = vmul.f32 %v4676_v36, %v4458_v47 }
0x1296   :  { %v4474_v54 = vadd.f32 %v4677_v63, %v4466_v22 }
0x1298   :  { %v4475_v53 = vmax.f32 %v4474_v54, 0.0 }
0x1299   :  { %6736 = dma.done.wait [#allocation6 + $0x2], 2048 }
0x129a   :  { %6737 = vsyncadd [#allocation6 + $0x2], 4294965248  ;;  %v6747_v30 = vmov 0.0|0.0   ;;  %vm6748_vm3 = vmmov 0   ;;  %v4479_v23 = vld [vmem:[#allocation5] sm:$0xff]  ;;  %v4480_v4 = vld [vmem:[#allocation5 + $0x8] sm:$0xff] }
0x129b   :  { %6206 = vmatprep.subr.bf16.mxu0 %v6747_v30  ;;  %4731 = vmatprep.mubr.msk.f32.mxu0 %vm6748_vm3, %v8349_v37  ;;  %v4481_v25 = vld [vmem:[#allocation5 + $0x10] sm:$0xff]  ;;  %v6207_v60 = vpack.c.bf16 %v4480_v4, %v4479_v23  ;;  %v4482_v32 = vld [vmem:[#allocation5 + $0x18] sm:$0xff]  ;;  %v4483_v13 = vld [vmem:[#allocation5 + $0x20] sm:$0xff]  ;;  %s6749_s24 = smov [#allocation10]  }
0x129c   :  { %v6210_v14 = vpack.c.bf16 %v4482_v32, %v4481_v25  ;;  %v4484_v28 = vld [vmem:[#allocation5 + $0x28] sm:$0xff]  ;;  %v4485_v31 = vld [vmem:[#allocation5 + $0x30] sm:$0xff]  ;;  %v4486_v18 = vld [vmem:[#allocation5 + $0x38] sm:$0xff]  ;;  %s4579_s25 = sshll.u32 %s6749_s24, 4  ;;  %s4580_s25 = int_to_ptr.vmem [resolvable:$true] %s4579_s25 }
0x129d   :  { %6208 = vmatpush3.bf16.msra.mxu0 %v6207_v60  ;;  %v6213_v49 = vpack.c.bf16 %v4484_v28, %v4483_v13  ;;  %v6216_v59 = vpack.c.bf16 %v4486_v18, %v4485_v31  ;;  %v4487_v20 = vld [vmem:[#allocation5 + $0x40] sm:$0xff]  ;;  %v4488_v37 = vld [vmem:[#allocation5 + $0x48] sm:$0xff]  ;;  %v4489_v39 = vld [vmem:[#allocation5 + $0x50] sm:$0xff]  ;;  %s6708_s26 = scalar_lea.vmem %s4580_s25, 128  ;;  %p6713_p5 = scmp.lt.s32.totalorder %s4580_s25, %s4580_s25 }
0x129e   :  { %6209 = vmatprep.subr.bf16.mxu0 %v6747_v30  ;;  %v6219_v35 = vpack.c.bf16 %v4488_v37, %v4487_v20  ;;  %v4490_v61 = vld [vmem:[#allocation5 + $0x58] sm:$0xff]  ;;  %v4491_v3 = vld [vmem:[#allocation5 + $0x60] sm:$0xff]  ;;  %v4492_v12 = vld [vmem:[#allocation5 + $0x68] sm:$0xff]  ;;  %p6709_p4 = scmp.ne.s32.totalorder %s4580_s25, %s6708_s26  ;;  %p6714_p6 = scmp.lt.s32.totalorder %s6708_s26, %s6708_s26 }
0x129f   :  { %v6222_v52 = vpack.c.bf16 %v4490_v61, %v4489_v39  ;;  %v6225_v11 = vpack.c.bf16 %v4492_v12, %v4491_v3  ;;  %v4493_v21 = vld [vmem:[#allocation5 + $0x70] sm:$0xff]  ;;  %v4494_v19 = vld [vmem:[#allocation5 + $0x78] sm:$0xff]  ;;  %v4678_v46 = vld [vmem:[%s8100_s10] ss:$0 sm:$0xff] }
0x12a0   :  { %v6228_v42 = vpack.c.bf16 %v4494_v19, %v4493_v21  ;;  %p6715_p7 = por %p6714_p6, %p6713_p5 }
0x12a1   :  { %6211 = vmatpush3.bf16.msra.mxu0 %v6210_v14 }
0x12a2   :  { %6212 = vmatprep.subr.bf16.mxu0 %v6747_v30  ;;  %p6716_p8 = pnand %p6715_p7, %p6709_p4 }
0x12a5   :  { %6214 = vmatpush3.bf16.msra.mxu0 %v6213_v49 }
0x12a6   :  { %6215 = vmatprep.subr.bf16.mxu0 %v6747_v30 }
0x12a9   :  { %6217 = vmatpush3.bf16.msra.mxu0 %v6216_v59 }
0x12aa   :  { %6218 = vmatprep.subr.bf16.mxu0 %v6747_v30 }
0x12ad   :  { %6220 = vmatpush3.bf16.msra.mxu0 %v6219_v35 }
0x12ae   :  { %6221 = vmatprep.subr.bf16.mxu0 %v6747_v30 }
0x12b1   :  { %6223 = vmatpush3.bf16.msra.mxu0 %v6222_v52 }
0x12b2   :  { %6224 = vmatprep.subr.bf16.mxu0 %v6747_v30 }
0x12b5   :  { %6226 = vmatpush3.bf16.msra.mxu0 %v6225_v11 }
0x12b6   :  { %6227 = vmatprep.subr.bf16.mxu0 %v6747_v30 }
0x12b9   :  { %6229 = vmatpush3.bf16.msra.mxu0 %v6228_v42 }
0x12bc   :  { %4732 = vmatmul.mubr.f32.vlgmr.msra.gmra.mrb[32].mxu0 %v4475_v53 }
0x138f   :  { %v4568_v62 = vpop.f32.mrb[32].mxu0 }
0x1390   :  { %v4569_v29 = vadd.f32 %v4678_v46, %v4568_v62  ;;  %v4733_v33 = vpop.f32.mrb[33].mxu0 }
0x1392   :  { %4572 = vst [vmem:[#allocation10] sm:$0xff] %v4569_v29 }
0x1393   :  { %6719 = shalt.err (!%p6716_p8)
}
0x1394   :  { %s6720_s29 = scalar_lea.hbm %s8101_s11, 128 }
0x1395   :  { %p6721_p9 = scmp.ne.s32.totalorder %s8101_s11, %s6720_s29  ;;  %p6724_p10 = scmp.lt.u32.totalorder %s6720_s29, %s8101_s11 }
0x1397   :  { %p6726_p11 = pnand %p6724_p10, %p6721_p9 }
0x1399   :  { %6729 = shalt.err (!%p6726_p11)
}
0x139a   :  { %4582 = dma.vmem_to_hbm [thread:$0]  %s4580_s25, 128, %s8101_s11, [#allocation9]  }
0x139b   :  { %6738 = dma.done.wait [#allocation9], 128  }
0x139c   :  { %6739 = vsyncadd [#allocation9], 4294967168 }
0x139d   :  { %4586 = vsyncpa [#allocation8], 1 }
0x139e   :  { %4587 = vsyncpa [#allocation9], 1 }
0x139f   :  { %4588 = vsyncmov [#allocation6] }
0x13a2   :  { %s4589_s13 = vpop.sfrf %4588 }
0x13a3   :  { %p4679_p12 = scmp.ne.s32.totalorder %s4589_s13, 0 }
0x13a5   :  { %4593 = shalt.err (%p4679_p12)  }
0x13a6   :  { %4595 = vsyncmov [#allocation6 + $0x1] }
0x13a9   :  { %s4596_s15 = vpop.sfrf %4595 }
0x13aa   :  { %p4680_p13 = scmp.ne.s32.totalorder %s4596_s15, 0 }
0x13ac   :  { %4600 = shalt.err (%p4680_p13)  }
0x13ad   :  { %4602 = vsyncmov [#allocation6 + $0x2] }
0x13b0   :  { %s4603_s16 = vpop.sfrf %4602 }
0x13b1   :  { %p4681_p0 = scmp.ne.s32.totalorder %s4603_s16, 0 }
0x13b3   :  { %4607 = shalt.err (%p4681_p0)  }

</bundles_post_ra>
